<compile_context>
chip_gen: v7x
topology: tpu7x:2x2x1
jax: 0.10.0
libtpu: 0.0.40
codegen_flags: <defaults>
</compile_context>

<pallas_src>
import functools

import jax
import jax.numpy as jnp
from jax.experimental import pallas as pl
from jax.experimental.pallas import tpu as pltpu


def _input_transition_kernel(x_ref, w_ref, b_ref, rep_ref, mask_ref, o_ref, x2_ref,
                             *, K, Wp, HpWp, pad, inv_count, eps):
    """x_ref:    (1, Cp, PW)       zero-padded input, channels on sublanes, flat spatial on lanes
       w_ref:    (Cout, K^3*Cp)    fused im2col conv weight
       b_ref:    (Cout, 1)         conv bias
       rep_ref:  (Cout, Cp)        0/1 matrix implementing torch's channel repeat
       mask_ref: (1, PW)           1.0 at valid spatial positions, else 0.0
       o_ref:    (1, Cout, PW)     lane-dense output (valid only where mask==1)
       x2_ref:   (K^3*Cp, PW) f32  VMEM im2col scratch
    """
    Cp = x_ref.shape[1]
    PW = x_ref.shape[2]
    xv = x_ref[0]                                            # (Cp, PW)

    # ---- in-kernel im2col: one lane-roll (XLU) per tap, stored at aligned row blocks ----
    center = None
    k = 0
    for kd in range(K):
        for kh in range(K):
            for kw in range(K):
                off = kd * HpWp + kh * Wp + kw
                tap = xv if off == 0 else pltpu.roll(xv, shift=PW - off, axis=1)
                x2_ref[pl.ds(k * Cp, Cp), :] = tap
                if (kd, kh, kw) == (pad, pad, pad):
                    center = tap                             # residual uses original x(d,h,w)
                k += 1

    # ---- Conv3d as ONE fused MXU contraction (depth K^3*Cp), f32 accumulation ----
    conv = jnp.dot(w_ref[...], x2_ref[...],
                   preferred_element_type=jnp.float32)       # (Cout, PW)
    conv = conv + b_ref[...]                                 # cheap register add (bias)

    # ---- InstanceNorm3d (affine=False, biased variance) over valid positions ----
    m = mask_ref[...]                                        # (1, PW)
    mean = jnp.sum(conv * m, axis=1, keepdims=True) * inv_count     # (Cout, 1)
    cen = conv - mean
    var = jnp.sum(cen * cen * m, axis=1, keepdims=True) * inv_count
    normed = cen * jax.lax.rsqrt(var + eps)

    # ---- channel-repeated residual (x.repeat) via tiny 0/1 matmul, then ELU(alpha=1) ----
    resid = jnp.dot(rep_ref[...], center,
                    preferred_element_type=jnp.float32)      # (Cout, PW)
    y = normed + resid
    out = jnp.where(y > 0.0, y, jnp.exp(jnp.minimum(y, 0.0)) - 1.0)
    o_ref[0] = out.astype(o_ref.dtype)


def input_transition_forward(x, weight, bias, *, kernel_size=3, padding=1, eps=1e-5):
    """x: (N, Cin, D, H, W) f32.  weight: (Cout, Cin, K, K, K).  bias: (Cout,)."""
    N, Cin, D, H, W = x.shape
    Cout = weight.shape[0]
    K, pad = kernel_size, padding
    assert K - 1 == 2 * pad, "residual add requires 'same'-size conv output"
    r = Cout // Cin
    assert r * Cin == Cout

    Dp, Hp, Wp = D + 2 * pad, H + 2 * pad, W + 2 * pad
    HpWp = Hp * Wp
    Pflat = Dp * HpWp
    max_off = (K - 1) * (HpWp + Wp + 1)
    PW = ((Pflat + max_off + 127) // 128) * 128          # lane-dense / roll-safe width
    Cp = ((Cin + 7) // 8) * 8                            # channel rows padded to sublane tile
    KKK = K * K * K

    # ---- glue: flatten the zero-padded volume (no transposes needed in this layout) ----
    x_pad = jnp.pad(x.astype(jnp.float32),
                    ((0, 0), (0, 0), (pad, pad), (pad, pad), (pad, pad)))
    xflat = x_pad.reshape(N, Cin, Pflat)
    xflat = jnp.pad(xflat, ((0, 0), (0, Cp - Cin), (0, PW - Pflat)))     # (N, Cp, PW)

    # fused im2col weight: column ((kd*K+kh)*K+kw)*Cp + ci  <->  W[co, ci, kd, kh, kw]
    wmat = jnp.transpose(weight.astype(jnp.float32), (0, 2, 3, 4, 1))    # (Cout,K,K,K,Cin)
    wmat = jnp.pad(wmat, ((0, 0), (0, 0), (0, 0), (0, 0), (0, Cp - Cin)))
    wmat = wmat.reshape(Cout, KKK * Cp)

    bcol = bias.astype(jnp.float32).reshape(Cout, 1)

    # 0/1 matrix implementing torch's x.repeat(1, Cout//Cin, 1, 1, 1)
    rep_mat = jnp.zeros((Cout, Cp), jnp.float32)
    rep_mat = rep_mat.at[jnp.arange(Cout), jnp.arange(Cout) % Cin].set(1.0)

    # lane-dense validity mask of the flattened padded volume
    p = jnp.arange(PW)
    d_i = p // HpWp
    h_i = (p % HpWp) // Wp
    w_i = p % Wp
    mask = ((d_i < D) & (h_i < H) & (w_i < W)).astype(jnp.float32).reshape(1, PW)

    kernel = functools.partial(
        _input_transition_kernel, K=K, Wp=Wp, HpWp=HpWp, pad=pad,
        inv_count=1.0 / float(D * H * W), eps=float(eps))

    out_flat = pl.pallas_call(
        kernel,
        out_shape=jax.ShapeDtypeStruct((N, Cout, PW), jnp.float32),
        grid=(N,),
        in_specs=[
            pl.BlockSpec((1, Cp, PW), lambda n: (n, 0, 0)),
            pl.BlockSpec((Cout, KKK * Cp), lambda n: (0, 0)),
            pl.BlockSpec((Cout, 1), lambda n: (0, 0)),
            pl.BlockSpec((Cout, Cp), lambda n: (0, 0)),
            pl.BlockSpec((1, PW), lambda n: (0, 0)),
        ],
        out_specs=pl.BlockSpec((1, Cout, PW), lambda n: (n, 0, 0)),
        scratch_shapes=[pltpu.VMEM((KKK * Cp, PW), jnp.float32)],
        compiler_params=pltpu.CompilerParams(dimension_semantics=("parallel",)),
    )(xflat, wmat, bcol, rep_mat, mask)

    # glue: drop padded positions; output is already channels-first -> NCDHW directly
    out = out_flat[:, :, :Pflat].reshape(N, Cout, Dp, Hp, Wp)[:, :, :D, :H, :W]
    return out


def reference_forward(x, weight, bias, K, pad, eps=1e-5):
    """Pure-JAX reference mirroring the PyTorch module (non_linearity='elu')."""
    out = jax.lax.conv_general_dilated(
        x, weight, window_strides=(1, 1, 1), padding=[(pad, pad)] * 3,
        dimension_numbers=("NCDHW", "OIDHW", "NCDHW"),
        precision=jax.lax.Precision.HIGHEST)
    out = out + bias.reshape(1, -1, 1, 1, 1)
    mean = out.mean(axis=(2, 3, 4), keepdims=True)
    var = jnp.mean((out - mean) ** 2, axis=(2, 3, 4), keepdims=True)    # biased
    out = (out - mean) * jax.lax.rsqrt(var + eps)
    r = weight.shape[0] // x.shape[1]
    x16 = jnp.tile(x, (1, r, 1, 1, 1))
    y = out + x16
    return jnp.where(y > 0.0, y, jnp.exp(jnp.minimum(y, 0.0)) - 1.0)     # ELU(alpha=1)


if __name__ == "__main__":
    # InputTransition(in_channels=4, num_features=16, non_linearity='elu', kernel_size=3, padding=1)
    N, Cin, Cout = 2, 4, 16
    D = H = W = 8
    K, pad = 3, 1

    key = jax.random.PRNGKey(0)
    kx, kw, kb = jax.random.split(key, 3)
    x = jax.random.normal(kx, (N, Cin, D, H, W), jnp.float32)
    fan_in = Cin * K * K * K
    bound = 1.0 / (fan_in ** 0.5)
    weight = jax.random.uniform(kw, (Cout, Cin, K, K, K), jnp.float32, -bound, bound)
    bias = jax.random.uniform(kb, (Cout,), jnp.float32, -bound, bound)

    y = jax.block_until_ready(
        input_transition_forward(x, weight, bias, kernel_size=K, padding=pad))

    y_ref = reference_forward(x, weight, bias, K, pad)
    assert y.shape == (N, Cout, D, H, W)
    max_err = float(jnp.max(jnp.abs(y - y_ref)))
    assert max_err < 5e-2, f"max abs err {max_err}"
    print("KERNEL_OK")
</pallas_src>

<mosaic_0001>
module attributes {stable_mosaic.version = 11 : i64} {
  func.func @_input_transition_kernel(%arg0: i32, %arg1: memref<1x8x1280xf32, #tpu.memory_space<vmem>>, %arg2: memref<16x216xf32, #tpu.memory_space<vmem>>, %arg3: memref<16x1xf32, #tpu.memory_space<vmem>>, %arg4: memref<16x8xf32, #tpu.memory_space<vmem>>, %arg5: memref<1x1280xf32, #tpu.memory_space<vmem>>, %arg6: memref<1x16x1280xf32, #tpu.memory_space<vmem>>, %arg7: memref<216x1280xf32, #tpu.memory_space<vmem>>) attributes {dimension_semantics = [#tpu.dimension_semantics<parallel>], iteration_bounds = array<i64: 2>, scalar_prefetch = 0 : i64, scratch_operands = 1 : i64, tpu.core_type = #tpu.core_type<tc>, window_params = [{transform_indices = @transform_0, window_bounds = array<i64: 1, 8, 1280>}, {pipeline_mode = #tpu.pipeline_mode<synchronous>, transform_indices = @transform_1, window_bounds = array<i64: 16, 216>}, {pipeline_mode = #tpu.pipeline_mode<synchronous>, transform_indices = @transform_2, window_bounds = array<i64: 16, 1>}, {pipeline_mode = #tpu.pipeline_mode<synchronous>, transform_indices = @transform_3, window_bounds = array<i64: 16, 8>}, {pipeline_mode = #tpu.pipeline_mode<synchronous>, transform_indices = @transform_4, window_bounds = array<i64: 1, 1280>}, {transform_indices = @transform_5, window_bounds = array<i64: 1, 16, 1280>}]} {
    %c0 = arith.constant 0 : index
    %c0_0 = arith.constant 0 : index
    %c0_1 = arith.constant 0 : index
    %0 = vector.load %arg1[%c0, %c0_0, %c0_1] : memref<1x8x1280xf32, #tpu.memory_space<vmem>>, vector<1x8x1280xf32>
    %1 = vector.shape_cast %0 : vector<1x8x1280xf32> to vector<8x1280xf32>
    %c0_2 = arith.constant 0 : index
    %c0_3 = arith.constant 0 : index
    %2 = vector.load %arg7[%c0_2, %c0_3] : memref<216x1280xf32, #tpu.memory_space<vmem>>, vector<8x1280xf32>
    tpu.vector_store %arg7[%c0_2, %c0_3], %1 {strides = array<i32>} : memref<216x1280xf32, #tpu.memory_space<vmem>>, vector<8x1280xf32>,
    %c1279_i32 = arith.constant 1279 : i32
    %3 = tpu.dynamic_rotate %1 by %c1279_i32 dim 1 : vector<8x1280xf32>, i32 -> vector<8x1280xf32>
    %c8 = arith.constant 8 : index
    %c0_4 = arith.constant 0 : index
    %4 = vector.load %arg7[%c8, %c0_4] : memref<216x1280xf32, #tpu.memory_space<vmem>>, vector<8x1280xf32>
    tpu.vector_store %arg7[%c8, %c0_4], %3 {strides = array<i32>} : memref<216x1280xf32, #tpu.memory_space<vmem>>, vector<8x1280xf32>,
    %c1278_i32 = arith.constant 1278 : i32
    %5 = tpu.dynamic_rotate %1 by %c1278_i32 dim 1 : vector<8x1280xf32>, i32 -> vector<8x1280xf32>
    %c16 = arith.constant 16 : index
    %c0_5 = arith.constant 0 : index
    %6 = vector.load %arg7[%c16, %c0_5] : memref<216x1280xf32, #tpu.memory_space<vmem>>, vector<8x1280xf32>
    tpu.vector_store %arg7[%c16, %c0_5], %5 {strides = array<i32>} : memref<216x1280xf32, #tpu.memory_space<vmem>>, vector<8x1280xf32>,
    %c1270_i32 = arith.constant 1270 : i32
    %7 = tpu.dynamic_rotate %1 by %c1270_i32 dim 1 : vector<8x1280xf32>, i32 -> vector<8x1280xf32>
    %c24 = arith.constant 24 : index
    %c0_6 = arith.constant 0 : index
    %8 = vector.load %arg7[%c24, %c0_6] : memref<216x1280xf32, #tpu.memory_space<vmem>>, vector<8x1280xf32>
    tpu.vector_store %arg7[%c24, %c0_6], %7 {strides = array<i32>} : memref<216x1280xf32, #tpu.memory_space<vmem>>, vector<8x1280xf32>,
    %c1269_i32 = arith.constant 1269 : i32
    %9 = tpu.dynamic_rotate %1 by %c1269_i32 dim 1 : vector<8x1280xf32>, i32 -> vector<8x1280xf32>
    %c32 = arith.constant 32 : index
    %c0_7 = arith.constant 0 : index
    %10 = vector.load %arg7[%c32, %c0_7] : memref<216x1280xf32, #tpu.memory_space<vmem>>, vector<8x1280xf32>
    tpu.vector_store %arg7[%c32, %c0_7], %9 {strides = array<i32>} : memref<216x1280xf32, #tpu.memory_space<vmem>>, vector<8x1280xf32>,
    %c1268_i32 = arith.constant 1268 : i32
    %11 = tpu.dynamic_rotate %1 by %c1268_i32 dim 1 : vector<8x1280xf32>, i32 -> vector<8x1280xf32>
    %c40 = arith.constant 40 : index
    %c0_8 = arith.constant 0 : index
    %12 = vector.load %arg7[%c40, %c0_8] : memref<216x1280xf32, #tpu.memory_space<vmem>>, vector<8x1280xf32>
    tpu.vector_store %arg7[%c40, %c0_8], %11 {strides = array<i32>} : memref<216x1280xf32, #tpu.memory_space<vmem>>, vector<8x1280xf32>,
    %c1260_i32 = arith.constant 1260 : i32
    %13 = tpu.dynamic_rotate %1 by %c1260_i32 dim 1 : vector<8x1280xf32>, i32 -> vector<8x1280xf32>
    %c48 = arith.constant 48 : index
    %c0_9 = arith.constant 0 : index
    %14 = vector.load %arg7[%c48, %c0_9] : memref<216x1280xf32, #tpu.memory_space<vmem>>, vector<8x1280xf32>
    tpu.vector_store %arg7[%c48, %c0_9], %13 {strides = array<i32>} : memref<216x1280xf32, #tpu.memory_space<vmem>>, vector<8x1280xf32>,
    %c1259_i32 = arith.constant 1259 : i32
    %15 = tpu.dynamic_rotate %1 by %c1259_i32 dim 1 : vector<8x1280xf32>, i32 -> vector<8x1280xf32>
    %c56 = arith.constant 56 : index
    %c0_10 = arith.constant 0 : index
    %16 = vector.load %arg7[%c56, %c0_10] : memref<216x1280xf32, #tpu.memory_space<vmem>>, vector<8x1280xf32>
    tpu.vector_store %arg7[%c56, %c0_10], %15 {strides = array<i32>} : memref<216x1280xf32, #tpu.memory_space<vmem>>, vector<8x1280xf32>,
    %c1258_i32 = arith.constant 1258 : i32
    %17 = tpu.dynamic_rotate %1 by %c1258_i32 dim 1 : vector<8x1280xf32>, i32 -> vector<8x1280xf32>
    %c64 = arith.constant 64 : index
    %c0_11 = arith.constant 0 : index
    %18 = vector.load %arg7[%c64, %c0_11] : memref<216x1280xf32, #tpu.memory_space<vmem>>, vector<8x1280xf32>
    tpu.vector_store %arg7[%c64, %c0_11], %17 {strides = array<i32>} : memref<216x1280xf32, #tpu.memory_space<vmem>>, vector<8x1280xf32>,
    %c1180_i32 = arith.constant 1180 : i32
    %19 = tpu.dynamic_rotate %1 by %c1180_i32 dim 1 : vector<8x1280xf32>, i32 -> vector<8x1280xf32>
    %c72 = arith.constant 72 : index
    %c0_12 = arith.constant 0 : index
    %20 = vector.load %arg7[%c72, %c0_12] : memref<216x1280xf32, #tpu.memory_space<vmem>>, vector<8x1280xf32>
    tpu.vector_store %arg7[%c72, %c0_12], %19 {strides = array<i32>} : memref<216x1280xf32, #tpu.memory_space<vmem>>, vector<8x1280xf32>,
    %c1179_i32 = arith.constant 1179 : i32
    %21 = tpu.dynamic_rotate %1 by %c1179_i32 dim 1 : vector<8x1280xf32>, i32 -> vector<8x1280xf32>
    %c80 = arith.constant 80 : index
    %c0_13 = arith.constant 0 : index
    %22 = vector.load %arg7[%c80, %c0_13] : memref<216x1280xf32, #tpu.memory_space<vmem>>, vector<8x1280xf32>
    tpu.vector_store %arg7[%c80, %c0_13], %21 {strides = array<i32>} : memref<216x1280xf32, #tpu.memory_space<vmem>>, vector<8x1280xf32>,
    %c1178_i32 = arith.constant 1178 : i32
    %23 = tpu.dynamic_rotate %1 by %c1178_i32 dim 1 : vector<8x1280xf32>, i32 -> vector<8x1280xf32>
    %c88 = arith.constant 88 : index
    %c0_14 = arith.constant 0 : index
    %24 = vector.load %arg7[%c88, %c0_14] : memref<216x1280xf32, #tpu.memory_space<vmem>>, vector<8x1280xf32>
    tpu.vector_store %arg7[%c88, %c0_14], %23 {strides = array<i32>} : memref<216x1280xf32, #tpu.memory_space<vmem>>, vector<8x1280xf32>,
    %c1170_i32 = arith.constant 1170 : i32
    %25 = tpu.dynamic_rotate %1 by %c1170_i32 dim 1 : vector<8x1280xf32>, i32 -> vector<8x1280xf32>
    %c96 = arith.constant 96 : index
    %c0_15 = arith.constant 0 : index
    %26 = vector.load %arg7[%c96, %c0_15] : memref<216x1280xf32, #tpu.memory_space<vmem>>, vector<8x1280xf32>
    tpu.vector_store %arg7[%c96, %c0_15], %25 {strides = array<i32>} : memref<216x1280xf32, #tpu.memory_space<vmem>>, vector<8x1280xf32>,
    %c1169_i32 = arith.constant 1169 : i32
    %27 = tpu.dynamic_rotate %1 by %c1169_i32 dim 1 : vector<8x1280xf32>, i32 -> vector<8x1280xf32>
    %c104 = arith.constant 104 : index
    %c0_16 = arith.constant 0 : index
    %28 = vector.load %arg7[%c104, %c0_16] : memref<216x1280xf32, #tpu.memory_space<vmem>>, vector<8x1280xf32>
    tpu.vector_store %arg7[%c104, %c0_16], %27 {strides = array<i32>} : memref<216x1280xf32, #tpu.memory_space<vmem>>, vector<8x1280xf32>,
    %c1168_i32 = arith.constant 1168 : i32
    %29 = tpu.dynamic_rotate %1 by %c1168_i32 dim 1 : vector<8x1280xf32>, i32 -> vector<8x1280xf32>
    %c112 = arith.constant 112 : index
    %c0_17 = arith.constant 0 : index
    %30 = vector.load %arg7[%c112, %c0_17] : memref<216x1280xf32, #tpu.memory_space<vmem>>, vector<8x1280xf32>
    tpu.vector_store %arg7[%c112, %c0_17], %29 {strides = array<i32>} : memref<216x1280xf32, #tpu.memory_space<vmem>>, vector<8x1280xf32>,
    %c1160_i32 = arith.constant 1160 : i32
    %31 = tpu.dynamic_rotate %1 by %c1160_i32 dim 1 : vector<8x1280xf32>, i32 -> vector<8x1280xf32>
    %c120 = arith.constant 120 : index
    %c0_18 = arith.constant 0 : index
    %32 = vector.load %arg7[%c120, %c0_18] : memref<216x1280xf32, #tpu.memory_space<vmem>>, vector<8x1280xf32>
    tpu.vector_store %arg7[%c120, %c0_18], %31 {strides = array<i32>} : memref<216x1280xf32, #tpu.memory_space<vmem>>, vector<8x1280xf32>,
    %c1159_i32 = arith.constant 1159 : i32
    %33 = tpu.dynamic_rotate %1 by %c1159_i32 dim 1 : vector<8x1280xf32>, i32 -> vector<8x1280xf32>
    %c128 = arith.constant 128 : index
    %c0_19 = arith.constant 0 : index
    %34 = vector.load %arg7[%c128, %c0_19] : memref<216x1280xf32, #tpu.memory_space<vmem>>, vector<8x1280xf32>
    tpu.vector_store %arg7[%c128, %c0_19], %33 {strides = array<i32>} : memref<216x1280xf32, #tpu.memory_space<vmem>>, vector<8x1280xf32>,
    %c1158_i32 = arith.constant 1158 : i32
    %35 = tpu.dynamic_rotate %1 by %c1158_i32 dim 1 : vector<8x1280xf32>, i32 -> vector<8x1280xf32>
    %c136 = arith.constant 136 : index
    %c0_20 = arith.constant 0 : index
    %36 = vector.load %arg7[%c136, %c0_20] : memref<216x1280xf32, #tpu.memory_space<vmem>>, vector<8x1280xf32>
    tpu.vector_store %arg7[%c136, %c0_20], %35 {strides = array<i32>} : memref<216x1280xf32, #tpu.memory_space<vmem>>, vector<8x1280xf32>,
    %c1080_i32 = arith.constant 1080 : i32
    %37 = tpu.dynamic_rotate %1 by %c1080_i32 dim 1 : vector<8x1280xf32>, i32 -> vector<8x1280xf32>
    %c144 = arith.constant 144 : index
    %c0_21 = arith.constant 0 : index
    %38 = vector.load %arg7[%c144, %c0_21] : memref<216x1280xf32, #tpu.memory_space<vmem>>, vector<8x1280xf32>
    tpu.vector_store %arg7[%c144, %c0_21], %37 {strides = array<i32>} : memref<216x1280xf32, #tpu.memory_space<vmem>>, vector<8x1280xf32>,
    %c1079_i32 = arith.constant 1079 : i32
    %39 = tpu.dynamic_rotate %1 by %c1079_i32 dim 1 : vector<8x1280xf32>, i32 -> vector<8x1280xf32>
    %c152 = arith.constant 152 : index
    %c0_22 = arith.constant 0 : index
    %40 = vector.load %arg7[%c152, %c0_22] : memref<216x1280xf32, #tpu.memory_space<vmem>>, vector<8x1280xf32>
    tpu.vector_store %arg7[%c152, %c0_22], %39 {strides = array<i32>} : memref<216x1280xf32, #tpu.memory_space<vmem>>, vector<8x1280xf32>,
    %c1078_i32 = arith.constant 1078 : i32
    %41 = tpu.dynamic_rotate %1 by %c1078_i32 dim 1 : vector<8x1280xf32>, i32 -> vector<8x1280xf32>
    %c160 = arith.constant 160 : index
    %c0_23 = arith.constant 0 : index
    %42 = vector.load %arg7[%c160, %c0_23] : memref<216x1280xf32, #tpu.memory_space<vmem>>, vector<8x1280xf32>
    tpu.vector_store %arg7[%c160, %c0_23], %41 {strides = array<i32>} : memref<216x1280xf32, #tpu.memory_space<vmem>>, vector<8x1280xf32>,
    %c1070_i32 = arith.constant 1070 : i32
    %43 = tpu.dynamic_rotate %1 by %c1070_i32 dim 1 : vector<8x1280xf32>, i32 -> vector<8x1280xf32>
    %c168 = arith.constant 168 : index
    %c0_24 = arith.constant 0 : index
    %44 = vector.load %arg7[%c168, %c0_24] : memref<216x1280xf32, #tpu.memory_space<vmem>>, vector<8x1280xf32>
    tpu.vector_store %arg7[%c168, %c0_24], %43 {strides = array<i32>} : memref<216x1280xf32, #tpu.memory_space<vmem>>, vector<8x1280xf32>,
    %c1069_i32 = arith.constant 1069 : i32
    %45 = tpu.dynamic_rotate %1 by %c1069_i32 dim 1 : vector<8x1280xf32>, i32 -> vector<8x1280xf32>
    %c176 = arith.constant 176 : index
    %c0_25 = arith.constant 0 : index
    %46 = vector.load %arg7[%c176, %c0_25] : memref<216x1280xf32, #tpu.memory_space<vmem>>, vector<8x1280xf32>
    tpu.vector_store %arg7[%c176, %c0_25], %45 {strides = array<i32>} : memref<216x1280xf32, #tpu.memory_space<vmem>>, vector<8x1280xf32>,
    %c1068_i32 = arith.constant 1068 : i32
    %47 = tpu.dynamic_rotate %1 by %c1068_i32 dim 1 : vector<8x1280xf32>, i32 -> vector<8x1280xf32>
    %c184 = arith.constant 184 : index
    %c0_26 = arith.constant 0 : index
    %48 = vector.load %arg7[%c184, %c0_26] : memref<216x1280xf32, #tpu.memory_space<vmem>>, vector<8x1280xf32>
    tpu.vector_store %arg7[%c184, %c0_26], %47 {strides = array<i32>} : memref<216x1280xf32, #tpu.memory_space<vmem>>, vector<8x1280xf32>,
    %c1060_i32 = arith.constant 1060 : i32
    %49 = tpu.dynamic_rotate %1 by %c1060_i32 dim 1 : vector<8x1280xf32>, i32 -> vector<8x1280xf32>
    %c192 = arith.constant 192 : index
    %c0_27 = arith.constant 0 : index
    %50 = vector.load %arg7[%c192, %c0_27] : memref<216x1280xf32, #tpu.memory_space<vmem>>, vector<8x1280xf32>
    tpu.vector_store %arg7[%c192, %c0_27], %49 {strides = array<i32>} : memref<216x1280xf32, #tpu.memory_space<vmem>>, vector<8x1280xf32>,
    %c1059_i32 = arith.constant 1059 : i32
    %51 = tpu.dynamic_rotate %1 by %c1059_i32 dim 1 : vector<8x1280xf32>, i32 -> vector<8x1280xf32>
    %c200 = arith.constant 200 : index
    %c0_28 = arith.constant 0 : index
    %52 = vector.load %arg7[%c200, %c0_28] : memref<216x1280xf32, #tpu.memory_space<vmem>>, vector<8x1280xf32>
    tpu.vector_store %arg7[%c200, %c0_28], %51 {strides = array<i32>} : memref<216x1280xf32, #tpu.memory_space<vmem>>, vector<8x1280xf32>,
    %c1058_i32 = arith.constant 1058 : i32
    %53 = tpu.dynamic_rotate %1 by %c1058_i32 dim 1 : vector<8x1280xf32>, i32 -> vector<8x1280xf32>
    %c208 = arith.constant 208 : index
    %c0_29 = arith.constant 0 : index
    %54 = vector.load %arg7[%c208, %c0_29] : memref<216x1280xf32, #tpu.memory_space<vmem>>, vector<8x1280xf32>
    tpu.vector_store %arg7[%c208, %c0_29], %53 {strides = array<i32>} : memref<216x1280xf32, #tpu.memory_space<vmem>>, vector<8x1280xf32>,
    %c0_30 = arith.constant 0 : index
    %c0_31 = arith.constant 0 : index
    %55 = vector.load %arg2[%c0_30, %c0_31] : memref<16x216xf32, #tpu.memory_space<vmem>>, vector<16x216xf32>
    %c0_32 = arith.constant 0 : index
    %c0_33 = arith.constant 0 : index
    %56 = vector.load %arg7[%c0_32, %c0_33] : memref<216x1280xf32, #tpu.memory_space<vmem>>, vector<216x1280xf32>
    %cst = arith.constant dense<0.000000e+00> : vector<16x1280xf32>
    %57 = tpu.matmul %55, %56, %cst {dimension_numbers = #tpu.dot_dimension_numbers<[1], [0], [0], [1], [0, 0, 1, 1], [], []>} : vector<16x216xf32>, vector<216x1280xf32>, vector<16x1280xf32> -> vector<16x1280xf32>
    %c0_34 = arith.constant 0 : index
    %c0_35 = arith.constant 0 : index
    %58 = vector.load %arg3[%c0_34, %c0_35] : memref<16x1xf32, #tpu.memory_space<vmem>>, vector<16x1xf32>
    %59 = vector.broadcast %58 : vector<16x1xf32> to vector<16x1280xf32>
    %60 = arith.addf %57, %59 : vector<16x1280xf32>
    %c0_36 = arith.constant 0 : index
    %c0_37 = arith.constant 0 : index
    %61 = vector.load %arg5[%c0_36, %c0_37] : memref<1x1280xf32, #tpu.memory_space<vmem>>, vector<1x1280xf32>
    %62 = vector.broadcast %61 : vector<1x1280xf32> to vector<16x1280xf32>
    %63 = arith.mulf %60, %62 : vector<16x1280xf32>
    %cst_38 = arith.constant dense<0.000000e+00> : vector<16xf32>
    %64 = vector.multi_reduction <add>, %63, %cst_38 [1] : vector<16x1280xf32> to vector<16xf32>
    %65 = vector.shape_cast %64 : vector<16xf32> to vector<16x1xf32>
    %cst_39 = arith.constant 0.001953125 : f32
    %66 = vector.broadcast %cst_39 : f32 to vector<16x1xf32>
    %67 = arith.mulf %65, %66 : vector<16x1xf32>
    %68 = vector.broadcast %67 : vector<16x1xf32> to vector<16x1280xf32>
    %69 = arith.subf %60, %68 : vector<16x1280xf32>
    %70 = arith.mulf %69, %69 : vector<16x1280xf32>
    %71 = vector.broadcast %61 : vector<1x1280xf32> to vector<16x1280xf32>
    %72 = arith.mulf %70, %71 : vector<16x1280xf32>
    %cst_40 = arith.constant dense<0.000000e+00> : vector<16xf32>
    %73 = vector.multi_reduction <add>, %72, %cst_40 [1] : vector<16x1280xf32> to vector<16xf32>
    %74 = vector.shape_cast %73 : vector<16xf32> to vector<16x1xf32>
    %cst_41 = arith.constant 0.001953125 : f32
    %75 = vector.broadcast %cst_41 : f32 to vector<16x1xf32>
    %76 = arith.mulf %74, %75 : vector<16x1xf32>
    %cst_42 = arith.constant 9.99999974E-6 : f32
    %77 = vector.broadcast %cst_42 : f32 to vector<16x1xf32>
    %78 = arith.addf %76, %77 : vector<16x1xf32>
    %79 = math.rsqrt %78 : vector<16x1xf32>
    %80 = vector.broadcast %79 : vector<16x1xf32> to vector<16x1280xf32>
    %81 = arith.mulf %69, %80 : vector<16x1280xf32>
    %c0_43 = arith.constant 0 : index
    %c0_44 = arith.constant 0 : index
    %82 = vector.load %arg4[%c0_43, %c0_44] : memref<16x8xf32, #tpu.memory_space<vmem>>, vector<16x8xf32>
    %cst_45 = arith.constant dense<0.000000e+00> : vector<16x1280xf32>
    %83 = tpu.matmul %82, %27, %cst_45 {dimension_numbers = #tpu.dot_dimension_numbers<[1], [0], [0], [1], [0, 0, 1, 1], [], []>} : vector<16x8xf32>, vector<8x1280xf32>, vector<16x1280xf32> -> vector<16x1280xf32>
    %84 = arith.addf %81, %83 : vector<16x1280xf32>
    %cst_46 = arith.constant 0.000000e+00 : f32
    %85 = vector.broadcast %cst_46 : f32 to vector<16x1280xf32>
    %86 = arith.cmpf ogt, %84, %85 : vector<16x1280xf32>
    %cst_47 = arith.constant 0.000000e+00 : f32
    %87 = vector.broadcast %cst_47 : f32 to vector<16x1280xf32>
    %88 = arith.minimumf %84, %87 : vector<16x1280xf32>
    %89 = math.exp %88 : vector<16x1280xf32>
    %cst_48 = arith.constant 1.000000e+00 : f32
    %90 = vector.broadcast %cst_48 : f32 to vector<16x1280xf32>
    %91 = arith.subf %89, %90 : vector<16x1280xf32>
    %92 = arith.select %86, %84, %91 : vector<16x1280xi1>, vector<16x1280xf32>
    %c0_49 = arith.constant 0 : index
    %c0_50 = arith.constant 0 : index
    %c0_51 = arith.constant 0 : index
    %93 = vector.load %arg6[%c0_49, %c0_50, %c0_51] : memref<1x16x1280xf32, #tpu.memory_space<vmem>>, vector<1x16x1280xf32>
    %94 = vector.shape_cast %93 : vector<1x16x1280xf32> to vector<16x1280xf32>
    %95 = vector.shape_cast %92 : vector<16x1280xf32> to vector<1x16x1280xf32>
    tpu.vector_store %arg6[%c0_49, %c0_50, %c0_51], %95 {strides = array<i32>} : memref<1x16x1280xf32, #tpu.memory_space<vmem>>, vector<1x16x1280xf32>,
    return
  }
  func.func @transform_0(%arg0: i32) -> (i32, i32, i32) {
    %c0_i32 = arith.constant 0 : i32
    %c0_i32_0 = arith.constant 0 : i32
    %c0_i32_1 = arith.constant 0 : i32
    return %arg0, %c0_i32, %c0_i32_0 : i32, i32, i32
  }
  func.func @transform_1(%arg0: i32) -> (i32, i32) {
    %c0_i32 = arith.constant 0 : i32
    %c0_i32_0 = arith.constant 0 : i32
    %c0_i32_1 = arith.constant 0 : i32
    return %c0_i32, %c0_i32_0 : i32, i32
  }
  func.func @transform_2(%arg0: i32) -> (i32, i32) {
    %c0_i32 = arith.constant 0 : i32
    %c0_i32_0 = arith.constant 0 : i32
    %c0_i32_1 = arith.constant 0 : i32
    return %c0_i32, %c0_i32_0 : i32, i32
  }
  func.func @transform_3(%arg0: i32) -> (i32, i32) {
    %c0_i32 = arith.constant 0 : i32
    %c0_i32_0 = arith.constant 0 : i32
    %c0_i32_1 = arith.constant 0 : i32
    return %c0_i32, %c0_i32_0 : i32, i32
  }
  func.func @transform_4(%arg0: i32) -> (i32, i32) {
    %c0_i32 = arith.constant 0 : i32
    %c0_i32_0 = arith.constant 0 : i32
    %c0_i32_1 = arith.constant 0 : i32
    return %c0_i32, %c0_i32_0 : i32, i32
  }
  func.func @transform_5(%arg0: i32) -> (i32, i32, i32) {
    %c0_i32 = arith.constant 0 : i32
    %c0_i32_0 = arith.constant 0 : i32
    %c0_i32_1 = arith.constant 0 : i32
    return %arg0, %c0_i32, %c0_i32_0 : i32, i32, i32
  }
}

</mosaic_0001>

<bundles_post_ra>
// kernel: tpu_custom_call.1
= control target key start
LH: loop header
LB: loop body
LE: loop exit
PB: predicated region body
PF: predicated region fallthrough
CT: control target
= control target key end

     0   :  { %s6207_s0 = inlined_call_operand.hbm [shape: f32[2,8,1280], index: 0, kind: input, shape index: {}]   ;;  %s6208_s1 = inlined_call_operand.vmem [shape: f32[16,216], index: 1, kind: input, shape index: {}]   ;;  %s6209_s2 = inlined_call_operand.vmem [shape: f32[16,1], index: 2, kind: input, shape index: {}]   ;;  %s6210_s3 = inlined_call_operand.vmem [shape: f32[16,8], index: 3, kind: input, shape index: {}]   ;;  %s6211_s4 = inlined_call_operand.vmem [shape: f32[1,1280], index: 4, kind: input, shape index: {}]   ;;  %s6212_s5 = inlined_call_operand.hbm [shape: f32[2,16,1280], index: 5, kind: output, shape index: {}]  }
   0x1   :  { %6372 = sst [smem:[#allocation47_spill]] %s6207_s0 }
   0x2   :  { %10 = vsyncpa [#allocation4], 0 }
   0x3   :  { %12 = vsyncpa [#allocation4 + $0x1], 0 }
   0x4   :  { %13 = vsyncpa [#allocation5], 0 }
   0x5   :  { %15 = vsyncpa [#allocation5 + $0x1], 0  ;;  %s3998_s18 = smov 0   ;;  %s4000_s19 = smov 0  }
   0x6   :  { %s4002_s20 = smov 0   ;;  %s4004_s21 = smov 0  }
   0x7 LB: > { %6373 = sst [smem:[#allocation9_spill]] %s3926_s19  ;;  %s4019_s22 = sadd.s32 4294967295, %s3934_s21   ;;  %s3934_s21 = sphi %s4004_s21, %s6661_s21   ;;  %s3930_s20 = sphi %s4002_s20, %s6664_s20   ;;  %s3926_s19 = sphi %s4000_s19, %s6663_s19   ;;  %s3922_s18 = sphi %s3998_s18, %s6662_s18  }
   0x8   : > { %6374 = sst [smem:[#allocation10_spill]] %s3930_s20  ;;  %s2854_s23 = sadd.s32 4294967294, %s3934_s21  }
   0x9   : > { %s4023_s24 = sadd.s32 1, %s3934_s21   ;;  %s28_s25 = sadd.s32 1, %s3930_s20 }
   0xa   : > { %6375 = sst [smem:[#allocation11_spill]] %s4023_s24  ;;  %s25_s26 = ssub.s32 %s3934_s21, %s4023_s24 }
   0xb   : > { %p35_p0 = scmp.ne.s32.totalorder %s3930_s20, %s3926_s19  ;;  %p26_p1 = scmp.eq.s32.totalorder %s25_s26, 0 }
   0xc   : > { %p36_p2 = scmp.eq.s32.totalorder %s3934_s21, 0  ;;  %p41_p3 = scmp.ne.s32.totalorder %s3926_s19, %s3922_s18 }
   0xd   : > { %p42_p4 = scmp.eq.s32.totalorder %s4019_s22, 0  ;;  %p149_p7 = scmp.eq.s32.totalorder %s4019_s22, 1 }
   0xe   : > { %s4035_s27 = scalar_select %p26_p1, %s3930_s20, %s28_s25  }
   0xf   : > { %p37_p5 = por %p36_p2, %p35_p0  ;;  %p4037_p6 = por %p42_p4, %p41_p3 }
  0x10   : > { %6376 = sst [smem:[#allocation12_spill]] %s4035_s27  ;;  %p155_p8 = scmp.eq.s32.totalorder %s2854_s23, 1 }
  0x11   : > { %p3179_p10 = scmp.lt.s32.totalorder %s3934_s21, 2  ;;  %p4044_p11 = por %p149_p7, %p35_p0 }
  0x12   : > { %p4048_p12 = por %p155_p8, %p41_p3  ;;  %s187_s6 = sand.u32 1, %s3930_s20  }
  0x13   : > { %s6378_s29 = scalar_select %p4044_p11, 1, 0 }
  0x14   : > { %s6379_s30 = scalar_select %p4048_p12, 1, 0 }
  0x15   : > { %s3163_s7 = smul.u32 1280, %s3934_s21  ;;  %s6380_s0 = sld [smem:[#allocation47_spill]] }
  0x16   : > { %s3162_s8 = smul.u32 80, %s187_s6  ;;  %p4059_p13 = pnand %p3179_p10, %p37_p5 }
  0x17   : > { %s188_s15 = scalar_lea.sflag [#allocation4], %s187_s6 }
  0x18   : > { %s191_s13 = scalar_lea.vmem [#allocation3], %s3162_s8  ;;  %p3840_p3 = pneg %p4059_p13 }
  0x19   : > { %s199_s14 = sshll.u32 %s191_s13, 4  ;;  %s4064_s14 = int_to_ptr.vmem [resolvable:$true] %s199_s14 }
  0x1b   : > { %s4057_s11 = scalar_lea.hbm %s6380_s0, %s3163_s7  ;;  %s3843_s25 = scalar_lea.hbm %s6380_s0, 2560 }
  0x1c   : > { %s3838_s16 = scalar_lea.hbm %s4057_s11, 1280  ;;  %p3844_p7 = scmp.lt.u32.totalorder %s4057_s11, %s6380_s0 }
  0x1d   : > { %p3839_p2 = scmp.ne.s32.totalorder %s4057_s11, %s3838_s16  ;;  %p3845_p8 = scmp.lt.u32.totalorder %s3843_s25, %s3838_s16 }
  0x1e   : > { %p3847_p9 = scmp.lt.u32.totalorder %s3838_s16, %s4057_s11 }
  0x1f   : > { %p3841_p4 = pnand %p3840_p3, %p3839_p2  ;;  %p3846_p10 = por %p3845_p8, %p3844_p7 }
  0x21   : > { %p3842_p5 = pneg %p3841_p4  ;;  %p3848_p0 = por %p3847_p9, %p3846_p10 }
  0x23   : > { %p3849_p1 = pnand %p3848_p0, %p3842_p5 }
  0x25   : > { %3852 = shalt.err (!%p3849_p1)
}
  0x26   : > { %s3853_s6 = scalar_lea.vmem %s4064_s14, 1280  ;;  %s3936_s8 = smov [#allocation3]  }
  0x27   : > { %p3854_p2 = scmp.ne.s32.totalorder %s4064_s14, %s3853_s6  ;;  %s3858_s9 = sshll.u32 %s3936_s8, 4  ;;  %s3859_s9 = int_to_ptr.vmem [resolvable:$false] %s3858_s9 }
  0x28   : > { %s3860_s10 = scalar_lea.vmem %s3859_s9, 2560  ;;  %p3861_p11 = scmp.lt.s32.totalorder %s4064_s14, %s3859_s9 }
  0x29   : > { %p3856_p4 = pnand %p3854_p2, %p3840_p3  ;;  %p3862_p7 = scmp.lt.s32.totalorder %s3860_s10, %s3853_s6 }
  0x2b   : > { %p3857_p12 = pneg %p3856_p4  ;;  %p3863_p8 = por %p3862_p7, %p3861_p11 }
  0x2d   : > { %p3864_p9 = pnand %p3863_p8, %p3857_p12 }
  0x2f   : > { %3867 = shalt.err (!%p3864_p9)
}
  0x30   : > { %3174 = dma.hbm_to_vmem [thread:$0]  (!%p4059_p13), %s4057_s11, 1280, %s4064_s14, %s188_s15  }
  0x31   : > { %p6382_p0 = scmp.lt.s32.totalorder %s3934_s21, 3  ;;  %p6383_p1 = scmp.ge.s32.totalorder %s3934_s21, 1 }
  0x33   : > { %p205_p3 = pnand %p6383_p1, %p6382_p0 }
  0x35   : > { %208 = sbr.rel (%p205_p3) target bundleno = 1102 (0x44e), region = 40 }
  0x3c   : > { %s4097_s13 = sand.u32 1, %s3926_s19  }
  0x3d   : > { %s3164_s16 = smul.u32 80, %s4097_s13  ;;  %s211_s17 = scalar_lea.sflag [#allocation4], %s4097_s13 }
  0x3f   : > { %s4101_s23 = scalar_lea.vmem [#allocation3], %s3164_s16 }
  0x40   : > { %3913 = dma.done.wait (%p4037_p6), %s211_s17, 1280  }
  0x41   : > { %3915 = vsyncadd (%p4037_p6), %s211_s17, 4294966016  ;;  %v4108_v0 = vld [vmem:[%s4101_s23 + $0x8] sm:$0xff]  ;;  %v4111_v1 = vld [vmem:[%s4101_s23 + $0x10] sm:$0xff]  ;;  %s6259_s11 = smov 126   ;;  %s6271_s28 = smov 127   ;;  %vm1615_vm0 = vcmask 719872   ;;  %v6245_v15 = vlaneseq }
  0x42   : > { %v4114_v2 = vld [vmem:[%s4101_s23] sm:$0xff]  ;;  %v3253_v3 = vpack.i.bf16 %v4111_v1, %v4108_v0  ;;  %v4119_v4 = vld [vmem:[%s4101_s23 + $0x18] sm:$0xff]  ;;  %s6257_s12 = smov 118   ;;  %s6244_s14 = smov 116   ;;  %v4182_v9 = vld [vmem:[%s4101_s23 + $0x28] sm:$0xff] }
  0x43   : > { %v3248_v5 = vpack.i.bf16 %v4119_v4, %v4114_v2  ;;  %s6249_s15 = smov 117   ;;  %s6243_s25 = smov 107   ;;  %v3403_v6 = vpack.i.bf16 %v4119_v4, %v4111_v1  ;;  %v4163_v7 = vld [vmem:[%s4101_s23 + $0x20] sm:$0xff]  ;;  %v4191_v11 = vld [vmem:[%s4101_s23 + $0x30] sm:$0xff]  ;;  %v4194_v12 = vld [vmem:[%s4101_s23 + $0x38] sm:$0xff]  ;;  %v4221_v16 = vand.u32 127, %v6245_v15 }
  0x44   : > { %3254 = vrot.lane.b32.xlu1 %v3253_v3, %s6259_s11  ;;  %3244 = vrot.lane.b32.xlu0 %v3253_v3, %s6271_s28  ;;  %s6247_s26 = smov 108   ;;  %s6242_s7 = smov 28   ;;  %v3413_v8 = vpack.i.bf16 %v4163_v7, %v4108_v0  ;;  %v4188_v10 = vpack.i.bf16 %v4182_v9, %v4163_v7  ;;  %v4201_v13 = vpack.i.bf16 %v4194_v12, %v4191_v11  ;;  %v4206_v14 = vld [vmem:[%s6208_s1 + $0x8] sm:$0xff] }
  0x45   : > { %s6232_s6 = smov 106   ;;  %s6216_s8 = smov 26   ;;  %2859 = vmatprep.mubr.msk.f32.mxu0 %vm1615_vm0, %v4206_v14  ;;  %2861 = vmatprep.mubr.msk.f32.mxu1 %vm1615_vm0, %v4206_v14  ;;  %vm283_vm1 = vcmp.lt.s32.totalorder %v4221_v16, 127  ;;  %vm324_vm2 = vcmp.lt.s32.totalorder %v4221_v16, 126  ;;  %vm365_vm3 = vcmp.lt.s32.totalorder %v4221_v16, 118  ;;  %vm406_vm4 = vcmp.lt.s32.totalorder %v4221_v16, 117 }
  0x46   : > { %s6214_s9 = smov 27   ;;  %s6220_s10 = smov 17   ;;  %vm447_vm5 = vcmp.lt.s32.totalorder %v4221_v16, 116  ;;  %vm488_vm6 = vcmp.lt.s32.totalorder %v4221_v16, 108  ;;  %vm6364_vm7 = vcmp.lt.s32.totalorder %v4221_v16, 107  ;;  %vm6360_vm8 = vcmp.lt.s32.totalorder %v4221_v16, 106 }
  0x47   : > { %s6218_s16 = smov 18   ;;  %s6222_s17 = smov 16   ;;  %vm6359_vm9 = vcmp.lt.s32.totalorder %v4221_v16, 28  ;;  %vm6358_vm10 = vcmp.lt.s32.totalorder %v4221_v16, 27  ;;  %vm6357_vm11 = vcmp.lt.s32.totalorder %v4221_v16, 26  ;;  %vm6267_vm12 = vcmp.lt.s32.totalorder %v4221_v16, 17 }
  0x48   : > { %3259 = vrot.lane.b32.xlu1 %v3253_v3, %s6257_s12  ;;  %3249 = vrot.lane.b32.xlu0 %v3248_v5, %s6271_s28  ;;  %vm6265_vm13 = vcmp.lt.s32.totalorder %v4221_v16, 18  ;;  %vm6274_vm14 = vcmp.lt.s32.totalorder %v4221_v16, 16  ;;  %vm6277_vm15 = vcmp.lt.s32.totalorder %v4221_v16, 8  ;;  %s6425_s0 = smov 34   ;;  %s6426_s27 = smov 127  }
  0x49   : > { %s6427_s20 = smov 126   ;;  %s6438_s24 = smov 116  }
  0x4a   : > { %s6440_s19 = smov 107   ;;  %p6658_p11 = scmp.ne.s32.totalorder %s6378_s29, 0 }
  0x4c   : > { %3269 = vrot.lane.b32.xlu1 %v3248_v5, %s6257_s12  ;;  %3264 = vrot.lane.b32.xlu0 %v3248_v5, %s6259_s11 }
  0x50   : > { %3279 = vrot.lane.b32.xlu1 %v3253_v3, %s6244_s14  ;;  %3274 = vrot.lane.b32.xlu0 %v3253_v3, %s6249_s15 }
  0x54   : > { %3289 = vrot.lane.b32.xlu1 %v3248_v5, %s6244_s14  ;;  %3284 = vrot.lane.b32.xlu0 %v3248_v5, %s6249_s15 }
  0x58   : > { %3299 = vrot.lane.b32.xlu1 %v3253_v3, %s6243_s25  ;;  %3294 = vrot.lane.b32.xlu0 %v3253_v3, %s6247_s26 }
  0x5c   : > { %3309 = vrot.lane.b32.xlu1 %v3248_v5, %s6243_s25  ;;  %3304 = vrot.lane.b32.xlu0 %v3248_v5, %s6247_s26 }
  0x60   : > { %3319 = vrot.lane.b32.xlu1 %v3253_v3, %s6242_s7  ;;  %3314 = vrot.lane.b32.xlu0 %v3253_v3, %s6232_s6 }
  0x64   : > { %3329 = vrot.lane.b32.xlu1 %v3248_v5, %s6242_s7  ;;  %3324 = vrot.lane.b32.xlu0 %v3248_v5, %s6232_s6  ;;  %s6236_s6 = smov 36  }
  0x68   : > { %3339 = vrot.lane.b32.xlu1 %v3253_v3, %s6216_s8  ;;  %3334 = vrot.lane.b32.xlu0 %v3253_v3, %s6214_s9 }
  0x6c   : > { %3349 = vrot.lane.b32.xlu1 %v3248_v5, %s6216_s8  ;;  %3344 = vrot.lane.b32.xlu0 %v3248_v5, %s6214_s9  ;;  %s6226_s9 = smov 8   ;;  %s6224_s8 = smov 7  }
  0x70   : > { %757 = vrot.lane.b32.xlu1 %v4108_v0, %s6220_s10  ;;  %3354 = vrot.lane.b32.xlu0 %v3253_v3, %s6218_s16 }
  0x74   : > { %3359 = vrot.lane.b32.xlu1 %v3248_v5, %s6218_s16  ;;  %759 = vrot.lane.b32.xlu0 %v4111_v1, %s6220_s10  ;;  %s6228_s16 = smov 6  }
  0x78   : > { %3364 = vrot.lane.b32.xlu1 %v3253_v3, %s6222_s17  ;;  %755 = vrot.lane.b32.xlu0 %v4114_v2, %s6220_s10  ;;  %s6230_s10 = smov 56  }
  0x7c   : > { %3374 = vrot.lane.b32.xlu1 %v3248_v5, %s6222_s17  ;;  %3369 = vrot.lane.b32.xlu0 %v3253_v3, %s6226_s9  ;;  %s6281_s17 = smov 55  }
  0x80   : > { %3384 = vrot.lane.b32.xlu1 %v3253_v3, %s6224_s8  ;;  %3379 = vrot.lane.b32.xlu0 %v3248_v5, %s6226_s9  ;;  %s6291_s9 = smov 46  }
  0x84   : > { %3394 = vrot.lane.b32.xlu1 %v3248_v5, %s6224_s8  ;;  %3389 = vrot.lane.b32.xlu0 %v3253_v3, %s6228_s16  ;;  %s6234_s8 = smov 54  }
  0x88   : > { %3404 = vrot.lane.b32.xlu1 %v3403_v6, %s6230_s10  ;;  %3399 = vrot.lane.b32.xlu0 %v3248_v5, %s6228_s16  ;;  %s6238_s16 = smov 45  }
  0x8c   : > { %3414 = vrot.lane.b32.xlu1 %v3413_v8, %s6230_s10  ;;  %3409 = vrot.lane.b32.xlu0 %v3403_v6, %s6281_s17  ;;  %s6302_s10 = smov 44  }
  0x90   : > { %3424 = vrot.lane.b32.xlu1 %v3403_v6, %s6234_s8  ;;  %3419 = vrot.lane.b32.xlu0 %v3413_v8, %s6281_s17 }
  0x94   : > { %3434 = vrot.lane.b32.xlu1 %v3413_v8, %s6234_s8  ;;  %3429 = vrot.lane.b32.xlu0 %v3403_v6, %s6291_s9  ;;  %s6240_s8 = smov 35  }
  0x98   : > { %3444 = vrot.lane.b32.xlu1 %v3403_v6, %s6238_s16  ;;  %3439 = vrot.lane.b32.xlu0 %v3413_v8, %s6291_s9 }
  0x9c   : > { %3454 = vrot.lane.b32.xlu1 %v3413_v8, %s6238_s16  ;;  %3449 = vrot.lane.b32.xlu0 %v3403_v6, %s6302_s10  ;;  %s6392_s16 = smov 26  }
  0xa0   : > { %3464 = vrot.lane.b32.xlu1 %v3403_v6, %s6236_s6  ;;  %3459 = vrot.lane.b32.xlu0 %v3413_v8, %s6302_s10 }
  0xa4   : > { %3474 = vrot.lane.b32.xlu1 %v3413_v8, %s6236_s6  ;;  %3469 = vrot.lane.b32.xlu0 %v3403_v6, %s6240_s8  ;;  %s6389_s6 = smov 106  }
  0xa8   : > { %3484 = vrot.lane.b32.xlu1 %v4188_v10, %s6271_s28  ;;  %3479 = vrot.lane.b32.xlu0 %v3413_v8, %s6240_s8  ;;  %s6305_s8 = smov 34  }
  0xac   : > { %3494 = vrot.lane.b32.xlu1 %v4188_v10, %s6259_s11  ;;  %3489 = vrot.lane.b32.xlu0 %v4201_v13, %s6271_s28  ;;  %s6406_s28 = smov 56  }
  0xb0   : > { %1292 = vrot.lane.b32.xlu1 %v4111_v1, %s6305_s8  ;;  %3499 = vrot.lane.b32.xlu0 %v4188_v10, %s6257_s12 }
  0xb4   : > { %1290 = vrot.lane.b32.xlu1 %v4108_v0, %s6305_s8  ;;  %1294 = vrot.lane.b32.xlu0 %v4119_v4, %s6305_s8  ;;  %s6417_s8 = smov 36  }
  0xb6   : > { %v3255_v17 = vpop.permute.xlu1 %3254  ;;  %v4227_v18 = vpop.permute.xlu0 %3244 }
  0xb7   : > { %v3257_v19 = vunpack.i.h.bf16 %v3255_v17  ;;  %v3256_v20 = vunpack.i.l.bf16 %v3255_v17  ;;  %v6298_v21 = vunpack.i.h.bf16 %v4227_v18  ;;  %v3246_v22 = vunpack.i.l.bf16 %v4227_v18 }
  0xb8   : > { %3509 = vrot.lane.b32.xlu1 %v4201_v13, %s6257_s12  ;;  %3504 = vrot.lane.b32.xlu0 %v4201_v13, %s6259_s11  ;;  %s6403_s12 = smov 6   ;;  %s6404_s11 = smov 7  }
  0xb9   : > { %v291_v23 = vsel %vm283_vm1, %v3246_v22, %v6298_v21  ;;  %v332_v30 = vsel %vm324_vm2, %v3256_v20, %v3257_v19 }
  0xba   : > { %v3260_v24 = vpop.permute.xlu1 %3259  ;;  %v4241_v25 = vpop.permute.xlu0 %3249  ;;  %v2902_v26 = vpack.c.bf16 %v291_v23, %v4108_v0 }
  0xbb   : > { %6384 = vst [vmem:[#allocation13_spill] sm:$0xff] %v4241_v25  ;;  %v3262_v27 = vunpack.i.h.bf16 %v3260_v24  ;;  %v3261_v28 = vunpack.i.l.bf16 %v3260_v24  ;;  %v6261_v29 = vunpack.i.l.bf16 %v4241_v25 }
  0xbc   : > { %2903 = vmatprep.subr.bf16.mxu0 %v2902_v26  ;;  %3519 = vrot.lane.b32.xlu1 %v4188_v10, %s6244_s14 }
  0xbd   : > { %3514 = vrot.lane.b32.xlu0 %v4188_v10, %s6249_s15  ;;  %v292_v31 = vsel %vm283_vm1, %v6261_v29, %v3246_v22  ;;  %v373_v32 = vsel %vm365_vm3, %v3261_v28, %v3262_v27 }
  0xbe   : > { %v4258_v33 = vpop.permute.xlu1 %3269  ;;  %v4260_v34 = vpop.permute.xlu0 %3264  ;;  %v2904_v35 = vpack.c.bf16 %v292_v31, %v4114_v2  ;;  %v2906_v36 = vpack.c.bf16 %v373_v32, %v332_v30 }
  0xbf   : > { %6385 = vst [vmem:[#allocation14_spill] sm:$0xff] %v4258_v33  ;;  %6386 = vst [vmem:[#allocation15_spill] sm:$0xff] %v4260_v34  ;;  %v6294_v37 = vunpack.i.h.bf16 %v4258_v33  ;;  %v6260_v38 = vunpack.i.l.bf16 %v4258_v33  ;;  %v6295_v39 = vunpack.i.h.bf16 %v4260_v34  ;;  %v6256_v40 = vunpack.i.l.bf16 %v4260_v34 }
  0xc0   : > { %3529 = vrot.lane.b32.xlu1 %v4201_v13, %s6244_s14  ;;  %2905 = vmatpush1.bf16.msra.mxu0 %v2904_v35  ;;  %s6397_s14 = smov 18  }
  0xc1   : > { %3524 = vrot.lane.b32.xlu0 %v4201_v13, %s6249_s15  ;;  %2907 = vmatprep.subr.bf16.mxu0 %v2906_v36  ;;  %v333_v41 = vsel %vm324_vm2, %v6256_v40, %v3256_v20  ;;  %v374_v42 = vsel %vm365_vm3, %v6260_v38, %v3261_v28  ;;  %v4283_v43 = vsel %vm324_vm2, %v3257_v19, %v6295_v39  ;;  %s6400_s15 = smov 16  }
  0xc2   : > { %v3280_v44 = vpop.permute.xlu1 %3279  ;;  %v3275_v45 = vpop.permute.xlu0 %3274  ;;  %v2908_v46 = vpack.c.bf16 %v374_v42, %v333_v41  ;;  %v4291_v47 = vsel %vm365_vm3, %v3262_v27, %v6294_v37 }
  0xc3   : > { %v3282_v48 = vunpack.i.h.bf16 %v3280_v44  ;;  %v3281_v49 = vunpack.i.l.bf16 %v3280_v44  ;;  %v3277_v50 = vunpack.i.h.bf16 %v3275_v45  ;;  %v3276_v51 = vunpack.i.l.bf16 %v3275_v45 }
  0xc4   : > { %3539 = vrot.lane.b32.xlu1 %v4188_v10, %s6243_s25  ;;  %2909 = vmatpush1.bf16.msra.mxu0 %v2908_v46 }
  0xc5   : > { %3534 = vrot.lane.b32.xlu0 %v4188_v10, %s6247_s26  ;;  %v414_v53 = vsel %vm406_vm4, %v3276_v51, %v3277_v50  ;;  %v455_v54 = vsel %vm447_vm5, %v3281_v49, %v3282_v48 }
  0xc6   : > { %v4303_v55 = vpop.permute.xlu1 %3289  ;;  %v4305_v56 = vpop.permute.xlu0 %3284  ;;  %v2910_v57 = vpack.c.bf16 %v455_v54, %v414_v53 }
  0xc7   : > { %6387 = vst [vmem:[#allocation16_spill] sm:$0xff] %v4303_v55  ;;  %6388 = vst [vmem:[#allocation17_spill] sm:$0xff] %v4305_v56  ;;  %v6286_v58 = vunpack.i.h.bf16 %v4303_v55  ;;  %v6255_v59 = vunpack.i.l.bf16 %v4303_v55  ;;  %v6284_v60 = vunpack.i.h.bf16 %v4305_v56  ;;  %v6254_v61 = vunpack.i.l.bf16 %v4305_v56 }
  0xc8   : > { %3549 = vrot.lane.b32.xlu1 %v4201_v13, %s6243_s25  ;;  %2911 = vmatprep.subr.bf16.mxu0 %v2910_v57  ;;  %s6396_s25 = smov 17  }
  0xc9   : > { %3544 = vrot.lane.b32.xlu0 %v4201_v13, %s6247_s26  ;;  %v415_v62 = vsel %vm406_vm4, %v6254_v61, %v3276_v51  ;;  %v456_v63 = vsel %vm447_vm5, %v6255_v59, %v3281_v49  ;;  %v4327_v0 = vsel %vm406_vm4, %v3277_v50, %v6284_v60  ;;  %v4333_v1 = vsel %vm447_vm5, %v3282_v48, %v6286_v58  ;;  %s6399_s26 = smov 8  }
  0xca   : > { %v3300_v2 = vpop.permute.xlu1 %3299  ;;  %v3295_v3 = vpop.permute.xlu0 %3294  ;;  %v2912_v5 = vpack.c.bf16 %v456_v63, %v415_v62 }
  0xcb   : > { %v3302_v8 = vunpack.i.h.bf16 %v3300_v2  ;;  %v3301_v17 = vunpack.i.l.bf16 %v3300_v2  ;;  %v3297_v19 = vunpack.i.h.bf16 %v3295_v3  ;;  %v3296_v20 = vunpack.i.l.bf16 %v3295_v3 }
  0xcc   : > { %3559 = vrot.lane.b32.xlu1 %v4188_v10, %s6242_s7  ;;  %2913 = vmatpush1.bf16.msra.mxu0 %v2912_v5 }
  0xcd   : > { %3554 = vrot.lane.b32.xlu0 %v4188_v10, %s6389_s6  ;;  %v496_v22 = vsel %vm488_vm6, %v3296_v20, %v3297_v19  ;;  %v537_v23 = vsel %vm6364_vm7, %v3301_v17, %v3302_v8 }
  0xce   : > { %v4347_v24 = vpop.permute.xlu1 %3309  ;;  %v4349_v26 = vpop.permute.xlu0 %3304  ;;  %v2914_v27 = vpack.c.bf16 %v537_v23, %v496_v22 }
  0xcf   : > { %6390 = vst [vmem:[#allocation18_spill] sm:$0xff] %v4347_v24  ;;  %6391 = vst [vmem:[#allocation19_spill] sm:$0xff] %v4349_v26  ;;  %v6279_v28 = vunpack.i.h.bf16 %v4347_v24  ;;  %v6253_v30 = vunpack.i.l.bf16 %v4347_v24  ;;  %v6275_v31 = vunpack.i.h.bf16 %v4349_v26  ;;  %v6252_v32 = vunpack.i.l.bf16 %v4349_v26 }
  0xd0   : > { %3569 = vrot.lane.b32.xlu1 %v4201_v13, %s6242_s7  ;;  %2915 = vmatprep.subr.bf16.mxu0 %v2914_v27  ;;  %s6393_s7 = smov 27  }
  0xd1   : > { %3564 = vrot.lane.b32.xlu0 %v4201_v13, %s6389_s6  ;;  %v497_v35 = vsel %vm488_vm6, %v6252_v32, %v3296_v20  ;;  %v538_v36 = vsel %vm6364_vm7, %v6253_v30, %v3301_v17  ;;  %v4371_v41 = vsel %vm488_vm6, %v3297_v19, %v6275_v31  ;;  %v4377_v42 = vsel %vm6364_vm7, %v3302_v8, %v6279_v28 }
  0xd2   : > { %v3320_v44 = vpop.permute.xlu1 %3319  ;;  %v3315_v45 = vpop.permute.xlu0 %3314  ;;  %v2916_v46 = vpack.c.bf16 %v538_v36, %v497_v35 }
  0xd3   : > { %v3322_v49 = vunpack.i.h.bf16 %v3320_v44  ;;  %v3321_v50 = vunpack.i.l.bf16 %v3320_v44  ;;  %v3317_v51 = vunpack.i.h.bf16 %v3315_v45  ;;  %v3316_v53 = vunpack.i.l.bf16 %v3315_v45 }
  0xd4   : > { %3579 = vrot.lane.b32.xlu1 %v4188_v10, %s6392_s16  ;;  %2917 = vmatpush1.bf16.msra.mxu0 %v2916_v46 }
  0xd5   : > { %3574 = vrot.lane.b32.xlu0 %v4188_v10, %s6393_s7  ;;  %v578_v54 = vsel %vm6360_vm8, %v3316_v53, %v3317_v51  ;;  %v619_v57 = vsel %vm6359_vm9, %v3321_v50, %v3322_v49 }
  0xd6   : > { %v4391_v62 = vpop.permute.xlu1 %3329  ;;  %v4393_v63 = vpop.permute.xlu0 %3324  ;;  %v2918_v2 = vpack.c.bf16 %v619_v57, %v578_v54 }
  0xd7   : > { %6394 = vst [vmem:[#allocation20_spill] sm:$0xff] %v4391_v62  ;;  %6395 = vst [vmem:[#allocation21_spill] sm:$0xff] %v4393_v63  ;;  %v6273_v3 = vunpack.i.h.bf16 %v4391_v62  ;;  %v6251_v5 = vunpack.i.l.bf16 %v4391_v62  ;;  %v6269_v8 = vunpack.i.h.bf16 %v4393_v63  ;;  %v6250_v17 = vunpack.i.l.bf16 %v4393_v63 }
  0xd8   : > { %3589 = vrot.lane.b32.xlu1 %v4201_v13, %s6392_s16  ;;  %2919 = vmatprep.subr.bf16.mxu0 %v2918_v2 }
  0xd9   : > { %3584 = vrot.lane.b32.xlu0 %v4201_v13, %s6393_s7  ;;  %v579_v19 = vsel %vm6360_vm8, %v6250_v17, %v3316_v53  ;;  %v620_v20 = vsel %vm6359_vm9, %v6251_v5, %v3321_v50  ;;  %v4415_v22 = vsel %vm6360_vm8, %v3317_v51, %v6269_v8  ;;  %v4421_v23 = vsel %vm6359_vm9, %v3322_v49, %v6273_v3 }
  0xda   : > { %v3340_v27 = vpop.permute.xlu1 %3339  ;;  %v3335_v35 = vpop.permute.xlu0 %3334  ;;  %v2920_v36 = vpack.c.bf16 %v620_v20, %v579_v19 }
  0xdb   : > { %v3342_v45 = vunpack.i.h.bf16 %v3340_v27  ;;  %v3341_v46 = vunpack.i.l.bf16 %v3340_v27  ;;  %v3337_v50 = vunpack.i.h.bf16 %v3335_v35  ;;  %v3336_v51 = vunpack.i.l.bf16 %v3335_v35 }
  0xdc   : > { %761 = vrot.lane.b32.xlu1 %v4119_v4, %s6396_s25  ;;  %2921 = vmatpush1.bf16.msra.mxu0 %v2920_v36 }
  0xdd   : > { %3594 = vrot.lane.b32.xlu0 %v4188_v10, %s6397_s14  ;;  %v660_v49 = vsel %vm6358_vm10, %v3336_v51, %v3337_v50  ;;  %v701_v53 = vsel %vm6357_vm11, %v3341_v46, %v3342_v45 }
  0xde   : > { %v4435_v54 = vpop.permute.xlu1 %3349  ;;  %v4437_v57 = vpop.permute.xlu0 %3344  ;;  %v2922_v2 = vpack.c.bf16 %v701_v53, %v660_v49 }
  0xdf   : > { %v6264_v19 = vunpack.i.h.bf16 %v4435_v54  ;;  %v6246_v20 = vunpack.i.l.bf16 %v4435_v54  ;;  %v6263_v4 = vunpack.i.h.bf16 %v4437_v57  ;;  %v6248_v27 = vunpack.i.l.bf16 %v4437_v57 }
  0xe0   : > { %3599 = vrot.lane.b32.xlu1 %v4201_v13, %s6397_s14  ;;  %2923 = vmatprep.subr.bf16.mxu0 %v2922_v2 }
  0xe1   : > { %763 = vrot.lane.b32.xlu0 %v4163_v7, %s6396_s25  ;;  %v661_v35 = vsel %vm6358_vm10, %v6248_v27, %v3336_v51  ;;  %v702_v36 = vsel %vm6357_vm11, %v6246_v20, %v3341_v46  ;;  %v4459_v49 = vsel %vm6358_vm10, %v3337_v50, %v6263_v4  ;;  %v4465_v13 = vsel %vm6357_vm11, %v3342_v45, %v6264_v19 }
  0xe2   : > { %v758_v53 = vpop.permute.xlu1 %757  ;;  %v4467_v2 = vpop.permute.xlu0 %3354  ;;  %v2924_v51 = vpack.c.bf16 %v702_v36, %v661_v35 }
  0xe3   : > { %v6262_v46 = vunpack.i.h.bf16 %v4467_v2  ;;  %v3356_v20 = vunpack.i.l.bf16 %v4467_v2 }
  0xe4   : > { %767 = vrot.lane.b32.xlu1 %v4191_v11, %s6396_s25  ;;  %2925 = vmatpush1.bf16.msra.mxu0 %v2924_v51 }
  0xe5   : > { %765 = vrot.lane.b32.xlu0 %v4182_v9, %s6396_s25  ;;  %v742_v51 = vsel %vm6265_vm13, %v3356_v20, %v6262_v46 }
  0xe6   : > { %v4479_v45 = vpop.permute.xlu1 %3359  ;;  %v4481_v50 = vpop.permute.xlu0 %759 }
  0xe7   : > { %v6258_v35 = vunpack.i.l.bf16 %v4479_v45  ;;  %v4487_v36 = vsel %vm6267_vm12, %v758_v53, %v4481_v50 }
  0xe8   : > { %6398 = vst [vmem:[#allocation22_spill] sm:$0xff] %v4487_v36  ;;  %3609 = vrot.lane.b32.xlu1 %v4188_v10, %s6399_s26  ;;  %v2926_v27 = vpack.c.bf16 %v4487_v36, %v742_v51 }
  0xe9   : > { %3604 = vrot.lane.b32.xlu0 %v4188_v10, %s6400_s15  ;;  %v743_v59 = vsel %vm6265_vm13, %v6258_v35, %v3356_v20  ;;  %vm6285_vm13 = vcmp.lt.s32.totalorder %v4221_v16, 7 }
  0xea   : > { %v3365_v17 = vpop.permute.xlu1 %3364  ;;  %v4498_v5 = vpop.permute.xlu0 %755  ;;  %2927 = vmatprep.subr.bf16.mxu0 %v2926_v27 }
  0xeb   : > { %6401 = vst [vmem:[#allocation23_spill] sm:$0xff] %v4498_v5  ;;  %v3367_v32 = vunpack.i.h.bf16 %v3365_v17  ;;  %v3366_v30 = vunpack.i.l.bf16 %v3365_v17  ;;  %v4503_v61 = vsel %vm6267_vm12, %v4498_v5, %v758_v53  ;;  %vm6288_vm12 = vcmp.lt.s32.totalorder %v4221_v16, 6 }
  0xec   : > { %6402 = vst [vmem:[#allocation24_spill] sm:$0xff] %v4503_v61  ;;  %849 = vrot.lane.b32.xlu1 %v4191_v11, %s6399_s26  ;;  %v2928_v51 = vpack.c.bf16 %v4503_v61, %v743_v59 }
  0xed   : > { %808 = vrot.lane.b32.xlu0 %v4191_v11, %s6400_s15  ;;  %v824_v20 = vsel %vm6274_vm14, %v3366_v30, %v3367_v32 }
  0xee   : > { %v4515_v17 = vpop.permute.xlu1 %3374  ;;  %v3370_v27 = vpop.permute.xlu0 %3369  ;;  %2929 = vmatpush1.bf16.msra.mxu0 %v2928_v51 }
  0xef   : > { %v3372_v53 = vunpack.i.h.bf16 %v3370_v27  ;;  %v3371_v40 = vunpack.i.l.bf16 %v3370_v27  ;;  %v6270_v59 = vunpack.i.h.bf16 %v4515_v17  ;;  %v6266_v35 = vunpack.i.l.bf16 %v4515_v17 }
  0xf0   : > { %3619 = vrot.lane.b32.xlu1 %v4188_v10, %s6403_s12 }
  0xf1   : > { %3614 = vrot.lane.b32.xlu0 %v4188_v10, %s6404_s11  ;;  %v865_v51 = vsel %vm6277_vm15, %v3371_v40, %v3372_v53  ;;  %v4536_v10 = vpack.i.bf16 %v4191_v11, %v4182_v9 }
  0xf2   : > { %v3385_v38 = vpop.permute.xlu1 %3384  ;;  %v4528_v29 = vpop.permute.xlu0 %3379  ;;  %v2930_v27 = vpack.c.bf16 %v865_v51, %v824_v20  ;;  %v4553_v51 = vsel %vm6274_vm14, %v3367_v32, %v6270_v59 }
  0xf3   : > { %6405 = vst [vmem:[#allocation25_spill] sm:$0xff] %v4528_v29  ;;  %v3387_v46 = vunpack.i.h.bf16 %v3385_v38  ;;  %v3386_v15 = vunpack.i.l.bf16 %v3385_v38  ;;  %v6272_v4 = vunpack.i.h.bf16 %v4528_v29  ;;  %v6268_v19 = vunpack.i.l.bf16 %v4528_v29 }
  0xf4   : > { %931 = vrot.lane.b32.xlu1 %v4191_v11, %s6403_s12  ;;  %2931 = vmatprep.subr.bf16.mxu0 %v2930_v27  ;;  %v825_v38 = vsel %vm6274_vm14, %v6266_v35, %v3366_v30  ;;  %vm6296_vm14 = vcmp.lt.s32.totalorder %v4221_v16, 56 }
  0xf5   : > { %890 = vrot.lane.b32.xlu0 %v4191_v11, %s6404_s11  ;;  %v866_v20 = vsel %vm6277_vm15, %v6268_v19, %v3371_v40  ;;  %v4559_v27 = vsel %vm6277_vm15, %v3372_v53, %v6272_v4  ;;  %v906_v32 = vsel %vm6285_vm13, %v3386_v15, %v3387_v46  ;;  %vm6299_vm15 = vcmp.lt.s32.totalorder %v4221_v16, 55 }
  0xf6   : > { %v4561_v44 = vpop.permute.xlu1 %3394  ;;  %v3390_v30 = vpop.permute.xlu0 %3389  ;;  %v2932_v35 = vpack.c.bf16 %v866_v20, %v825_v38 }
  0xf7   : > { %v3392_v19 = vunpack.i.h.bf16 %v3390_v30  ;;  %v3391_v8 = vunpack.i.l.bf16 %v3390_v30  ;;  %v6280_v53 = vunpack.i.h.bf16 %v4561_v44  ;;  %v6276_v59 = vunpack.i.l.bf16 %v4561_v44 }
  0xf8   : > { %3629 = vrot.lane.b32.xlu1 %v4536_v10, %s6281_s17  ;;  %2933 = vmatpush1.bf16.msra.mxu0 %v2932_v35 }
  0xf9   : > { %3624 = vrot.lane.b32.xlu0 %v4536_v10, %s6406_s28  ;;  %v947_v38 = vsel %vm6288_vm12, %v3391_v8, %v3392_v19 }
  0xfa   : > { %v3405_v20 = vpop.permute.xlu1 %3404  ;;  %v4576_v40 = vpop.permute.xlu0 %3399  ;;  %v2934_v30 = vpack.c.bf16 %v947_v38, %v906_v32  ;;  %v907_v32 = vsel %vm6285_vm13, %v6276_v59, %v3386_v15 }
  0xfb   : > { %v3407_v4 = vunpack.i.h.bf16 %v3405_v20  ;;  %v3406_v3 = vunpack.i.l.bf16 %v3405_v20  ;;  %v6283_v48 = vunpack.i.h.bf16 %v4576_v40  ;;  %v6278_v35 = vunpack.i.l.bf16 %v4576_v40 }
  0xfc   : > { %1015 = vrot.lane.b32.xlu1 %v4194_v12, %s6281_s17  ;;  %2935 = vmatprep.subr.bf16.mxu0 %v2934_v30  ;;  %v4597_v20 = vsel %vm6285_vm13, %v3387_v46, %v6280_v53  ;;  %s6408_s17 = smov 54   ;;  %vm6310_vm13 = vcmp.lt.s32.totalorder %v4221_v16, 54 }
  0xfd   : > { %974 = vrot.lane.b32.xlu0 %v4194_v12, %s6406_s28  ;;  %v948_v38 = vsel %vm6288_vm12, %v6278_v35, %v3391_v8  ;;  %v4603_v30 = vsel %vm6288_vm12, %v3392_v19, %v6283_v48  ;;  %v987_v46 = vsel %vm6296_vm14, %v3406_v3, %v3407_v4  ;;  %vm6315_vm12 = vcmp.lt.s32.totalorder %v4221_v16, 46 }
  0xfe   : > { %v4605_v31 = vpop.permute.xlu1 %3414  ;;  %v3410_v15 = vpop.permute.xlu0 %3409  ;;  %v2936_v59 = vpack.c.bf16 %v948_v38, %v907_v32 }
  0xff   : > { %6407 = vst [vmem:[#allocation26_spill] sm:$0xff] %v4605_v31  ;;  %v3412_v35 = vunpack.i.h.bf16 %v3410_v15  ;;  %v3411_v28 = vunpack.i.l.bf16 %v3410_v15  ;;  %v6290_v19 = vunpack.i.h.bf16 %v4605_v31  ;;  %v6287_v53 = vunpack.i.l.bf16 %v4605_v31 }
 0x100   : > { %3639 = vrot.lane.b32.xlu1 %v4536_v10, %s6291_s9  ;;  %2937 = vmatpush1.bf16.msra.mxu0 %v2936_v59 }
 0x101   : > { %3634 = vrot.lane.b32.xlu0 %v4536_v10, %s6408_s17  ;;  %v1028_v32 = vsel %vm6299_vm15, %v3411_v28, %v3412_v35 }
 0x102   : > { %v3425_v38 = vpop.permute.xlu1 %3424  ;;  %v4620_v8 = vpop.permute.xlu0 %3419  ;;  %v2938_v15 = vpack.c.bf16 %v1028_v32, %v987_v46  ;;  %v988_v46 = vsel %vm6296_vm14, %v6287_v53, %v3406_v3 }
 0x103   : > { %6409 = vst [vmem:[#allocation27_spill] sm:$0xff] %v4620_v8  ;;  %v3427_v48 = vunpack.i.h.bf16 %v3425_v38  ;;  %v3426_v6 = vunpack.i.l.bf16 %v3425_v38  ;;  %v6293_v60 = vunpack.i.h.bf16 %v4620_v8  ;;  %v6289_v59 = vunpack.i.l.bf16 %v4620_v8 }
 0x104   : > { %1097 = vrot.lane.b32.xlu1 %v4194_v12, %s6291_s9  ;;  %2939 = vmatprep.subr.bf16.mxu0 %v2938_v15  ;;  %v4641_v38 = vsel %vm6296_vm14, %v3407_v4, %v6290_v19  ;;  %s6411_s9 = smov 45   ;;  %vm1144_vm14 = vcmp.lt.s32.totalorder %v4221_v16, 45 }
 0x105   : > { %1056 = vrot.lane.b32.xlu0 %v4194_v12, %s6408_s17  ;;  %v1029_v32 = vsel %vm6299_vm15, %v6289_v59, %v3411_v28  ;;  %v4647_v15 = vsel %vm6299_vm15, %v3412_v35, %v6293_v60  ;;  %v1069_v4 = vsel %vm6310_vm13, %v3426_v6, %v3427_v48  ;;  %vm1185_vm15 = vcmp.lt.s32.totalorder %v4221_v16, 44 }
 0x106   : > { %v4649_v58 = vpop.permute.xlu1 %3434  ;;  %v3430_v3 = vpop.permute.xlu0 %3429  ;;  %v2940_v53 = vpack.c.bf16 %v1029_v32, %v988_v46 }
 0x107   : > { %6410 = vst [vmem:[#allocation28_spill] sm:$0xff] %v4649_v58  ;;  %v3432_v59 = vunpack.i.h.bf16 %v3430_v3  ;;  %v3431_v52 = vunpack.i.l.bf16 %v3430_v3  ;;  %v6301_v35 = vunpack.i.h.bf16 %v4649_v58  ;;  %v6297_v19 = vunpack.i.l.bf16 %v4649_v58 }
 0x108   : > { %3649 = vrot.lane.b32.xlu1 %v4536_v10, %s6302_s10  ;;  %2941 = vmatpush1.bf16.msra.mxu0 %v2940_v53 }
 0x109   : > { %3644 = vrot.lane.b32.xlu0 %v4536_v10, %s6411_s9  ;;  %v1110_v46 = vsel %vm6315_vm12, %v3431_v52, %v3432_v59 }
 0x10a   : > { %v3445_v32 = vpop.permute.xlu1 %3444  ;;  %v4664_v28 = vpop.permute.xlu0 %3439  ;;  %v2942_v3 = vpack.c.bf16 %v1110_v46, %v1069_v4  ;;  %v1070_v4 = vsel %vm6310_vm13, %v6297_v19, %v3426_v6 }
 0x10b   : > { %6412 = vst [vmem:[#allocation29_spill] sm:$0xff] %v4664_v28  ;;  %v3447_v60 = vunpack.i.h.bf16 %v3445_v32  ;;  %v3446_v37 = vunpack.i.l.bf16 %v3445_v32  ;;  %v6304_v39 = vunpack.i.h.bf16 %v4664_v28  ;;  %v6300_v53 = vunpack.i.l.bf16 %v4664_v28 }
 0x10c   : > { %1179 = vrot.lane.b32.xlu1 %v4194_v12, %s6302_s10  ;;  %2943 = vmatprep.subr.bf16.mxu0 %v2942_v3  ;;  %v4685_v32 = vsel %vm6310_vm13, %v3427_v48, %v6301_v35  ;;  %s6416_s10 = smov 35   ;;  %vm6330_vm13 = vcmp.lt.s32.totalorder %v4221_v16, 36 }
 0x10d   : > { %1138 = vrot.lane.b32.xlu0 %v4194_v12, %s6411_s9  ;;  %v1111_v46 = vsel %vm6315_vm12, %v6300_v53, %v3431_v52  ;;  %6413 = vst [vmem:[#allocation30_spill] sm:$0xff] %v4685_v32  ;;  %v4691_v3 = vsel %vm6315_vm12, %v3432_v59, %v6304_v39  ;;  %v1151_v35 = vsel %vm1144_vm14, %v3446_v37, %v3447_v60  ;;  %vm1267_vm12 = vcmp.lt.s32.totalorder %v4221_v16, 35 }
 0x10e   : > { %6414 = vst [vmem:[#allocation31_spill] sm:$0xff] %v4691_v3  ;;  %v4693_v6 = vpop.permute.xlu1 %3454  ;;  %v3450_v19 = vpop.permute.xlu0 %3449  ;;  %v2944_v21 = vpack.c.bf16 %v1111_v46, %v1070_v4  ;;  %v4709_v46 = vld [vmem:[%s4101_s23 + $0x40] sm:$0xff] }
 0x10f   : > { %6415 = vst [vmem:[#allocation32_spill] sm:$0xff] %v4693_v6  ;;  %v3452_v53 = vunpack.i.h.bf16 %v3450_v19  ;;  %v3451_v48 = vunpack.i.l.bf16 %v3450_v19  ;;  %v4712_v19 = vld [vmem:[%s4101_s23 + $0x48] sm:$0xff] }
 0x110   : > { %3659 = vrot.lane.b32.xlu1 %v4536_v10, %s6416_s10  ;;  %2945 = vmatpush1.bf16.msra.mxu0 %v2944_v21 }
 0x111   : > { %3654 = vrot.lane.b32.xlu0 %v4536_v10, %s6417_s8  ;;  %v1192_v4 = vsel %vm1185_vm15, %v3451_v48, %v3452_v53  ;;  %v4722_v10 = vpack.i.bf16 %v4712_v19, %v4709_v46 }
 0x112   : > { %v3465_v52 = vpop.permute.xlu1 %3464  ;;  %v4714_v61 = vpop.permute.xlu0 %3459  ;;  %v2946_v36 = vpack.c.bf16 %v1192_v4, %v1151_v35  ;;  %v6419_v35 = vunpack.i.l.bf16 %v4693_v6 }
 0x113   : > { %6418 = vst [vmem:[#allocation33_spill] sm:$0xff] %v4714_v61  ;;  %v3467_v5 = vunpack.i.h.bf16 %v3465_v52  ;;  %v3466_v21 = vunpack.i.l.bf16 %v3465_v52  ;;  %v6316_v39 = vunpack.i.l.bf16 %v4714_v61  ;;  %v6422_v32 = vunpack.i.h.bf16 %v4714_v61 }
 0x114   : > { %1261 = vrot.lane.b32.xlu1 %v4194_v12, %s6416_s10  ;;  %2947 = vmatprep.subr.bf16.mxu0 %v2946_v36  ;;  %v1152_v52 = vsel %vm1144_vm14, %v6419_v35, %v3446_v37  ;;  %v6420_v36 = vunpack.i.h.bf16 %v4693_v6 }
 0x115   : > { %1220 = vrot.lane.b32.xlu0 %v4194_v12, %s6417_s8  ;;  %v1193_v4 = vsel %vm1185_vm15, %v6316_v39, %v3451_v48  ;;  %v4745_v3 = vsel %vm1185_vm15, %v3452_v53, %v6422_v32 }
 0x116   : > { %v4739_v59 = vsel %vm1144_vm14, %v3447_v60, %v6420_v36  ;;  %6423 = vst [vmem:[#allocation35_spill] sm:$0xff] %v4745_v3  ;;  %v4747_v58 = vpop.permute.xlu1 %3474  ;;  %v3470_v37 = vpop.permute.xlu0 %3469  ;;  %v2948_v35 = vpack.c.bf16 %v1193_v4, %v1152_v52  ;;  %v1233_v60 = vsel %vm6330_vm13, %v3466_v21, %v3467_v5  ;;  %v3252_v36 = vunpack.i.h.bf16 %v4241_v25 }
 0x117   : > { %6421 = vst [vmem:[#allocation34_spill] sm:$0xff] %v4739_v59  ;;  %6424 = vst [vmem:[#allocation36_spill] sm:$0xff] %v4747_v58  ;;  %v3472_v39 = vunpack.i.h.bf16 %v3470_v37  ;;  %v3471_v6 = vunpack.i.l.bf16 %v3470_v37  ;;  %v6429_v59 = vunpack.i.h.bf16 %v4227_v18  ;;  %v6430_v61 = vunpack.i.h.bf16 %v4747_v58 }
 0x118   : > { %1296 = vrot.lane.b32.xlu1 %v4163_v7, %s6425_s0  ;;  %2949 = vmatpush1.bf16.msra.mxu0 %v2948_v35  ;;  %v6428_v35 = vunpack.i.l.bf16 %v4747_v58 }
 0x119   : > { %3664 = vrot.lane.b32.xlu0 %v4722_v10, %s6426_s27  ;;  %v1274_v32 = vsel %vm1267_vm12, %v3471_v6, %v3472_v39  ;;  %s6433_s27 = smov 117  }
 0x11a   : > { %v3485_v52 = vpop.permute.xlu1 %3484  ;;  %v4763_v4 = vpop.permute.xlu0 %3479  ;;  %v2950_v37 = vpack.c.bf16 %v1274_v32, %v1233_v60  ;;  %v1234_v53 = vsel %vm6330_vm13, %v6428_v35, %v3466_v21  ;;  %v290_v60 = vsel %vm283_vm1, %v6429_v59, %v3252_v36  ;;  %v4789_v21 = vsel %vm6330_vm13, %v3467_v5, %v6430_v61  ;;  %v3830_v61 = vld [vmem:[%s4101_s23 + $0x10] sm:$0xff] }
 0x11b   : > { %v3486_v48 = vunpack.i.l.bf16 %v3485_v52  ;;  %v6327_v25 = vunpack.i.l.bf16 %v4763_v4  ;;  %v6431_v18 = vunpack.i.h.bf16 %v4763_v4  ;;  %v2956_v5 = vpack.c.bf16 %v290_v60, %v3830_v61 }
 0x11c   : > { %3669 = vrot.lane.b32.xlu1 %v4722_v10, %s6427_s20  ;;  %2951 = vmatprep.subr.bf16.mxu0 %v2950_v37  ;;  %s6432_s20 = smov 118   ;;  %vm1308_vm13 = vcmp.lt.s32.totalorder %v4221_v16, 34 }
 0x11d   : > { %1298 = vrot.lane.b32.xlu0 %v4182_v9, %s6425_s0  ;;  %v1275_v32 = vsel %vm1267_vm12, %v6327_v25, %v3471_v6  ;;  %v289_v37 = vsel %vm283_vm1, %v3252_v36, %v3486_v48  ;;  %v4795_v59 = vsel %vm1267_vm12, %v3472_v39, %v6431_v18  ;;  %v3829_v6 = vld [vmem:[%s4101_s23 + $0x18] sm:$0xff]  ;;  %v3487_v39 = vunpack.i.h.bf16 %v3485_v52 }
 0x11e   : > { %v3495_v35 = vpop.permute.xlu1 %3494  ;;  %v4797_v3 = vpop.permute.xlu0 %3489  ;;  %v2952_v28 = vpack.c.bf16 %v1275_v32, %v1234_v53  ;;  %v2954_v25 = vpack.c.bf16 %v289_v37, %v3829_v6 }
 0x11f   : > { %v3496_v58 = vunpack.i.l.bf16 %v3495_v35  ;;  %v6335_v18 = vunpack.i.l.bf16 %v4797_v3  ;;  %v3497_v36 = vunpack.i.h.bf16 %v3495_v35  ;;  %v6439_v35 = vpack.c.bf16 %v4291_v47, %v4283_v43  ;;  %v4874_v47 = vld [vmem:[%s6208_s1 + $0x10] sm:$0xff] }
 0x120   : > { %1300 = vrot.lane.b32.xlu1 %v4191_v11, %s6425_s0  ;;  %2953 = vmatpush1.bf16.msra.mxu0 %v2952_v28  ;;  %v6434_v11 = vunpack.i.h.bf16 %v4260_v34  ;;  %v6435_v28 = vunpack.i.h.bf16 %v4258_v33 }
 0x121   : > { %3674 = vrot.lane.b32.xlu0 %v4722_v10, %s6432_s20  ;;  %2955 = vmatprep.subr.bf16.mxu1 %v2954_v25  ;;  %s6437_s20 = smov 108   ;;  %v329_v43 = vsel %vm324_vm2, %v3496_v58, %v3497_v36 }
 0x122   : > { %2957 = vmatpush1.bf16.msra.mxu1 %v2956_v5  ;;  %v1293_v53 = vpop.permute.xlu1 %1292  ;;  %v3500_v32 = vpop.permute.xlu0 %3499  ;;  %v330_v25 = vsel %vm324_vm2, %v6434_v11, %v3496_v58  ;;  %v288_v5 = vsel %vm283_vm1, %v3486_v48, %v3487_v39 }
 0x123   : > { %v3501_v37 = vunpack.i.l.bf16 %v3500_v32  ;;  %v3502_v34 = vunpack.i.h.bf16 %v3500_v32  ;;  %v3008_v32 = vpack.c.bf16 %v288_v5, %v4163_v7 }
 0x124   : > { %3679 = vrot.lane.b32.xlu1 %v4722_v10, %s6433_s27 }
 0x125   : > { %1302 = vrot.lane.b32.xlu0 %v4194_v12, %s6425_s0  ;;  %v371_v52 = vsel %vm365_vm3, %v6435_v28, %v3501_v37  ;;  %v287_v12 = vsel %vm283_vm1, %v3487_v39, %v6335_v18  ;;  %v370_v7 = vsel %vm365_vm3, %v3501_v37, %v3502_v34 }
 0x126   : > { %v4821_v60 = vpop.permute.xlu1 %1290  ;;  %v4823_v6 = vpop.permute.xlu0 %1294  ;;  %v2958_v61 = vpack.c.bf16 %v371_v52, %v330_v25  ;;  %v4842_v25 = vld [vmem:[%s6208_s1] sm:$0xff]  ;;  %v3006_v48 = vpack.c.bf16 %v287_v12, %v4182_v9  ;;  %v4863_v9 = vld [vmem:[%s6208_s1 + $0x18] sm:$0xff] }
 0x127   : > { %6436 = vst [vmem:[#allocation37_spill] sm:$0xff] %v4821_v60  ;;  %v1315_v11 = vsel %vm1308_vm13, %v1293_v53, %v4823_v6  ;;  %v1316_v28 = vsel %vm1308_vm13, %v4821_v60, %v1293_v53 }
 0x128   : > { %3689 = vrot.lane.b32.xlu1 %v4722_v10, %s6437_s20  ;;  %1674 = vmatprep.subr.mxu0 %v1315_v11 }
 0x129   : > { %3684 = vrot.lane.b32.xlu0 %v4722_v10, %s6438_s24  ;;  %2959 = vmatprep.subr.bf16.mxu1 %v2958_v61 }
 0x12a   : > { %1675 = vmatpush1.msra.mxu0 %v1316_v28  ;;  %2961 = vmatpush1.bf16.msra.mxu1 %v6439_v35  ;;  %v4850_v39 = vpop.permute.xlu1 %3509  ;;  %v4852_v53 = vpop.permute.xlu0 %3504 }
 0x12b   : > { %v6336_v52 = vunpack.i.h.bf16 %v4850_v39  ;;  %v3511_v11 = vunpack.i.l.bf16 %v4850_v39  ;;  %v6337_v18 = vunpack.i.h.bf16 %v4852_v53  ;;  %v3506_v61 = vunpack.i.l.bf16 %v4852_v53  ;;  %3007 = vmatprep.subr.bf16.mxu0 %v3006_v48  ;;  %1687 = vmatmul.mubr.f32.vlgmr.msra.gmra.mrb[0].mxu0 %v4842_v25 }
 0x12c   : > { %3009 = vmatpush1.bf16.msra.mxu0 %v3008_v32  ;;  %3699 = vrot.lane.b32.xlu1 %v4722_v10, %s6389_s6  ;;  %s6441_s6 = smov 28  }
 0x12d   : > { %v4880_v12 = vsel %vm365_vm3, %v3511_v11, %v6336_v52  ;;  %v4886_v58 = vsel %vm324_vm2, %v3506_v61, %v6337_v18  ;;  %3694 = vrot.lane.b32.xlu0 %v4722_v10, %s6440_s19  ;;  %v328_v37 = vsel %vm324_vm2, %v3497_v36, %v3506_v61  ;;  %v369_v5 = vsel %vm365_vm3, %v3502_v34, %v3511_v11 }
 0x12e   : > { %v3520_v28 = vpop.permute.xlu1 %3519  ;;  %v3010_v48 = vpack.c.bf16 %v369_v5, %v328_v37  ;;  %2860 = vmatprep.mubr.msk.f32.mxu0 %vm1615_vm0, %v4863_v9  ;;  %v3012_v18 = vpack.c.bf16 %v370_v7, %v329_v43  ;;  %v6442_v36 = vunpack.i.h.bf16 %v4303_v55  ;;  %v6444_v43 = vunpack.i.h.bf16 %v4305_v56 }
 0x12f   : > { %v3521_v32 = vunpack.i.l.bf16 %v3520_v28  ;;  %v3515_v52 = vpop.permute.xlu0 %3514  ;;  %1693 = vmatmul.mubr.f32.gmra.mrb[2].mxu0 %v4874_v47  ;;  %v3522_v60 = vunpack.i.h.bf16 %v3520_v28 }
 0x130   : > { %v3516_v33 = vunpack.i.l.bf16 %v3515_v52  ;;  %3709 = vrot.lane.b32.xlu1 %v4722_v10, %s6393_s7  ;;  %3011 = vmatprep.subr.bf16.mxu0 %v3010_v48  ;;  %v3517_v34 = vunpack.i.h.bf16 %v3515_v52  ;;  %s2768_s7 = scalar_lea.sflag [#allocation5], %s4097_s13 }
 0x131   : > { %3704 = vrot.lane.b32.xlu0 %v4722_v10, %s6441_s6  ;;  %3013 = vmatpush1.bf16.msra.mxu0 %v3012_v18  ;;  %v453_v11 = vsel %vm447_vm5, %v6442_v36, %v3521_v32  ;;  %v452_v28 = vsel %vm447_vm5, %v3521_v32, %v3522_v60 }
 0x132   : > { %v4907_v61 = vpop.permute.xlu1 %3529  ;;  %v412_v7 = vsel %vm406_vm4, %v6444_v43, %v3516_v33  ;;  %2863 = vmatprep.mubr.msk.f32.mxu0 %vm1615_vm0, %v4206_v14  ;;  %v411_v14 = vsel %vm406_vm4, %v3516_v33, %v3517_v34  ;;  %v6446_v33 = vpack.c.bf16 %v4333_v1, %v4327_v0 }
 0x133   : > { %6443 = vst [vmem:[#allocation38_spill] sm:$0xff] %v4907_v61  ;;  %v6340_v52 = vunpack.i.h.bf16 %v4907_v61  ;;  %v3531_v37 = vunpack.i.l.bf16 %v4907_v61  ;;  %v4917_v18 = vpop.permute.xlu0 %3524  ;;  %v2962_v5 = vpack.c.bf16 %v453_v11, %v412_v7 }
 0x134   : > { %v6344_v48 = vunpack.i.h.bf16 %v4917_v18  ;;  %v3526_v36 = vunpack.i.l.bf16 %v4917_v18  ;;  %3719 = vrot.lane.b32.xlu1 %v4722_v10, %s6397_s14  ;;  %s3165_s14 = smul.u32 160, %s4097_s13 }
 0x135   : > { %v4931_v43 = vsel %vm447_vm5, %v3531_v37, %v6340_v52  ;;  %3714 = vrot.lane.b32.xlu0 %v4722_v10, %s6392_s16  ;;  %2963 = vmatprep.subr.bf16.mxu1 %v2962_v5  ;;  %v451_v32 = vsel %vm447_vm5, %v3522_v60, %v3531_v37  ;;  %v3016_v37 = vpack.c.bf16 %v452_v28, %v411_v14 }
 0x136   : > { %v4941_v11 = vsel %vm406_vm4, %v3526_v36, %v6344_v48  ;;  %2965 = vmatpush1.bf16.msra.mxu1 %v6446_v33  ;;  %v3540_v7 = vpop.permute.xlu1 %3539  ;;  %v410_v52 = vsel %vm406_vm4, %v3517_v34, %v3526_v36  ;;  %v4953_v48 = vld [vmem:[%s4101_s23 + $0x38] sm:$0xff]  ;;  %v6447_v34 = vunpack.i.h.bf16 %v4347_v24  ;;  %v6449_v36 = vunpack.i.h.bf16 %v4349_v26 }
 0x137   : > { %6445 = vst [vmem:[#allocation39_spill] sm:$0xff] %v4941_v11  ;;  %v3541_v35 = vunpack.i.l.bf16 %v3540_v7  ;;  %v3535_v56 = vpop.permute.xlu0 %3534  ;;  %v3014_v60 = vpack.c.bf16 %v451_v32, %v410_v52  ;;  %v3542_v55 = vunpack.i.h.bf16 %v3540_v7  ;;  %v4957_v0 = vpack.i.bf16 %v4709_v46, %v4953_v48 }
 0x138   : > { %v3536_v61 = vunpack.i.l.bf16 %v3535_v56  ;;  %771 = vrot.lane.b32.xlu1 %v4709_v46, %s6396_s25  ;;  %v3537_v1 = vunpack.i.h.bf16 %v3535_v56 }
 0x139   : > { %769 = vrot.lane.b32.xlu0 %v4953_v48, %s6396_s25  ;;  %3015 = vmatprep.subr.bf16.mxu0 %v3014_v60  ;;  %v535_v52 = vsel %vm6364_vm7, %v6447_v34, %v3541_v35  ;;  %v534_v60 = vsel %vm6364_vm7, %v3541_v35, %v3542_v55 }
 0x13a   : > { %3017 = vmatpush1.bf16.msra.mxu0 %v3016_v37  ;;  %v4965_v28 = vpop.permute.xlu1 %3549  ;;  %v494_v14 = vsel %vm488_vm6, %v6449_v36, %v3536_v61  ;;  %v493_v36 = vsel %vm488_vm6, %v3536_v61, %v3537_v1  ;;  %v6450_v61 = vpack.c.bf16 %v4377_v42, %v4371_v41  ;;  %v6451_v41 = vunpack.i.h.bf16 %v4391_v62 }
 0x13b   : > { %6448 = vst [vmem:[#allocation40_spill] sm:$0xff] %v4965_v28  ;;  %v6345_v32 = vunpack.i.h.bf16 %v4965_v28  ;;  %v3551_v56 = vunpack.i.l.bf16 %v4965_v28  ;;  %v4973_v33 = vpop.permute.xlu0 %3544  ;;  %v2966_v7 = vpack.c.bf16 %v535_v52, %v494_v14 }
 0x13c   : > { %v6350_v34 = vunpack.i.h.bf16 %v4973_v33  ;;  %v3546_v37 = vunpack.i.l.bf16 %v4973_v33  ;;  %3724 = vrot.lane.b32.xlu1 %v4957_v0, %s6400_s15 }
 0x13d   : > { %v4987_v5 = vsel %vm6364_vm7, %v3551_v56, %v6345_v32  ;;  %773 = vrot.lane.b32.xlu0 %v4712_v19, %s6396_s25  ;;  %2967 = vmatprep.subr.bf16.mxu1 %v2966_v7  ;;  %v533_v35 = vsel %vm6364_vm7, %v3542_v55, %v3551_v56  ;;  %v3020_v56 = vpack.c.bf16 %v534_v60, %v493_v36 }
 0x13e   : > { %v4997_v52 = vsel %vm488_vm6, %v3546_v37, %v6350_v34  ;;  %2969 = vmatpush1.bf16.msra.mxu1 %v6450_v61  ;;  %v3560_v14 = vpop.permute.xlu1 %3559  ;;  %v492_v32 = vsel %vm488_vm6, %v3537_v1, %v3546_v37 }
 0x13f   : > { %v3561_v26 = vunpack.i.l.bf16 %v3560_v14  ;;  %v3555_v24 = vpop.permute.xlu0 %3554  ;;  %v3018_v55 = vpack.c.bf16 %v533_v35, %v492_v32  ;;  %v3562_v28 = vunpack.i.h.bf16 %v3560_v14  ;;  %v6452_v32 = vunpack.i.h.bf16 %v4393_v63 }
 0x140   : > { %v3556_v11 = vunpack.i.l.bf16 %v3555_v24  ;;  %814 = vrot.lane.b32.xlu1 %v4712_v19, %s6400_s15  ;;  %v3557_v34 = vunpack.i.h.bf16 %v3555_v24  ;;  %s6067_s15 = scalar_lea.vmem [#allocation6], %s3165_s14 }
 0x141   : > { %3729 = vrot.lane.b32.xlu0 %v4957_v0, %s6399_s26  ;;  %3019 = vmatprep.subr.bf16.mxu0 %v3018_v55  ;;  %v617_v42 = vsel %vm6359_vm9, %v6451_v41, %v3561_v26  ;;  %v616_v61 = vsel %vm6359_vm9, %v3561_v26, %v3562_v28  ;;  %s2781_s25 = sshll.u32 %s6067_s15, 4  ;;  %s6157_s25 = int_to_ptr.vmem [resolvable:$true] %s2781_s25 }
 0x142   : > { %3021 = vmatpush1.bf16.msra.mxu0 %v3020_v56  ;;  %v5014_v1 = vpop.permute.xlu1 %3569  ;;  %v576_v60 = vsel %vm6360_vm8, %v6452_v32, %v3556_v11  ;;  %v575_v56 = vsel %vm6360_vm8, %v3556_v11, %v3557_v34  ;;  %v6453_v11 = vpack.c.bf16 %v4421_v23, %v4415_v22  ;;  %v6454_v22 = vunpack.i.h.bf16 %v4435_v54 }
 0x143   : > { %v6351_v37 = vunpack.i.h.bf16 %v5014_v1  ;;  %v3571_v24 = vunpack.i.l.bf16 %v5014_v1  ;;  %v5022_v36 = vpop.permute.xlu0 %3564  ;;  %v2970_v35 = vpack.c.bf16 %v617_v42, %v576_v60 }
 0x144   : > { %v6354_v14 = vunpack.i.h.bf16 %v5022_v36  ;;  %v3566_v55 = vunpack.i.l.bf16 %v5022_v36  ;;  %3734 = vrot.lane.b32.xlu1 %v4957_v0, %s6404_s11 }
 0x145   : > { %v5036_v41 = vsel %vm6359_vm9, %v3571_v24, %v6351_v37  ;;  %855 = vrot.lane.b32.xlu0 %v4712_v19, %s6399_s26  ;;  %2971 = vmatprep.subr.bf16.mxu1 %v2970_v35  ;;  %v615_v26 = vsel %vm6359_vm9, %v3562_v28, %v3571_v24  ;;  %v3024_v24 = vpack.c.bf16 %v616_v61, %v575_v56  ;;  %v6455_v61 = vunpack.i.h.bf16 %v4437_v57  ;;  %v5105_v35 = vld [vmem:[%s4101_s23] sm:$0xff] }
 0x146   : > { %v5046_v42 = vsel %vm6360_vm8, %v3566_v55, %v6354_v14  ;;  %2973 = vmatpush1.bf16.msra.mxu1 %v6453_v11  ;;  %v3580_v32 = vpop.permute.xlu1 %3579  ;;  %v574_v60 = vsel %vm6360_vm8, %v3557_v34, %v3566_v55  ;;  %vm6467_vm8 = vcmp.lt.s32.totalorder %v4221_v16, 17 }
 0x147   : > { %v3581_v37 = vunpack.i.l.bf16 %v3580_v32  ;;  %v3575_v7 = vpop.permute.xlu0 %3574  ;;  %v3022_v28 = vpack.c.bf16 %v615_v26, %v574_v60  ;;  %v3582_v63 = vunpack.i.h.bf16 %v3580_v32 }
 0x148   : > { %v3576_v62 = vunpack.i.l.bf16 %v3575_v7  ;;  %896 = vrot.lane.b32.xlu1 %v4712_v19, %s6404_s11  ;;  %v3577_v14 = vunpack.i.h.bf16 %v3575_v7  ;;  %s6457_s11 = smov 55  }
 0x149   : > { %3739 = vrot.lane.b32.xlu0 %v4957_v0, %s6403_s12  ;;  %3023 = vmatprep.subr.bf16.mxu0 %v3022_v28  ;;  %v699_v23 = vsel %vm6357_vm11, %v6454_v22, %v3581_v37  ;;  %v698_v11 = vsel %vm6357_vm11, %v3581_v37, %v3582_v63 }
 0x14a   : > { %3025 = vmatpush1.bf16.msra.mxu0 %v3024_v24  ;;  %v5063_v34 = vpop.permute.xlu1 %3589  ;;  %v658_v55 = vsel %vm6358_vm10, %v6455_v61, %v3576_v62  ;;  %v657_v28 = vsel %vm6358_vm10, %v3576_v62, %v3577_v14  ;;  %v6456_v62 = vpack.c.bf16 %v4465_v13, %v4459_v49 }
 0x14b   : > { %v6355_v56 = vunpack.i.h.bf16 %v5063_v34  ;;  %v3591_v7 = vunpack.i.l.bf16 %v5063_v34  ;;  %v5071_v26 = vpop.permute.xlu0 %3584  ;;  %v2974_v0 = vpack.c.bf16 %v699_v23, %v658_v55 }
 0x14c   : > { %v6356_v32 = vunpack.i.h.bf16 %v5071_v26  ;;  %v3586_v60 = vunpack.i.l.bf16 %v5071_v26  ;;  %3744 = vrot.lane.b32.xlu1 %v4722_v10, %s6406_s28 }
 0x14d   : > { %v5085_v24 = vsel %vm6357_vm11, %v3591_v7, %v6355_v56  ;;  %937 = vrot.lane.b32.xlu0 %v4712_v19, %s6403_s12  ;;  %2975 = vmatprep.subr.bf16.mxu1 %v2974_v0  ;;  %v697_v37 = vsel %vm6357_vm11, %v3582_v63, %v3591_v7  ;;  %v3028_v63 = vpack.c.bf16 %v698_v11, %v657_v28  ;;  %vm6458_vm11 = vcmp.lt.s32.totalorder %v4221_v16, 17  ;;  %s6480_s12 = smov 44  }
 0x14e   : > { %v5095_v22 = vsel %vm6358_vm10, %v3586_v60, %v6356_v32  ;;  %2977 = vmatpush1.bf16.msra.mxu1 %v6456_v62  ;;  %v762_v23 = vpop.permute.xlu1 %761  ;;  %v656_v61 = vsel %vm6358_vm10, %v3577_v14, %v3586_v60  ;;  %v3362_v32 = vunpack.i.h.bf16 %v4479_v45  ;;  %vm6460_vm10 = vcmp.lt.s32.totalorder %v4221_v16, 18  ;;  %vm6461_vm9 = vmmov %vm6458_vm11 }
 0x14f   : > { %v3595_v0 = vpop.permute.xlu0 %3594  ;;  %v3026_v56 = vpack.c.bf16 %v697_v37, %v656_v61  ;;  %v5117_v13 = vsel %vm6458_vm11, %v4481_v50, %v762_v23  ;;  %v3963_v37 = vmov 0   ;;  %v6463_v50 = vunpack.i.h.bf16 %v4467_v2  ;;  %vm6464_vm11 = vmmov %vm6460_vm10 }
 0x150   : > { %v3596_v7 = vunpack.i.l.bf16 %v3595_v0  ;;  %960 = vrot.lane.b32.xlu1 %v5105_v35, %s6406_s28  ;;  %6459 = vst [vmem:[#allocation41_spill] sm:$0xff] %v5117_v13  ;;  %v3597_v14 = vunpack.i.h.bf16 %v3595_v0  ;;  %3783 = vset.pattern.permute.xlu0 %v3963_v37  ;;  %s6471_s28 = smov 46  }
 0x151   : > { %3749 = vrot.lane.b32.xlu0 %v4722_v10, %s6457_s11  ;;  %3027 = vmatprep.subr.bf16.mxu0 %v3026_v56  ;;  %v741_v61 = vsel %vm6464_vm11, %v6463_v50, %v3362_v32 }
 0x152   : > { %3029 = vmatpush1.bf16.msra.mxu0 %v3028_v63  ;;  %v5112_v49 = vpop.permute.xlu1 %3599  ;;  %3784 = vset.pattern.permute.xlu1 %v3963_v37  ;;  %v740_v56 = vsel %vm6460_vm10, %v3362_v32, %v3596_v7 }
 0x153   : > { %v6361_v11 = vunpack.i.h.bf16 %v5112_v49  ;;  %v3601_v60 = vunpack.i.l.bf16 %v5112_v49  ;;  %v764_v28 = vpop.permute.xlu0 %763 }
 0x154   : > { %v5125_v62 = vsel %vm6461_vm9, %v762_v23, %v764_v28  ;;  %3754 = vrot.lane.b32.xlu1 %v4722_v10, %s6408_s17  ;;  %v2980_v23 = vpack.c.bf16 %v5117_v13, %v741_v61  ;;  %vm6465_vm9 = vmmov %vm6460_vm10 }
 0x155   : > { %6462 = vst [vmem:[#allocation42_spill] sm:$0xff] %v5125_v62  ;;  %v2978_v0 = vpack.c.bf16 %v5125_v62, %v740_v56  ;;  %1001 = vrot.lane.b32.xlu0 %v5105_v35, %s6457_s11  ;;  %v5140_v63 = vsel %vm6460_vm10, %v3601_v60, %v6361_v11  ;;  %v739_v2 = vsel %vm6465_vm9, %v3596_v7, %v3597_v14  ;;  %vm6466_vm11 = vmmov %vm6465_vm9  ;;  %vm6475_vm9 = vcmp.lt.s32.totalorder %v4221_v16, 16 }
 0x156   : > { %v5143_v37 = vpop.permute.xlu1 %767  ;;  %v738_v32 = vsel %vm6466_vm11, %v3597_v14, %v3601_v60  ;;  %vm6469_vm10 = vmmov %vm6467_vm8 }
 0x157   : > { %v766_v55 = vpop.permute.xlu0 %765  ;;  %2979 = vmatprep.subr.bf16.mxu1 %v2978_v0 }
 0x158   : > { %v5152_v56 = vsel %vm6467_vm8, %v766_v55, %v5143_v37  ;;  %v5156_v50 = vsel %vm6469_vm10, %v764_v28, %v766_v55  ;;  %2981 = vmatpush1.bf16.msra.mxu1 %v2980_v23  ;;  %1042 = vrot.lane.b32.xlu1 %v5105_v35, %s6408_s17  ;;  %v6472_v55 = vunpack.i.h.bf16 %v4528_v29  ;;  %vm6473_vm8 = vcmp.lt.s32.totalorder %v4221_v16, 8  ;;  %vm6477_vm10 = vmmov %vm6475_vm9 }
 0x159   : > { %6468 = vst [vmem:[#allocation43_spill] sm:$0xff] %v5152_v56  ;;  %6470 = vst [vmem:[#allocation44_spill] sm:$0xff] %v5156_v50  ;;  %v3030_v61 = vpack.c.bf16 %v5152_v56, %v738_v32  ;;  %v3032_v7 = vpack.c.bf16 %v5156_v50, %v739_v2  ;;  %3759 = vrot.lane.b32.xlu0 %v4722_v10, %s6471_s28  ;;  %v6474_v2 = vunpack.i.h.bf16 %v4515_v17 }
 0x15a   : > { %v3610_v14 = vpop.permute.xlu1 %3609  ;;  %vm6476_vm11 = vmmov %vm6473_vm8 }
 0x15b   : > { %v3612_v60 = vunpack.i.h.bf16 %v3610_v14  ;;  %v3611_v0 = vunpack.i.l.bf16 %v3610_v14  ;;  %v3605_v11 = vpop.permute.xlu0 %3604  ;;  %3031 = vmatprep.subr.bf16.mxu0 %v3030_v61  ;;  %vm6478_vm7 = vmmov %vm6473_vm8 }
 0x15c   : > { %v3607_v13 = vunpack.i.h.bf16 %v3605_v11  ;;  %v3606_v62 = vunpack.i.l.bf16 %v3605_v11  ;;  %3033 = vmatpush1.bf16.msra.mxu0 %v3032_v7  ;;  %3764 = vrot.lane.b32.xlu1 %v4722_v10, %s6411_s9 }
 0x15d   : > { %1083 = vrot.lane.b32.xlu0 %v5105_v35, %s6471_s28  ;;  %v863_v28 = vsel %vm6473_vm8, %v6472_v55, %v3611_v0  ;;  %v862_v11 = vsel %vm6476_vm11, %v3611_v0, %v3612_v60  ;;  %vm6479_vm8 = vmmov %vm6475_vm9  ;;  %v6481_v0 = vpack.c.bf16 %v4559_v27, %v4553_v51 }
 0x15e   : > { %v5172_v23 = vpop.permute.xlu1 %849  ;;  %v822_v32 = vsel %vm6475_vm9, %v6474_v2, %v3606_v62  ;;  %v821_v61 = vsel %vm6477_vm10, %v3606_v62, %v3607_v13  ;;  %vm6485_vm9 = vcmp.lt.s32.totalorder %v4221_v16, 7 }
 0x15f   : > { %v861_v7 = vsel %vm6478_vm7, %v3612_v60, %v5172_v23  ;;  %v5185_v14 = vpop.permute.xlu0 %808  ;;  %v2982_v55 = vpack.c.bf16 %v863_v28, %v822_v32  ;;  %v3036_v62 = vpack.c.bf16 %v862_v11, %v821_v61  ;;  %vm6483_vm7 = vcmp.lt.s32.totalorder %v4221_v16, 6  ;;  %vm6487_vm10 = vmmov %vm6485_vm9 }
 0x160   : > { %v820_v50 = vsel %vm6479_vm8, %v3607_v13, %v5185_v14  ;;  %1124 = vrot.lane.b32.xlu1 %v5105_v35, %s6411_s9  ;;  %v6484_v11 = vunpack.i.h.bf16 %v4561_v44  ;;  %vm6486_vm11 = vmmov %vm6483_vm7  ;;  %s3965_s9 = smov [#allocation6]  }
 0x161   : > { %v3034_v2 = vpack.c.bf16 %v861_v7, %v820_v50  ;;  %3769 = vrot.lane.b32.xlu0 %v4722_v10, %s6480_s12  ;;  %2983 = vmatprep.subr.bf16.mxu1 %v2982_v55  ;;  %v6482_v50 = vunpack.i.h.bf16 %v4576_v40  ;;  %vm6488_vm8 = vmmov %vm6483_vm7 }
 0x162   : > { %2985 = vmatpush1.bf16.msra.mxu1 %v6481_v0  ;;  %v3620_v60 = vpop.permute.xlu1 %3619 }
 0x163   : > { %v3622_v56 = vunpack.i.h.bf16 %v3620_v60  ;;  %v3621_v28 = vunpack.i.l.bf16 %v3620_v60  ;;  %v3615_v32 = vpop.permute.xlu0 %3614  ;;  %3035 = vmatprep.subr.bf16.mxu0 %v3034_v2 }
 0x164   : > { %v3617_v29 = vunpack.i.h.bf16 %v3615_v32  ;;  %v3616_v13 = vunpack.i.l.bf16 %v3615_v32  ;;  %3037 = vmatpush1.bf16.msra.mxu0 %v3036_v62  ;;  %3774 = vrot.lane.b32.xlu1 %v4722_v10, %s6417_s8 }
 0x165   : > { %1165 = vrot.lane.b32.xlu0 %v5105_v35, %s6480_s12  ;;  %v945_v51 = vsel %vm6483_vm7, %v6482_v50, %v3621_v28  ;;  %v944_v7 = vsel %vm6486_vm11, %v3621_v28, %v3622_v56  ;;  %vm6489_vm7 = vmmov %vm6485_vm9  ;;  %vm6494_vm11 = vcmp.lt.s32.totalorder %v4221_v16, 56 }
 0x166   : > { %v5205_v27 = vpop.permute.xlu1 %931  ;;  %v904_v61 = vsel %vm6485_vm9, %v6484_v11, %v3616_v13  ;;  %v903_v55 = vsel %vm6487_vm10, %v3616_v13, %v3617_v29  ;;  %v6490_v13 = vpack.c.bf16 %v4603_v30, %v4597_v20  ;;  %vm6492_vm9 = vcmp.lt.s32.totalorder %v4221_v16, 55 }
 0x167   : > { %v943_v2 = vsel %vm6488_vm8, %v3622_v56, %v5205_v27  ;;  %v5218_v62 = vpop.permute.xlu0 %890  ;;  %v2986_v0 = vpack.c.bf16 %v945_v51, %v904_v61  ;;  %v3040_v28 = vpack.c.bf16 %v944_v7, %v903_v55  ;;  %v6493_v7 = vunpack.i.h.bf16 %v4605_v31  ;;  %vm6495_vm10 = vmmov %vm6492_vm9 }
 0x168   : > { %v902_v60 = vsel %vm6489_vm7, %v3617_v29, %v5218_v62  ;;  %1206 = vrot.lane.b32.xlu1 %v5105_v35, %s6417_s8  ;;  %vm6496_vm8 = vmmov %vm6494_vm11  ;;  %s3868_s8 = scalar_lea.vmem %s6157_s25, 2560 }
 0x169   : > { %v3038_v32 = vpack.c.bf16 %v943_v2, %v902_v60  ;;  %3779 = vrot.lane.b32.xlu0 %v4722_v10, %s6416_s10  ;;  %2987 = vmatprep.subr.bf16.mxu1 %v2986_v0  ;;  %v6491_v10 = vunpack.i.h.bf16 %v4620_v8  ;;  %vm6497_vm7 = vmmov %vm6492_vm9  ;;  %p3869_p6 = scmp.ne.s32.totalorder %s6157_s25, %s3868_s8 }
 0x16a   : > { %2989 = vmatpush1.bf16.msra.mxu1 %v6490_v13  ;;  %v3630_v56 = vpop.permute.xlu1 %3629 }
 0x16b   : > { %v3632_v50 = vunpack.i.h.bf16 %v3630_v56  ;;  %v3631_v51 = vunpack.i.l.bf16 %v3630_v56  ;;  %v3625_v11 = vpop.permute.xlu0 %3624  ;;  %3039 = vmatprep.subr.bf16.mxu0 %v3038_v32  ;;  %p3870_p12 = pnand %p3869_p6, %p6658_p11 }
 0x16c   : > { %v3627_v61 = vunpack.i.h.bf16 %v3625_v11  ;;  %v3626_v29 = vunpack.i.l.bf16 %v3625_v11  ;;  %3041 = vmatpush1.bf16.msra.mxu0 %v3040_v28  ;;  %1304 = vrot.lane.b32.xlu1 %v4709_v46, %s6425_s0  ;;  %v6499_v11 = vpack.c.bf16 %v4647_v15, %v4641_v38  ;;  %v6504_v15 = vld [vmem:[#allocation28_spill] sm:$0xff] }
 0x16d   : > { %1247 = vrot.lane.b32.xlu0 %v5105_v35, %s6416_s10  ;;  %v1026_v20 = vsel %vm6492_vm9, %v6491_v10, %v3631_v51  ;;  %v1025_v2 = vsel %vm6495_vm10, %v3631_v51, %v3632_v50  ;;  %vm6498_vm9 = vmmov %vm6496_vm8  ;;  %vm6506_vm10 = vcmp.lt.s32.totalorder %v4221_v16, 54  ;;  %p3871_p13 = pneg %p3870_p12  ;;  %s3872_s10 = sshll.u32 %s3965_s9, 4  ;;  %s3873_s10 = int_to_ptr.vmem [resolvable:$false] %s3872_s10 }
 0x16e   : > { %v5238_v30 = vpop.permute.xlu1 %1015  ;;  %v985_v55 = vsel %vm6494_vm11, %v6493_v7, %v3626_v29  ;;  %v984_v0 = vsel %vm6496_vm8, %v3626_v29, %v3627_v61  ;;  %v1603_v29 = vld [vmem:[%s6209_s2] sm:$0xff]  ;;  %vm6502_vm11 = vcmp.lt.s32.totalorder %v4221_v16, 46  ;;  %s3874_s17 = scalar_lea.vmem %s3873_s10, 5120  ;;  %p3875_p5 = scmp.lt.s32.totalorder %s6157_s25, %s3873_s10 }
 0x16f   : > { %v1024_v60 = vsel %vm6497_vm7, %v3632_v50, %v5238_v30  ;;  %v5251_v32 = vpop.permute.xlu0 %974  ;;  %v2990_v28 = vpack.c.bf16 %v1026_v20, %v985_v55  ;;  %v3044_v51 = vpack.c.bf16 %v1025_v2, %v984_v0  ;;  %v6500_v55 = vld [vmem:[#allocation29_spill] sm:$0xff]  ;;  %v6505_v0 = vunpack.i.h.bf16 %v6504_v15  ;;  %vm6507_vm8 = vmmov %vm6502_vm11  ;;  %p3876_p10 = scmp.lt.s32.totalorder %s3874_s17, %s3868_s8 }
 0x170   : > { %v983_v13 = vsel %vm6498_vm9, %v3627_v61, %v5251_v32  ;;  %1288 = vrot.lane.b32.xlu1 %v5105_v35, %s6425_s0  ;;  %vm6508_vm7 = vmmov %vm6506_vm10 }
 0x171   : > { %v3042_v56 = vpack.c.bf16 %v1024_v60, %v983_v13  ;;  %1306 = vrot.lane.b32.xlu0 %v4712_v19, %s6425_s0  ;;  %2991 = vmatprep.subr.bf16.mxu1 %v2990_v28  ;;  %v6501_v60 = vunpack.i.h.bf16 %v6500_v55  ;;  %vm6509_vm9 = vmmov %vm6507_vm8  ;;  %v6513_v55 = vld [vmem:[#allocation30_spill] sm:$0xff]  ;;  %s3166_s0 = smul.u32 2560, %s4019_s22  ;;  %p3877_p2 = por %p3876_p10, %p3875_p5 }
 0x172   : > { %2993 = vmatpush1.bf16.msra.mxu1 %v6499_v11  ;;  %v3640_v50 = vpop.permute.xlu1 %3639 }
 0x173   : > { %v3642_v10 = vunpack.i.h.bf16 %v3640_v50  ;;  %v3641_v61 = vunpack.i.l.bf16 %v3640_v50  ;;  %v3635_v20 = vpop.permute.xlu0 %3634  ;;  %3043 = vmatprep.subr.bf16.mxu0 %v3042_v56  ;;  %s6155_s26 = scalar_lea.hbm %s6212_s5, %s3166_s0  ;;  %p3878_p4 = pnand %p3877_p2, %p3871_p13 }
 0x174   : > { %v3637_v35 = vunpack.i.h.bf16 %v3635_v20  ;;  %v3636_v7 = vunpack.i.l.bf16 %v3635_v20  ;;  %3045 = vmatpush1.bf16.msra.mxu0 %v3044_v51 }
 0x175   : > { %v1108_v2 = vsel %vm6502_vm11, %v6501_v60, %v3641_v61  ;;  %1607 = vperm.xlu0 %3783, %v1603_v29   ;;  %v1107_v13 = vsel %vm6507_vm8, %v3641_v61, %v3642_v10  ;;  %vm6511_vm11 = vmmov %vm6508_vm7 }
 0x176   : > { %v5270_v38 = vpop.permute.xlu1 %1097  ;;  %v1067_v28 = vsel %vm6506_vm10, %v6505_v0, %v3636_v7  ;;  %v1066_v56 = vsel %vm6508_vm7, %v3636_v7, %v3637_v35  ;;  %v6512_v0 = vld [vmem:[#allocation31_spill] sm:$0xff]  ;;  %vm6525_vm10 = vcmp.lt.s32.totalorder %v4221_v16, 36 }
 0x177   : > { %6503 = vst [vmem:[#allocation45_spill] sm:$0xff] %v5270_v38  ;;  %v1106_v51 = vsel %vm6509_vm9, %v3642_v10, %v5270_v38  ;;  %v5283_v11 = vpop.permute.xlu0 %1056  ;;  %v2994_v50 = vpack.c.bf16 %v1108_v2, %v1067_v28  ;;  %v3048_v60 = vpack.c.bf16 %v1107_v13, %v1066_v56  ;;  %v6514_v61 = vpack.c.bf16 %v6512_v0, %v6513_v55  ;;  %v6515_v2 = vld [vmem:[#allocation33_spill] sm:$0xff]  ;;  %v6517_v13 = vld [vmem:[#allocation32_spill] sm:$0xff]  ;;  %vm6526_vm8 = vmmov %vm6525_vm10 }
 0x178   : > { %6510 = vst [vmem:[#allocation46_spill] sm:$0xff] %v5283_v11  ;;  %v1065_v29 = vsel %vm6511_vm11, %v3637_v35, %v5283_v11  ;;  %v6516_v28 = vunpack.i.h.bf16 %v6515_v2  ;;  %v6518_v56 = vunpack.i.h.bf16 %v6517_v13  ;;  %vm6527_vm7 = vmmov %vm6526_vm8 }
 0x179   : > { %v3046_v20 = vpack.c.bf16 %v1106_v51, %v1065_v29  ;;  %2995 = vmatprep.subr.bf16.mxu1 %v2994_v50 }
 0x17a   : > { %2997 = vmatpush1.bf16.msra.mxu1 %v6514_v61  ;;  %v3650_v15 = vpop.permute.xlu1 %3649 }
 0x17b   : > { %v3652_v7 = vunpack.i.h.bf16 %v3650_v15  ;;  %v3651_v8 = vunpack.i.l.bf16 %v3650_v15  ;;  %v3645_v31 = vpop.permute.xlu0 %3644  ;;  %3047 = vmatprep.subr.bf16.mxu0 %v3046_v20 }
 0x17c   : > { %v3647_v10 = vunpack.i.h.bf16 %v3645_v31  ;;  %v3646_v38 = vunpack.i.l.bf16 %v3645_v31  ;;  %3049 = vmatpush1.bf16.msra.mxu0 %v3048_v60 }
 0x17d   : > { %v1190_v35 = vsel %vm1185_vm15, %v6516_v28, %v3651_v8  ;;  %v1189_v15 = vsel %vm1185_vm15, %v3651_v8, %v3652_v7  ;;  %v6519_v28 = vld [vmem:[#allocation35_spill] sm:$0xff] }
 0x17e   : > { %v5295_v51 = vpop.permute.xlu1 %1179  ;;  %v1149_v55 = vsel %vm1144_vm14, %v6518_v56, %v3646_v38  ;;  %v1148_v50 = vsel %vm1144_vm14, %v3646_v38, %v3647_v10  ;;  %v6520_v56 = vld [vmem:[#allocation34_spill] sm:$0xff] }
 0x17f   : > { %v1188_v31 = vsel %vm1185_vm15, %v3652_v7, %v5295_v51  ;;  %v5308_v29 = vpop.permute.xlu0 %1138  ;;  %v2998_v20 = vpack.c.bf16 %v1190_v35, %v1149_v55  ;;  %v3052_v61 = vpack.c.bf16 %v1189_v15, %v1148_v50  ;;  %v6521_v8 = vpack.c.bf16 %v6519_v28, %v6520_v56  ;;  %v1604_v7 = vld [vmem:[%s6209_s2 + $0x8] sm:$0xff] }
 0x180   : > { %v1147_v60 = vsel %vm1144_vm14, %v3647_v10, %v5308_v29  ;;  %1612 = vperm.xlu1 %3784, %v1604_v7   ;;  %v6522_v10 = vunpack.i.h.bf16 %v4763_v4 }
 0x181   : > { %v3050_v0 = vpack.c.bf16 %v1188_v31, %v1147_v60  ;;  %2999 = vmatprep.subr.bf16.mxu1 %v2998_v20  ;;  %v6523_v31 = vld [vmem:[#allocation36_spill] sm:$0xff] }
 0x182   : > { %3001 = vmatpush1.bf16.msra.mxu1 %v6521_v8  ;;  %v3660_v2 = vpop.permute.xlu1 %3659  ;;  %v6524_v20 = vunpack.i.h.bf16 %v6523_v31 }
 0x183   : > { %v3662_v38 = vunpack.i.h.bf16 %v3660_v2  ;;  %v3661_v13 = vunpack.i.l.bf16 %v3660_v2  ;;  %v3655_v11 = vpop.permute.xlu0 %3654  ;;  %3051 = vmatprep.subr.bf16.mxu0 %v3050_v0 }
 0x184   : > { %v3657_v35 = vunpack.i.h.bf16 %v3655_v11  ;;  %v3656_v55 = vunpack.i.l.bf16 %v3655_v11  ;;  %3053 = vmatpush1.bf16.msra.mxu0 %v3052_v61 }
 0x185   : > { %v1272_v15 = vsel %vm1267_vm12, %v6522_v10, %v3661_v13  ;;  %v1271_v60 = vsel %vm1267_vm12, %v3661_v13, %v3662_v38  ;;  %v6528_v13 = vpack.c.bf16 %v4795_v59, %v4789_v21 }
 0x186   : > { %v5323_v50 = vpop.permute.xlu1 %1261  ;;  %v1231_v2 = vsel %vm6525_vm10, %v6524_v20, %v3656_v55  ;;  %v1230_v11 = vsel %vm6526_vm8, %v3656_v55, %v3657_v35  ;;  %v3492_v55 = vunpack.i.h.bf16 %v4797_v3  ;;  %vm6571_vm8 = vcmp.lt.s32.totalorder %v4221_v16, 27 }
 0x187   : > { %v1270_v0 = vsel %vm1267_vm12, %v3662_v38, %v5323_v50  ;;  %v5336_v61 = vpop.permute.xlu0 %1220  ;;  %v3002_v28 = vpack.c.bf16 %v1272_v15, %v1231_v2  ;;  %v3056_v7 = vpack.c.bf16 %v1271_v60, %v1230_v11 }
 0x188   : > { %v1229_v56 = vsel %vm6527_vm7, %v3657_v35, %v5336_v61  ;;  %v6529_v35 = vunpack.i.l.bf16 %v4797_v3  ;;  %vm6573_vm7 = vmmov %vm6571_vm8 }
 0x189   : > { %v3054_v8 = vpack.c.bf16 %v1270_v0, %v1229_v56  ;;  %3003 = vmatprep.subr.bf16.mxu1 %v3002_v28 }
 0x18a   : > { %3005 = vmatpush1.bf16.msra.mxu1 %v6528_v13  ;;  %v1297_v10 = vpop.permute.xlu1 %1296  ;;  %v286_v60 = vsel %vm283_vm1, %v6529_v35, %v3492_v55 }
 0x18b   : > { %v3665_v20 = vpop.permute.xlu0 %3664  ;;  %3055 = vmatprep.subr.bf16.mxu0 %v3054_v8  ;;  %v1314_v0 = vsel %vm1308_vm13, %v4823_v6, %v1297_v10 }
 0x18c   : > { %v3666_v38 = vunpack.i.l.bf16 %v3665_v20  ;;  %3057 = vmatpush1.bf16.msra.mxu0 %v3056_v7  ;;  %v3667_v59 = vunpack.i.h.bf16 %v3665_v20  ;;  %v3833_v7 = vld [vmem:[%s4101_s23 + $0x30] sm:$0xff]  ;;  %v6530_v20 = vunpack.i.h.bf16 %v4852_v53 }
 0x18d   : > { %v3060_v3 = vpack.c.bf16 %v286_v60, %v3833_v7  ;;  %v6531_v60 = vunpack.i.h.bf16 %v4850_v39 }
 0x18e   : > { %v3670_v15 = vpop.permute.xlu1 %3669  ;;  %v285_v2 = vsel %vm283_vm1, %v3492_v55, %v3666_v38  ;;  %v284_v6 = vsel %vm283_vm1, %v3666_v38, %v3667_v59 }
 0x18f   : > { %v1299_v11 = vpop.permute.xlu0 %1298  ;;  %v3058_v28 = vpack.c.bf16 %v285_v2, %v4953_v48  ;;  %v3671_v56 = vunpack.i.l.bf16 %v3670_v15 }
 0x190   : > { %v1313_v21 = vsel %vm1308_vm13, %v1297_v10, %v1299_v11  ;;  %v3672_v10 = vunpack.i.h.bf16 %v3670_v15  ;;  %v6534_v15 = vld [vmem:[#allocation14_spill] sm:$0xff] }
 0x191   : > { %1751 = vmatprep.subr.mxu1 %v1313_v21  ;;  %v326_v2 = vsel %vm324_vm2, %v6530_v20, %v3671_v56  ;;  %v3834_v20 = vld [vmem:[%s6208_s1 + $0x8] sm:$0xff] }
 0x192   : > { %1752 = vmatpush1.msra.mxu1 %v1314_v0  ;;  %v1301_v8 = vpop.permute.xlu1 %1300  ;;  %v6532_v0 = vld [vmem:[#allocation13_spill] sm:$0xff] }
 0x193   : > { %v3675_v13 = vpop.permute.xlu0 %3674  ;;  %1764 = vmatmul.mubr.f32.vlgmr.msra.gmra.mrb[0].mxu1 %v4842_v25  ;;  %3059 = vmatprep.subr.bf16.mxu1 %v3058_v28  ;;  %v6533_v28 = vunpack.i.l.bf16 %v6532_v0 }
 0x194   : > { %v3677_v55 = vunpack.i.h.bf16 %v3675_v13  ;;  %v3676_v35 = vunpack.i.l.bf16 %v3675_v13  ;;  %3061 = vmatpush1.bf16.msra.mxu1 %v3060_v3  ;;  %2862 = vmatprep.mubr.msk.f32.mxu1 %vm1615_vm0, %v4863_v9  ;;  %v6535_v13 = vunpack.i.l.bf16 %v6534_v15  ;;  %v6536_v15 = vpack.c.bf16 %v4880_v12, %v4886_v58 }
 0x195   : > { %v293_v7 = vsel %vm283_vm1, %v3667_v59, %v6533_v28  ;;  %v3112_v59 = vpack.c.bf16 %v284_v6, %v4709_v46  ;;  %v6537_v6 = vld [vmem:[#allocation15_spill] sm:$0xff]  ;;  %vm6551_vm1 = vcmp.lt.s32.totalorder %v4221_v16, 107 }
 0x196   : > { %v3680_v48 = vpop.permute.xlu1 %3679  ;;  %v367_v21 = vsel %vm365_vm3, %v6531_v60, %v3676_v35  ;;  %v375_v39 = vsel %vm365_vm3, %v3677_v55, %v6535_v13  ;;  %v3110_v60 = vpack.c.bf16 %v293_v7, %v4712_v19  ;;  %v366_v0 = vsel %vm365_vm3, %v3676_v35, %v3677_v55  ;;  %vm6555_vm3 = vmmov %vm6551_vm1 }
 0x197   : > { %v5375_v3 = vpop.permute.xlu0 %1302  ;;  %v3062_v38 = vpack.c.bf16 %v367_v21, %v326_v2  ;;  %1770 = vmatmul.mubr.f32.gmra.mrb[2].mxu1 %v4874_v47  ;;  %v1312_v2 = vsel %vm1308_vm13, %v1299_v11, %v1301_v8  ;;  %v325_v21 = vsel %vm324_vm2, %v3671_v56, %v3672_v10  ;;  %v3681_v28 = vunpack.i.l.bf16 %v3680_v48 }
 0x198   : > { %v1311_v53 = vsel %vm1308_vm13, %v1301_v8, %v5375_v3  ;;  %2865 = vmatprep.mubr.msk.f32.mxu1 %vm1615_vm0, %v3834_v20  ;;  %v6538_v13 = vunpack.i.l.bf16 %v6537_v6  ;;  %v3682_v8 = vunpack.i.h.bf16 %v3680_v48  ;;  %v3116_v12 = vpack.c.bf16 %v366_v0, %v325_v21  ;;  %v6540_v48 = vld [vmem:[#allocation38_spill] sm:$0xff] }
 0x199   : > { %1828 = vmatprep.subr.mxu0 %v1311_v53  ;;  %3063 = vmatprep.subr.bf16.mxu1 %v3062_v38  ;;  %v6541_v53 = vunpack.i.h.bf16 %v6540_v48 }
 0x19a   : > { %1829 = vmatpush1.msra.mxu0 %v1312_v2  ;;  %3065 = vmatpush1.bf16.msra.mxu1 %v6536_v15  ;;  %v3690_v46 = vpop.permute.xlu1 %3689  ;;  %v334_v11 = vsel %vm324_vm2, %v3672_v10, %v6538_v13  ;;  %v407_v35 = vsel %vm406_vm4, %v3681_v28, %v3682_v8  ;;  %v6539_v10 = vunpack.i.h.bf16 %v4917_v18  ;;  %v6544_v18 = vld [vmem:[#allocation17_spill] sm:$0xff]  ;;  %vm6554_vm2 = vmmov %vm6551_vm1 }
 0x19b   : > { %v3685_v19 = vpop.permute.xlu0 %3684  ;;  %1841 = vmatmul.mubr.f32.vlgmr.msra.gmra.mrb[4].mxu0 %v4842_v25  ;;  %3111 = vmatprep.subr.bf16.mxu0 %v3110_v60  ;;  %v3114_v56 = vpack.c.bf16 %v375_v39, %v334_v11  ;;  %v3691_v58 = vunpack.i.l.bf16 %v3690_v46  ;;  %v3692_v60 = vunpack.i.h.bf16 %v3690_v46  ;;  %v6545_v6 = vunpack.i.l.bf16 %v6544_v18 }
 0x19c   : > { %v3687_v7 = vunpack.i.h.bf16 %v3685_v19  ;;  %v3686_v55 = vunpack.i.l.bf16 %v3685_v19  ;;  %3113 = vmatpush1.bf16.msra.mxu0 %v3112_v59  ;;  %2864 = vmatprep.mubr.msk.f32.mxu0 %vm1615_vm0, %v4863_v9  ;;  %v408_v25 = vsel %vm406_vm4, %v6539_v10, %v3681_v28  ;;  %v6542_v59 = vld [vmem:[#allocation16_spill] sm:$0xff] }
 0x19d   : > { %3115 = vmatprep.subr.bf16.mxu0 %v3114_v56  ;;  %v6543_v2 = vunpack.i.l.bf16 %v6542_v59  ;;  %v416_v28 = vsel %vm406_vm4, %v3682_v8, %v6545_v6  ;;  %v489_v46 = vsel %vm488_vm6, %v3691_v58, %v3692_v60  ;;  %vm6559_vm4 = vcmp.lt.s32.totalorder %v4221_v16, 106 }
 0x19e   : > { %v3700_v38 = vpop.permute.xlu1 %3699  ;;  %v449_v39 = vsel %vm447_vm5, %v6541_v53, %v3686_v55  ;;  %v448_v21 = vsel %vm447_vm5, %v3686_v55, %v3687_v7  ;;  %v6552_v53 = vld [vmem:[#allocation18_spill] sm:$0xff]  ;;  %vm6566_vm9 = vmmov %vm6559_vm4 }
 0x19f   : > { %v457_v9 = vsel %vm447_vm5, %v3687_v7, %v6543_v2  ;;  %v3695_v0 = vpop.permute.xlu0 %3694  ;;  %v3066_v15 = vpack.c.bf16 %v449_v39, %v408_v25  ;;  %1847 = vmatmul.mubr.f32.gmra.mrb[6].mxu0 %v4874_v47  ;;  %v3701_v56 = vunpack.i.l.bf16 %v3700_v38  ;;  %v6546_v7 = vunpack.i.h.bf16 %v4973_v33  ;;  %v6547_v47 = vld [vmem:[#allocation39_spill] sm:$0xff]  ;;  %v6549_v25 = vld [vmem:[#allocation40_spill] sm:$0xff]  ;;  %vm6570_vm10 = vmmov %vm6559_vm4 }
 0x1a0   : > { %v3697_v13 = vunpack.i.h.bf16 %v3695_v0  ;;  %v3696_v11 = vunpack.i.l.bf16 %v3695_v0  ;;  %3117 = vmatpush1.bf16.msra.mxu0 %v3116_v12  ;;  %v3118_v19 = vpack.c.bf16 %v457_v9, %v416_v28  ;;  %2867 = vmatprep.mubr.msk.f32.mxu0 %vm1615_vm0, %v3834_v20  ;;  %v3120_v10 = vpack.c.bf16 %v448_v21, %v407_v35  ;;  %v6556_v9 = vld [vmem:[#allocation19_spill] sm:$0xff] }
 0x1a1   : > { %3067 = vmatprep.subr.bf16.mxu1 %v3066_v15  ;;  %v490_v55 = vsel %vm488_vm6, %v6546_v7, %v3691_v58  ;;  %v6548_v8 = vpack.c.bf16 %v4931_v43, %v6547_v47  ;;  %v6550_v48 = vunpack.i.h.bf16 %v6549_v25  ;;  %v6553_v39 = vunpack.i.l.bf16 %v6552_v53 }
 0x1a2   : > { %3119 = vmatprep.subr.bf16.mxu0 %v3118_v19  ;;  %v3710_v12 = vpop.permute.xlu1 %3709  ;;  %v3702_v59 = vunpack.i.h.bf16 %v3700_v38  ;;  %v530_v58 = vsel %vm6555_vm3, %v3696_v11, %v3697_v13  ;;  %v6557_v43 = vunpack.i.l.bf16 %v6556_v9  ;;  %v6558_v19 = vunpack.i.h.bf16 %v5022_v36 }
 0x1a3   : > { %3069 = vmatpush1.bf16.msra.mxu1 %v6548_v8  ;;  %v531_v20 = vsel %vm6551_vm1, %v6550_v48, %v3696_v11  ;;  %v539_v33 = vsel %vm6554_vm2, %v3697_v13, %v6553_v39  ;;  %v3705_v35 = vpop.permute.xlu0 %3704  ;;  %v3712_v6 = vunpack.i.h.bf16 %v3710_v12  ;;  %v3711_v28 = vunpack.i.l.bf16 %v3710_v12  ;;  %vm6575_vm1 = vmmov %vm6573_vm7 }
 0x1a4   : > { %v3070_v2 = vpack.c.bf16 %v531_v20, %v490_v55  ;;  %v498_v21 = vsel %vm488_vm6, %v3692_v60, %v6557_v43  ;;  %v3707_v0 = vunpack.i.h.bf16 %v3705_v35  ;;  %v3706_v15 = vunpack.i.l.bf16 %v3705_v35  ;;  %3121 = vmatpush1.bf16.msra.mxu0 %v3120_v10  ;;  %v6563_v10 = vld [vmem:[#allocation20_spill] sm:$0xff] }
 0x1a5   : > { %v3122_v18 = vpack.c.bf16 %v539_v33, %v498_v21  ;;  %v572_v38 = vsel %vm6559_vm4, %v6558_v19, %v3701_v56  ;;  %v3124_v13 = vpack.c.bf16 %v530_v58, %v489_v46  ;;  %v6560_v11 = vpack.c.bf16 %v4987_v5, %v4997_v52  ;;  %v6568_v52 = vld [vmem:[#allocation21_spill] sm:$0xff] }
 0x1a6   : > { %3071 = vmatprep.subr.bf16.mxu1 %v3070_v2  ;;  %v3720_v7 = vpop.permute.xlu1 %3719  ;;  %v6561_v60 = vunpack.i.h.bf16 %v5014_v1  ;;  %vm6562_vm5 = vcmp.lt.s32.totalorder %v4221_v16, 28  ;;  %v6564_v47 = vunpack.i.l.bf16 %v6563_v10  ;;  %v571_v8 = vsel %vm6566_vm9, %v3701_v56, %v3702_v59 }
 0x1a7   : > { %3123 = vmatprep.subr.bf16.mxu0 %v3122_v18  ;;  %3073 = vmatpush1.bf16.msra.mxu1 %v6560_v11  ;;  %vm6565_vm6 = vmmov %vm6562_vm5  ;;  %v3715_v12 = vpop.permute.xlu0 %3714  ;;  %v6569_v25 = vunpack.i.l.bf16 %v6568_v52  ;;  %v3721_v48 = vunpack.i.l.bf16 %v3720_v7  ;;  %v653_v33 = vsel %vm6571_vm8, %v3711_v28, %v3712_v6  ;;  %v6572_v56 = vunpack.i.h.bf16 %v5071_v26 }
 0x1a8   : > { %v613_v55 = vsel %vm6562_vm5, %v6561_v60, %v3706_v15  ;;  %v621_v36 = vsel %vm6565_vm6, %v3707_v0, %v6564_v47  ;;  %vm6567_vm11 = vmmov %vm6562_vm5  ;;  %v3717_v20 = vunpack.i.h.bf16 %v3715_v12  ;;  %v3716_v53 = vunpack.i.l.bf16 %v3715_v12  ;;  %3125 = vmatpush1.bf16.msra.mxu0 %v3124_v13 }
 0x1a9   : > { %v612_v46 = vsel %vm6567_vm11, %v3706_v15, %v3707_v0  ;;  %v3074_v5 = vpack.c.bf16 %v613_v55, %v572_v38  ;;  %v580_v1 = vsel %vm6570_vm10, %v3702_v59, %v6569_v25  ;;  %v654_v58 = vsel %vm6573_vm7, %v6572_v56, %v3711_v28 }
 0x1aa   : > { %v3126_v39 = vpack.c.bf16 %v621_v36, %v580_v1  ;;  %v6574_v35 = vunpack.i.l.bf16 %v4437_v57  ;;  %v3128_v59 = vpack.c.bf16 %v612_v46, %v571_v8  ;;  %v6576_v9 = vpack.c.bf16 %v5036_v41, %v5046_v42  ;;  %v772_v43 = vpop.permute.xlu1 %771 }
 0x1ab   : > { %3075 = vmatprep.subr.bf16.mxu1 %v3074_v5  ;;  %v6577_v21 = vunpack.i.h.bf16 %v5063_v34  ;;  %vm6578_vm2 = vcmp.lt.s32.totalorder %v4221_v16, 26  ;;  %v6579_v0 = vunpack.i.l.bf16 %v4435_v54  ;;  %v3722_v15 = vunpack.i.h.bf16 %v3720_v7 }
 0x1ac   : > { %v662_v2 = vsel %vm6575_vm1, %v3712_v6, %v6574_v35  ;;  %3127 = vmatprep.subr.bf16.mxu0 %v3126_v39  ;;  %3077 = vmatpush1.bf16.msra.mxu1 %v6576_v9  ;;  %vm6580_vm3 = vmmov %vm6578_vm2  ;;  %v770_v6 = vpop.permute.xlu0 %769  ;;  %v6582_v41 = vunpack.i.h.bf16 %v5112_v49  ;;  %vm6583_vm5 = vcmp.lt.s32.totalorder %v4221_v16, 18  ;;  %vm6584_vm6 = vcmp.lt.s32.totalorder %v4221_v16, 17 }
 0x1ad   : > { %v695_v26 = vsel %vm6578_vm2, %v6577_v21, %v3716_v53  ;;  %v703_v57 = vsel %vm6580_vm3, %v3717_v20, %v6579_v0  ;;  %vm6581_vm4 = vmmov %vm6578_vm2  ;;  %v5504_v34 = vsel %vm6584_vm6, %v770_v6, %v772_v43  ;;  %3129 = vmatpush1.bf16.msra.mxu0 %v3128_v59  ;;  %v6586_v49 = vpack.c.bf16 %v5085_v24, %v5095_v22  ;;  %v6591_v24 = vld [vmem:[#allocation23_spill] sm:$0xff] }
 0x1ae   : > { %v694_v18 = vsel %vm6581_vm4, %v3716_v53, %v3717_v20  ;;  %v3078_v28 = vpack.c.bf16 %v695_v26, %v654_v58  ;;  %v3130_v19 = vpack.c.bf16 %v703_v57, %v662_v2  ;;  %v736_v42 = vsel %vm6583_vm5, %v6582_v41, %v3721_v48  ;;  %vm6585_vm9 = vmmov %vm6584_vm6  ;;  %v3725_v11 = vpop.permute.xlu1 %3724 }
 0x1af   : > { %v5509_v54 = vsel %vm6585_vm9, %v5143_v37, %v770_v6  ;;  %v3082_v38 = vpack.c.bf16 %v5504_v34, %v736_v42  ;;  %v3132_v13 = vpack.c.bf16 %v694_v18, %v653_v33  ;;  %vm6587_vm11 = vmmov %vm6583_vm5  ;;  %v6588_v60 = vunpack.i.l.bf16 %v4479_v45 }
 0x1b0   : > { %3079 = vmatprep.subr.bf16.mxu1 %v3078_v28  ;;  %3131 = vmatprep.subr.bf16.mxu0 %v3130_v19  ;;  %v735_v7 = vsel %vm6587_vm11, %v3721_v48, %v3722_v15  ;;  %vm6589_vm10 = vmmov %vm6583_vm5  ;;  %v774_v37 = vpop.permute.xlu0 %773  ;;  %v3084_v10 = vpack.c.bf16 %v5509_v54, %v5140_v63  ;;  %v3727_v47 = vunpack.i.h.bf16 %v3725_v11  ;;  %v3726_v46 = vunpack.i.l.bf16 %v3725_v11 }
 0x1b1   : > { %3081 = vmatpush1.bf16.msra.mxu1 %v6586_v49  ;;  %v744_v55 = vsel %vm6589_vm10, %v3722_v15, %v6588_v60  ;;  %vm6590_vm8 = vmmov %vm6584_vm6  ;;  %3133 = vmatpush1.bf16.msra.mxu0 %v3132_v13  ;;  %vm6593_vm1 = vcmp.lt.s32.totalorder %v4221_v16, 16  ;;  %vm6595_vm3 = vcmp.lt.s32.totalorder %v4221_v16, 8  ;;  %v6598_v35 = vunpack.i.l.bf16 %v4515_v17 }
 0x1b2   : > { %3083 = vmatprep.subr.bf16.mxu1 %v3082_v38  ;;  %v5525_v36 = vsel %vm6590_vm8, %v772_v43, %v774_v37  ;;  %vm6592_vm7 = vmmov %vm6584_vm6  ;;  %v815_v12 = vpop.permute.xlu1 %814  ;;  %v818_v25 = vsel %vm6593_vm1, %v3726_v46, %v3727_v47  ;;  %vm6604_vm10 = vcmp.lt.s32.totalorder %v4221_v16, 7 }
 0x1b3   : > { %v5530_v22 = vsel %vm6592_vm7, %v774_v37, %v6591_v24  ;;  %v3136_v8 = vpack.c.bf16 %v5525_v36, %v735_v7  ;;  %vm6594_vm2 = vmmov %vm6593_vm1  ;;  %vm6606_vm7 = vcmp.lt.s32.totalorder %v4221_v16, 6  ;;  %v6609_v7 = vunpack.i.l.bf16 %v4561_v44 }
 0x1b4   : > { %v3134_v45 = vpack.c.bf16 %v5530_v22, %v744_v55  ;;  %v3730_v5 = vpop.permute.xlu0 %3729  ;;  %v819_v1 = vsel %vm6594_vm2, %v5185_v14, %v3726_v46  ;;  %vm6596_vm4 = vmmov %vm6595_vm3 }
 0x1b5   : > { %3085 = vmatpush1.bf16.msra.mxu1 %v3084_v10  ;;  %v3732_v63 = vunpack.i.h.bf16 %v3730_v5  ;;  %v3731_v52 = vunpack.i.l.bf16 %v3730_v5  ;;  %vm6597_vm5 = vmmov %vm6593_vm1 }
 0x1b6   : > { %3135 = vmatprep.subr.bf16.mxu0 %v3134_v45  ;;  %v3735_v20 = vpop.permute.xlu1 %3734  ;;  %v817_v39 = vsel %vm6597_vm5, %v3727_v47, %v815_v12  ;;  %vm6599_vm6 = vmmov %vm6593_vm1 }
 0x1b7   : > { %3137 = vmatpush1.bf16.msra.mxu0 %v3136_v8  ;;  %v860_v48 = vsel %vm6595_vm3, %v5172_v23, %v3731_v52  ;;  %v859_v53 = vsel %vm6596_vm4, %v3731_v52, %v3732_v63  ;;  %v826_v2 = vsel %vm6599_vm6, %v815_v12, %v6598_v35  ;;  %v3737_v14 = vunpack.i.h.bf16 %v3735_v20  ;;  %vm6600_vm9 = vmmov %vm6595_vm3  ;;  %v6601_v23 = vld [vmem:[#allocation25_spill] sm:$0xff] }
 0x1b8   : > { %v3088_v33 = vpack.c.bf16 %v860_v48, %v819_v1  ;;  %v856_v56 = vpop.permute.xlu0 %855  ;;  %v3086_v58 = vpack.c.bf16 %v859_v53, %v818_v25  ;;  %v6602_v9 = vunpack.i.l.bf16 %v6601_v23  ;;  %vm6603_vm11 = vmmov %vm6595_vm3  ;;  %v3736_v0 = vunpack.i.l.bf16 %v3735_v20  ;;  %v6618_v25 = vld [vmem:[#allocation26_spill] sm:$0xff] }
 0x1b9   : > { %v858_v59 = vsel %vm6600_vm9, %v3732_v63, %v856_v56  ;;  %vm6605_vm8 = vmmov %vm6604_vm10  ;;  %vm6614_vm6 = vcmp.lt.s32.totalorder %v4221_v16, 56  ;;  %v6619_v1 = vunpack.i.l.bf16 %v6618_v25 }
 0x1ba   : > { %v867_v43 = vsel %vm6603_vm11, %v856_v56, %v6602_v9  ;;  %v3140_v26 = vpack.c.bf16 %v858_v59, %v817_v39  ;;  %3087 = vmatprep.subr.bf16.mxu1 %v3086_v58  ;;  %v897_v57 = vpop.permute.xlu1 %896  ;;  %v900_v6 = vsel %vm6604_vm10, %v3736_v0, %v3737_v14  ;;  %v901_v28 = vsel %vm6605_vm8, %v5218_v62, %v3736_v0  ;;  %vm6607_vm1 = vmmov %vm6606_vm7  ;;  %v6622_v56 = vld [vmem:[#allocation27_spill] sm:$0xff]  ;;  %v6627_v0 = vld [vmem:[#allocation46_spill] sm:$0xff] }
 0x1bb   : > { %v3138_v21 = vpack.c.bf16 %v867_v43, %v826_v2  ;;  %3089 = vmatpush1.bf16.msra.mxu1 %v3088_v33  ;;  %vm6608_vm2 = vmmov %vm6605_vm8  ;;  %vm6616_vm11 = vcmp.lt.s32.totalorder %v4221_v16, 55  ;;  %v6623_v58 = vunpack.i.l.bf16 %v6622_v56 }
 0x1bc   : > { %v3740_v15 = vpop.permute.xlu0 %3739  ;;  %v899_v38 = vsel %vm6608_vm2, %v3737_v14, %v897_v57  ;;  %vm6610_vm3 = vmmov %vm6608_vm2 }
 0x1bd   : > { %3139 = vmatprep.subr.bf16.mxu0 %v3138_v21  ;;  %v3742_v17 = vunpack.i.h.bf16 %v3740_v15  ;;  %v3741_v18 = vunpack.i.l.bf16 %v3740_v15  ;;  %v908_v60 = vsel %vm6610_vm3, %v897_v57, %v6609_v7  ;;  %vm6611_vm4 = vmmov %vm6607_vm1  ;;  %vm6626_vm3 = vcmp.lt.s32.totalorder %v4221_v16, 54  ;;  %v6629_v15 = vld [vmem:[#allocation45_spill] sm:$0xff] }
 0x1be   : > { %3141 = vmatpush1.bf16.msra.mxu0 %v3140_v26  ;;  %v3745_v41 = vpop.permute.xlu1 %3744  ;;  %vm6613_vm5 = vmmov %vm6607_vm1  ;;  %v6636_v7 = vld [vmem:[#allocation29_spill] sm:$0xff] }
 0x1bf   : > { %v942_v19 = vsel %vm6606_vm7, %v5205_v27, %v3741_v18  ;;  %v941_v42 = vsel %vm6607_vm1, %v3741_v18, %v3742_v17  ;;  %v3747_v62 = vunpack.i.h.bf16 %v3745_v41  ;;  %v6612_v27 = vunpack.i.l.bf16 %v4576_v40  ;;  %vm6615_vm9 = vmmov %vm6614_vm6 }
 0x1c0   : > { %v3092_v13 = vpack.c.bf16 %v942_v19, %v901_v28  ;;  %v938_v49 = vpop.permute.xlu0 %937  ;;  %v3090_v11 = vpack.c.bf16 %v941_v42, %v900_v6  ;;  %v3746_v24 = vunpack.i.l.bf16 %v3745_v41  ;;  %vm6617_vm10 = vmmov %vm6616_vm11  ;;  %v6632_v28 = vld [vmem:[#allocation28_spill] sm:$0xff] }
 0x1c1   : > { %v940_v55 = vsel %vm6611_vm4, %v3742_v17, %v938_v49  ;;  %v949_v37 = vsel %vm6613_vm5, %v938_v49, %v6612_v27  ;;  %vm6620_vm8 = vmmov %vm6614_vm6  ;;  %vm6630_vm5 = vcmp.lt.s32.totalorder %v4221_v16, 46  ;;  %v6633_v19 = vunpack.i.l.bf16 %v6632_v28 }
 0x1c2   : > { %v3142_v10 = vpack.c.bf16 %v949_v37, %v908_v60  ;;  %v3144_v47 = vpack.c.bf16 %v940_v55, %v899_v38  ;;  %3091 = vmatprep.subr.bf16.mxu1 %v3090_v11  ;;  %v961_v45 = vpop.permute.xlu1 %960  ;;  %v981_v12 = vsel %vm6614_vm6, %v3746_v24, %v3747_v62  ;;  %v982_v40 = vsel %vm6615_vm9, %v5251_v32, %v3746_v24  ;;  %vm6621_vm7 = vmmov %vm6614_vm6 }
 0x1c3   : > { %3093 = vmatpush1.bf16.msra.mxu1 %v3092_v13  ;;  %v989_v48 = vsel %vm6620_vm8, %v961_v45, %v6619_v1  ;;  %v990_v33 = vsel %vm6621_vm7, %v3747_v62, %v961_v45  ;;  %vm6624_vm1 = vmmov %vm6617_vm10  ;;  %v6637_v60 = vunpack.i.l.bf16 %v6636_v7  ;;  %v3835_v7 = vld [vmem:[%s6208_s1] sm:$0xff] }
 0x1c4   : > { %v3750_v8 = vpop.permute.xlu0 %3749  ;;  %3143 = vmatprep.subr.bf16.mxu0 %v3142_v10  ;;  %vm6625_vm2 = vmmov %vm6624_vm1 }
 0x1c5   : > { %v3752_v44 = vunpack.i.h.bf16 %v3750_v8  ;;  %v3751_v46 = vunpack.i.l.bf16 %v3750_v8  ;;  %3145 = vmatpush1.bf16.msra.mxu0 %v3144_v47  ;;  %vm6628_vm4 = vmmov %vm6626_vm3 }
 0x1c6   : > { %v3755_v63 = vpop.permute.xlu1 %3754  ;;  %vm6631_vm6 = vmmov %vm6630_vm5 }
 0x1c7   : > { %v1023_v5 = vsel %vm6616_vm11, %v5238_v30, %v3751_v46  ;;  %v1022_v52 = vsel %vm6617_vm10, %v3751_v46, %v3752_v44  ;;  %v3757_v32 = vunpack.i.h.bf16 %v3755_v63  ;;  %v3756_v59 = vunpack.i.l.bf16 %v3755_v63  ;;  %vm6634_vm9 = vmmov %vm6626_vm3  ;;  %v6640_v63 = vld [vmem:[#allocation32_spill] sm:$0xff] }
 0x1c8   : > { %v3096_v20 = vpack.c.bf16 %v1023_v5, %v982_v40  ;;  %v1002_v53 = vpop.permute.xlu0 %1001  ;;  %v3094_v39 = vpack.c.bf16 %v1022_v52, %v981_v12  ;;  %vm6635_vm11 = vmmov %vm6626_vm3  ;;  %v6641_v52 = vunpack.i.l.bf16 %v6640_v63 }
 0x1c9   : > { %v1030_v30 = vsel %vm6624_vm1, %v1002_v53, %v6623_v58  ;;  %v1031_v35 = vsel %vm6625_vm2, %v3752_v44, %v1002_v53  ;;  %v1063_v26 = vsel %vm6626_vm3, %v3756_v59, %v3757_v32  ;;  %v1064_v57 = vsel %vm6628_vm4, %v6627_v0, %v3756_v59  ;;  %vm6638_vm10 = vmmov %vm6630_vm5 }
 0x1ca   : > { %v3146_v2 = vpack.c.bf16 %v1030_v30, %v989_v48  ;;  %v3148_v14 = vpack.c.bf16 %v1031_v35, %v990_v33  ;;  %3095 = vmatprep.subr.bf16.mxu1 %v3094_v39  ;;  %v1043_v23 = vpop.permute.xlu1 %1042  ;;  %vm6639_vm8 = vmmov %vm6630_vm5  ;;  %v6642_v39 = vld [vmem:[#allocation33_spill] sm:$0xff] }
 0x1cb   : > { %3097 = vmatpush1.bf16.msra.mxu1 %v3096_v20  ;;  %v1071_v41 = vsel %vm6634_vm9, %v1043_v23, %v6633_v19  ;;  %v1072_v49 = vsel %vm6635_vm11, %v3757_v32, %v1043_v23  ;;  %v6643_v33 = vunpack.i.l.bf16 %v6642_v39  ;;  %v2007_v39 = vld [vmem:[%s6211_s4] sm:$0xff] }
 0x1cc   : > { %v3760_v9 = vpop.permute.xlu0 %3759  ;;  %3147 = vmatprep.subr.bf16.mxu0 %v3146_v2 }
 0x1cd   : > { %v3762_v43 = vunpack.i.h.bf16 %v3760_v9  ;;  %v3761_v21 = vunpack.i.l.bf16 %v3760_v9  ;;  %3149 = vmatpush1.bf16.msra.mxu0 %v3148_v14 }
 0x1ce   : > { %v3765_v18 = vpop.permute.xlu1 %3764 }
 0x1cf   : > { %v1105_v17 = vsel %vm6630_vm5, %v6629_v15, %v3761_v21  ;;  %v1104_v6 = vsel %vm6631_vm6, %v3761_v21, %v3762_v43  ;;  %v3767_v11 = vunpack.i.h.bf16 %v3765_v18  ;;  %v3766_v10 = vunpack.i.l.bf16 %v3765_v18 }
 0x1d0   : > { %v3100_v42 = vpack.c.bf16 %v1105_v17, %v1064_v57  ;;  %v1084_v38 = vpop.permute.xlu0 %1083  ;;  %v3098_v13 = vpack.c.bf16 %v1104_v6, %v1063_v26  ;;  %v6646_v17 = vunpack.i.l.bf16 %v6523_v31 }
 0x1d1   : > { %v1112_v62 = vsel %vm6638_vm10, %v1084_v38, %v6637_v60  ;;  %v1113_v55 = vsel %vm6639_vm8, %v3762_v43, %v1084_v38  ;;  %v1145_v44 = vsel %vm1144_vm14, %v3766_v10, %v3767_v11  ;;  %v1146_v46 = vsel %vm1144_vm14, %v5308_v29, %v3766_v10  ;;  %v6650_v38 = vld [vmem:[#allocation37_spill] sm:$0xff]  ;;  %v6651_v60 = vld [vmem:[#allocation22_spill] sm:$0xff] }
 0x1d2   : > { %v3150_v27 = vpack.c.bf16 %v1112_v62, %v1071_v41  ;;  %v3152_v37 = vpack.c.bf16 %v1113_v55, %v1072_v49  ;;  %3099 = vmatprep.subr.bf16.mxu1 %v3098_v13  ;;  %v1125_v47 = vpop.permute.xlu1 %1124  ;;  %v6652_v62 = vld [vmem:[#allocation24_spill] sm:$0xff]  ;;  %v6653_v55 = vld [vmem:[#allocation42_spill] sm:$0xff]  ;;  %v6654_v10 = vld [vmem:[#allocation41_spill] sm:$0xff] }
 0x1d3   : > { %3101 = vmatpush1.bf16.msra.mxu1 %v3100_v42  ;;  %v1153_v25 = vsel %vm1144_vm14, %v1125_v47, %v6641_v52  ;;  %v1154_v53 = vsel %vm1144_vm14, %v3767_v11, %v1125_v47  ;;  %vm6644_vm14 = vcmp.lt.s32.totalorder %v4221_v16, 36  ;;  %v3837_v16 = vld [vmem:[%s6208_s1 + $0x10] sm:$0xff]  ;;  %v2214_v47 = vld [vmem:[%s6210_s3 + $0x8] sm:$0xff] }
 0x1d4   : > { %v3770_v24 = vpop.permute.xlu0 %3769  ;;  %3151 = vmatprep.subr.bf16.mxu0 %v3150_v27  ;;  %vm6645_vm7 = vmmov %vm6644_vm14  ;;  %v3964_v27 = vmov 0.0  }
 0x1d5   : > { %v3772_v45 = vunpack.i.h.bf16 %v3770_v24  ;;  %v3771_v8 = vunpack.i.l.bf16 %v3770_v24  ;;  %3153 = vmatpush1.bf16.msra.mxu0 %v3152_v37  ;;  %vm6648_vm1 = vmmov %vm6645_vm7  ;;  %v2213_v37 = vld [vmem:[%s6210_s3] sm:$0xff]  ;;  %v6655_v24 = vld [vmem:[#allocation43_spill] sm:$0xff] }
 0x1d6   : > { %v3775_v40 = vpop.permute.xlu1 %3774 }
 0x1d7   : > { %v1187_v12 = vsel %vm1185_vm15, %v5295_v51, %v3771_v8  ;;  %v1186_v5 = vsel %vm1185_vm15, %v3771_v8, %v3772_v45  ;;  %v3777_v29 = vunpack.i.h.bf16 %v3775_v40  ;;  %v3776_v30 = vunpack.i.l.bf16 %v3775_v40 }
 0x1d8   : > { %v3104_v1 = vpack.c.bf16 %v1187_v12, %v1146_v46  ;;  %v1166_v48 = vpop.permute.xlu0 %1165  ;;  %v3102_v20 = vpack.c.bf16 %v1186_v5, %v1145_v44 }
 0x1d9   : > { %v1194_v51 = vsel %vm1185_vm15, %v1166_v48, %v6643_v33  ;;  %v1195_v32 = vsel %vm1185_vm15, %v3772_v45, %v1166_v48  ;;  %v1227_v23 = vsel %vm6644_vm14, %v3776_v30, %v3777_v29  ;;  %v1228_v9 = vsel %vm6645_vm7, %v5336_v61, %v3776_v30  ;;  %vm6647_vm15 = vmmov %vm6645_vm7  ;;  %v6656_v45 = vld [vmem:[#allocation44_spill] sm:$0xff] }
 0x1da   : > { %v3154_v56 = vpack.c.bf16 %v1194_v51, %v1153_v25  ;;  %v3156_v58 = vpack.c.bf16 %v1195_v32, %v1154_v53  ;;  %3103 = vmatprep.subr.bf16.mxu1 %v3102_v20  ;;  %v1207_v35 = vpop.permute.xlu1 %1206  ;;  %v6649_v61 = vunpack.i.l.bf16 %v4763_v4 }
 0x1db   : > { %3105 = vmatpush1.bf16.msra.mxu1 %v3104_v1  ;;  %v1235_v18 = vsel %vm6647_vm15, %v1207_v35, %v6646_v17  ;;  %v1236_v6 = vsel %vm6648_vm1, %v3777_v29, %v1207_v35  ;;  %v6657_v1 = vlaneseq }
 0x1dc   : > { %v3780_v2 = vpop.permute.xlu0 %3779  ;;  %3155 = vmatprep.subr.bf16.mxu0 %v3154_v56 }
 0x1dd   : > { %v3782_v14 = vunpack.i.h.bf16 %v3780_v2  ;;  %v3781_v59 = vunpack.i.l.bf16 %v3780_v2  ;;  %3157 = vmatpush1.bf16.msra.mxu0 %v3156_v58  ;;  %v5714_v48 = vshrl.u32 %v6657_v1, 7 }
 0x1de   : > { %v1305_v21 = vpop.permute.xlu1 %1304 }
 0x1df   : > { %v1269_v43 = vsel %vm1267_vm12, %v5323_v50, %v3781_v59  ;;  %v1268_v26 = vsel %vm1267_vm12, %v3781_v59, %v3782_v14  ;;  %v1310_v49 = vsel %vm1308_vm13, %v5375_v3, %v1305_v21  ;;  %v3836_v3 = vld [vmem:[%s6208_s1 + $0x18] sm:$0xff]  ;;  %v2017_v20 = vsub.s32 1, %v5714_v48 }
 0x1e0   : > { %v3108_v0 = vpack.c.bf16 %v1269_v43, %v1228_v9  ;;  %v1248_v57 = vpop.permute.xlu0 %1247  ;;  %v3106_v15 = vpack.c.bf16 %v1268_v26, %v1227_v23  ;;  %v2021_v33 = vsub.s32 2, %v5714_v48  ;;  %v2025_v59 = vsub.s32 3, %v5714_v48 }
 0x1e1   : > { %v1276_v50 = vsel %vm1267_vm12, %v1248_v57, %v6649_v61  ;;  %v1277_v28 = vsel %vm1267_vm12, %v3782_v14, %v1248_v57  ;;  %vm2215_vm12 = vcmask 64512   ;;  %v5738_v35 = vrot.slane %v2007_v39, %v2017_v20 }
 0x1e2   : > { %v3158_v19 = vpack.c.bf16 %v1276_v50, %v1235_v18  ;;  %v3160_v41 = vpack.c.bf16 %v1277_v28, %v1236_v6  ;;  %3107 = vmatprep.subr.bf16.mxu1 %v3106_v15  ;;  %v1289_v42 = vpop.permute.xlu1 %1288  ;;  %v5742_v14 = vrot.slane %v2007_v39, %v2021_v33  ;;  %v5761_v17 = vrot.slane %v2007_v39, %v2025_v59 }
 0x1e3   : > { %3109 = vmatpush1.bf16.msra.mxu1 %v3108_v0  ;;  %v1317_v13 = vsel %vm1308_vm13, %v1289_v42, %v6650_v38  ;;  %v2029_v0 = vsub.s32 4, %v5714_v48 }
 0x1e4   : > { %v1307_v31 = vpop.permute.xlu0 %1306  ;;  %3159 = vmatprep.subr.bf16.mxu0 %v3158_v19 }
 0x1e5   : > { %3161 = vmatpush1.bf16.msra.mxu0 %v3160_v41  ;;  %v1309_v4 = vsel %vm1308_vm13, %v1305_v21, %v1307_v31  ;;  %v1318_v11 = vsel %vm1308_vm13, %v1307_v31, %v1289_v42  ;;  %v5770_v19 = vrot.slane %v2007_v39, %v2029_v0  ;;  %v2033_v41 = vsub.s32 5, %v5714_v48 }
 0x1e6   : > { %1905 = vmatprep.subr.mxu1 %v1309_v4  ;;  %1982 = vmatprep.subr.mxu0 %v1317_v13 }
 0x1e7   : > { %1906 = vmatpush1.msra.mxu1 %v1310_v49 }
 0x1e8   : > { %1918 = vmatmul.mubr.f32.vlgmr.msra.gmra.mrb[4].mxu1 %v3835_v7  ;;  %2222 = vmatprep.subr.mxu1 %v6651_v60  ;;  %v2037_v60 = vsub.s32 6, %v5714_v48 }
 0x1e9   : > { %1983 = vmatpush1.msra.mxu0 %v1318_v11  ;;  %2223 = vmatpush1.msra.mxu1 %v6652_v62  ;;  %v2041_v62 = vsub.s32 7, %v5714_v48 }
 0x1ea   : > { %1995 = vmatmul.mubr.f32.vlgmr.msra.gmra.mrb[8].mxu0 %v3835_v7  ;;  %2299 = vmatprep.subr.mxu1 %v6653_v55  ;;  %v5784_v7 = vrot.slane %v2007_v39, %v2033_v41 }
 0x1eb   : > { %2866 = vmatprep.mubr.msk.f32.mxu1 %vm1615_vm0, %v3836_v3  ;;  %2868 = vmatprep.mubr.msk.f32.mxu0 %vm1615_vm0, %v3836_v3 }
 0x1ec   : > { %1924 = vmatmul.mubr.f32.gmra.mrb[6].mxu1 %v3837_v16 }
 0x1ed   : > { %2286 = vmatprep.mubr.f32.mxu1 %v3964_v27 }
 0x1ee   : > { %2001 = vmatmul.mubr.f32.gmra.mrb[10].mxu0 %v3837_v16 }
 0x1f0   : > { %2869 = vmatmul.mubr.msk.f32.vlgmr.msra.gmra.mrb[8].mxu1 %vm2215_vm12, %v2213_v37 }
 0x1f1   : > { %2300 = vmatpush1.msra.mxu1 %v6654_v10  ;;  %2292 = vmatprep.mubr.f32.mxu1 %v3964_v27 }
 0x1f2   : > { %2376 = vmatprep.subr.mxu1 %v6655_v24 }
 0x1f4   : > { %2870 = vmatmul.mubr.msk.f32.gmra.mrb[10].mxu1 %vm2215_vm12, %v2214_v47  ;;  %v1608_v29 = vpop.permute.xlu0 %1607 }
 0x1f5   : > { %2363 = vmatprep.mubr.f32.mxu1 %v3964_v27 }
 0x1f8   : > { %2871 = vmatmul.mubr.msk.f32.vlgmr.msra.gmra.mrb[12].mxu1 %vm2215_vm12, %v2213_v37 }
 0x1f9   : > { %2377 = vmatpush1.msra.mxu1 %v6656_v45  ;;  %2369 = vmatprep.mubr.f32.mxu1 %v3964_v27  ;;  %v5797_v45 = vrot.slane %v2007_v39, %v2041_v62 }
 0x1fa   : > { %2453 = vmatprep.subr.mxu1 %v5504_v34 }
 0x1fc   : > { %2872 = vmatmul.mubr.msk.f32.gmra.mrb[14].mxu1 %vm2215_vm12, %v2214_v47 }
 0x1fd   : > { %2440 = vmatprep.mubr.f32.mxu1 %v3964_v27 }
 0x1fe   : > { %v1688_v8 = vpop.f32.mrb[0].mxu0 }
 0x1ff   : > { %v1690_v44 = vpop.f32.mrb[1].mxu0  ;;  %v5718_v53 = vpop.permute.xlu1 %1612  ;;  %v5730_v56 = vadd.f32 %v1688_v8, %v1608_v29  ;;  %v2008_v8 = vld [vmem:[%s6211_s4 + $0x8] sm:$0x3] }
 0x200   : > { %2873 = vmatmul.mubr.msk.f32.vlgmr.msra.gmra.mrb[16].mxu1 %vm2215_vm12, %v2213_v37  ;;  %v5732_v58 = vadd.f32 %v1690_v44, %v1608_v29 }
 0x201   : > { %2454 = vmatpush1.msra.mxu1 %v5509_v54  ;;  %2446 = vmatprep.mubr.f32.mxu1 %v3964_v27 }
 0x202   : > { %2530 = vmatprep.subr.mxu1 %v5530_v22  ;;  %v1694_v46 = vpop.f32.mrb[2].mxu0  ;;  %v2062_v26 = vmul.f32 %v5738_v35, %v5732_v58 }
 0x203   : > { %v1696_v12 = vpop.f32.mrb[3].mxu0  ;;  %v5725_v51 = vadd.f32 %v1694_v46, %v5718_v53 }
 0x204   : > { %2874 = vmatmul.mubr.msk.f32.gmra.mrb[18].mxu1 %vm2215_vm12, %v2214_v47  ;;  %v5728_v32 = vadd.f32 %v1696_v12, %v5718_v53 }
 0x205   : > { %2517 = vmatprep.mubr.f32.mxu1 %v3964_v27 }
 0x206   : > { %v2072_v43 = vmul.f32 %v5738_v35, %v5728_v32 }
 0x208   : > { %2875 = vmatmul.mubr.msk.f32.vlgmr.msra.gmra.mrb[20].mxu1 %vm2215_vm12, %v2213_v37 }
 0x209   : > { %2531 = vmatpush1.msra.mxu1 %v5525_v36  ;;  %2523 = vmatprep.mubr.f32.mxu1 %v3964_v27  ;;  %v2013_v36 = vsub.s32 0, %v5714_v48 }
 0x20b   : > { %v5734_v30 = vrot.slane %v2007_v39, %v2013_v36 }
 0x20c   : > { %2876 = vmatmul.mubr.msk.f32.gmra.mrb[22].mxu1 %vm2215_vm12, %v2214_v47 }
 0x20d   : > { %2594 = vmatprep.mubr.f32.mxu1 %v3964_v27  ;;  %v2071_v9 = vmul.f32 %v5734_v30, %v5725_v51  ;;  %v2061_v21 = vmul.f32 %v5734_v30, %v5730_v56 }
 0x20f   : > { %v2092_v6 = vadd.f32 %v2072_v43, %v2071_v9  ;;  %v2081_v50 = vadd.f32 %v2062_v26, %v2061_v21  ;;  %v5820_v9 = vrot.slane %v2008_v8, %v2017_v20 }
 0x210   : > { %2877 = vmatmul.mubr.msk.f32.vlgmr.msra.gmra.mrb[24].mxu1 %vm2215_vm12, %v2213_v37 }
 0x211   : > { %2600 = vmatprep.mubr.f32.mxu1 %v3964_v27 }
 0x214   : > { %2878 = vmatmul.mubr.msk.f32.gmra.mrb[26].mxu1 %vm2215_vm12, %v2214_v47  ;;  %v5795_v47 = vrot.slane %v2007_v39, %v2037_v60 }
 0x266   : > { %v1765_v34 = vpop.f32.mrb[0].mxu1 }
 0x267   : > { %v1767_v54 = vpop.f32.mrb[1].mxu1  ;;  %v5740_v2 = vadd.f32 %v1765_v34, %v1608_v29 }
 0x268   : > { %v5759_v15 = vadd.f32 %v1767_v54, %v1608_v29 }
 0x269   : > { %v2063_v57 = vmul.f32 %v5742_v14, %v5740_v2 }
 0x26a   : > { %v1771_v22 = vpop.f32.mrb[2].mxu1  ;;  %v2064_v31 = vmul.f32 %v5761_v17, %v5759_v15 }
 0x26b   : > { %v1773_v40 = vpop.f32.mrb[3].mxu1  ;;  %v5746_v23 = vadd.f32 %v1771_v22, %v5718_v53  ;;  %v2082_v42 = vadd.f32 %v2081_v50, %v2063_v57 }
 0x26c   : > { %v5766_v61 = vadd.f32 %v1773_v40, %v5718_v53 }
 0x26d   : > { %v2073_v18 = vmul.f32 %v5742_v14, %v5746_v23  ;;  %v2083_v55 = vadd.f32 %v2082_v42, %v2064_v31 }
 0x26e   : > { %v1842_v5 = vpop.f32.mrb[4].mxu0  ;;  %v2074_v13 = vmul.f32 %v5761_v17, %v5766_v61 }
 0x26f   : > { %v1844_v63 = vpop.f32.mrb[5].mxu0  ;;  %v5768_v28 = vadd.f32 %v1842_v5, %v1608_v29  ;;  %v2093_v38 = vadd.f32 %v2092_v6, %v2073_v18 }
 0x270   : > { %v5782_v11 = vadd.f32 %v1844_v63, %v1608_v29 }
 0x271   : > { %v2065_v49 = vmul.f32 %v5770_v19, %v5768_v28  ;;  %v2094_v3 = vadd.f32 %v2093_v38, %v2074_v13 }
 0x272   : > { %v1848_v52 = vpop.f32.mrb[6].mxu0  ;;  %v2066_v10 = vmul.f32 %v5784_v7, %v5782_v11 }
 0x273   : > { %v1850_v25 = vpop.f32.mrb[7].mxu0  ;;  %v5778_v4 = vadd.f32 %v1848_v52, %v5718_v53  ;;  %v2084_v37 = vadd.f32 %v2083_v55, %v2065_v49  ;;  %v5812_v52 = vrot.slane %v2008_v8, %v2013_v36 }
 0x274   : > { %v5791_v27 = vadd.f32 %v1850_v25, %v5718_v53 }
 0x275   : > { %v2075_v16 = vmul.f32 %v5770_v19, %v5778_v4  ;;  %v2085_v40 = vadd.f32 %v2084_v37, %v2066_v10 }
 0x276   : > { %v2076_v34 = vmul.f32 %v5784_v7, %v5791_v27 }
 0x277   : > { %v2095_v12 = vadd.f32 %v2094_v3, %v2075_v16 }
 0x279   : > { %v2096_v26 = vadd.f32 %v2095_v12, %v2076_v34 }
 0x2bb   : > { %v1919_v24 = vpop.f32.mrb[4].mxu1 }
 0x2bc   : > { %v5802_v44 = vadd.f32 %v1919_v24, %v1608_v29  ;;  %v1921_v46 = vpop.f32.mrb[5].mxu1 }
 0x2bd   : > { %v5806_v54 = vadd.f32 %v1921_v46, %v1608_v29  ;;  %v1996_v22 = vpop.f32.mrb[8].mxu0 }
 0x2be   : > { %v2067_v5 = vmul.f32 %v5795_v47, %v5802_v44  ;;  %v5810_v63 = vadd.f32 %v1996_v22, %v1608_v29  ;;  %v1998_v25 = vpop.f32.mrb[9].mxu0 }
 0x2bf   : > { %v2068_v1 = vmul.f32 %v5797_v45, %v5806_v54  ;;  %v1925_v39 = vpop.f32.mrb[6].mxu1  ;;  %v5816_v59 = vadd.f32 %v1998_v25, %v1608_v29 }
 0x2c0   : > { %v2086_v33 = vadd.f32 %v2085_v40, %v2067_v5  ;;  %v5823_v43 = vadd.f32 %v1925_v39, %v5718_v53  ;;  %v1927_v21 = vpop.f32.mrb[7].mxu1  ;;  %v2069_v18 = vmul.f32 %v5812_v52, %v5810_v63 }
 0x2c1   : > { %v5826_v36 = vadd.f32 %v1927_v21, %v5718_v53  ;;  %v2002_v0 = vpop.f32.mrb[10].mxu0  ;;  %v2070_v41 = vmul.f32 %v5820_v9, %v5816_v59 }
 0x2c2   : > { %v2087_v57 = vadd.f32 %v2086_v33, %v2068_v1  ;;  %v2077_v29 = vmul.f32 %v5795_v47, %v5823_v43  ;;  %v5833_v48 = vadd.f32 %v2002_v0, %v5718_v53  ;;  %v2004_v20 = vpop.f32.mrb[11].mxu0 }
 0x2c3   : > { %v2078_v6 = vmul.f32 %v5797_v45, %v5826_v36  ;;  %v5840_v31 = vadd.f32 %v2004_v20, %v5718_v53  ;;  %v5846_v3 = vpop.f32.mrb[8].mxu1 }
 0x2c4   : > { %v2088_v50 = vadd.f32 %v2087_v57, %v2069_v18  ;;  %v2097_v42 = vadd.f32 %v2096_v26, %v2077_v29  ;;  %v2079_v13 = vmul.f32 %v5812_v52, %v5833_v48  ;;  %v5848_v16 = vpop.f32.mrb[9].mxu1 }
 0x2c5   : > { %v2080_v62 = vmul.f32 %v5820_v9, %v5840_v31 }
 0x2c6   : > { %v2098_v38 = vadd.f32 %v2097_v42, %v2078_v6  ;;  %v2089_v49 = vadd.f32 %v2088_v50, %v2070_v41 }
 0x2c7   : > { %v5850_v37 = vpop.f32.mrb[10].mxu1 }
 0x2c8   : > { %v2099_v60 = vadd.f32 %v2098_v38, %v2079_v13  ;;  %2090 = vadd.xlane.f32.xlu1 %v2089_v49  ;;  %v5852_v53 = vpop.f32.mrb[11].mxu1 }
 0x2ca   : > { %v2100_v55 = vadd.f32 %v2099_v60, %v2080_v62 }
 0x2cb   : > { %v5854_v10 = vpop.f32.mrb[12].mxu1 }
 0x2cc   : > { %2101 = vadd.xlane.f32.xlu0 %v2100_v55  ;;  %v5856_v24 = vpop.f32.mrb[13].mxu1 }
 0x2cf   : > { %v5858_v8 = vpop.f32.mrb[14].mxu1 }
 0x2d0   : > { %v5860_v46 = vpop.f32.mrb[15].mxu1 }
 0x2d3   : > { %v5862_v12 = vpop.f32.mrb[16].mxu1 }
 0x2d4   : > { %v5864_v34 = vpop.f32.mrb[17].mxu1 }
 0x355   : > { %v2091_v22 = vpop.xlane.xlu1 %2090 }
 0x356   : > { %v2103_v40 = vmul.f32 0.001953125, %v2091_v22 }
 0x358   : > { %v5867_v5 = vsub.f32 %v5730_v56, %v2103_v40  ;;  %v5870_v25 = vsub.f32 %v5732_v58, %v2103_v40  ;;  %v5873_v1 = vsub.f32 %v5740_v2, %v2103_v40  ;;  %v5876_v33 = vsub.f32 %v5759_v15, %v2103_v40 }
 0x359   : > { %v2102_v39 = vpop.xlane.xlu0 %2101  ;;  %v5881_v26 = vsub.f32 %v5768_v28, %v2103_v40  ;;  %v5888_v2 = vsub.f32 %v5782_v11, %v2103_v40  ;;  %v5895_v28 = vsub.f32 %v5802_v44, %v2103_v40  ;;  %v5910_v42 = vsub.f32 %v5806_v54, %v2103_v40 }
 0x35a   : > { %v2125_v21 = vmul.f32 %v5867_v5, %v5867_v5  ;;  %v2126_v56 = vmul.f32 %v5870_v25, %v5870_v25  ;;  %v2127_v58 = vmul.f32 %v5873_v1, %v5873_v1  ;;  %v2104_v0 = vmul.f32 0.001953125, %v2102_v39 }
 0x35b   : > { %v2128_v15 = vmul.f32 %v5876_v33, %v5876_v33  ;;  %v2129_v29 = vmul.f32 %v5881_v26, %v5881_v26  ;;  %v2130_v44 = vmul.f32 %v5888_v2, %v5888_v2  ;;  %v5916_v49 = vsub.f32 %v5810_v63, %v2103_v40 }
 0x35c   : > { %v2145_v57 = vmul.f32 %v2125_v21, %v5734_v30  ;;  %v2146_v18 = vmul.f32 %v2126_v56, %v5738_v35  ;;  %v2147_v20 = vmul.f32 %v2127_v58, %v5742_v14  ;;  %v5901_v50 = vsub.f32 %v5725_v51, %v2104_v0 }
 0x35d   : > { %v5904_v11 = vsub.f32 %v5728_v32, %v2104_v0  ;;  %v5907_v41 = vsub.f32 %v5746_v23, %v2104_v0  ;;  %v2148_v38 = vmul.f32 %v2128_v15, %v5761_v17  ;;  %v5919_v51 = vsub.f32 %v5766_v61, %v2104_v0 }
 0x35e   : > { %v2165_v6 = vadd.f32 %v2146_v18, %v2145_v57  ;;  %v2135_v32 = vmul.f32 %v5901_v50, %v5901_v50  ;;  %v2131_v23 = vmul.f32 %v5895_v28, %v5895_v28  ;;  %v2149_v54 = vmul.f32 %v2129_v29, %v5770_v19 }
 0x35f   : > { %v2136_v62 = vmul.f32 %v5904_v11, %v5904_v11  ;;  %v5929_v55 = vsub.f32 %v5816_v59, %v2103_v40  ;;  %v5932_v63 = vsub.f32 %v5778_v4, %v2104_v0  ;;  %v2137_v61 = vmul.f32 %v5907_v41, %v5907_v41 }
 0x360   : > { %v2166_v13 = vadd.f32 %v2165_v6, %v2147_v20  ;;  %v2132_v22 = vmul.f32 %v5910_v42, %v5910_v42  ;;  %v2150_v39 = vmul.f32 %v2130_v44, %v5784_v7  ;;  %v2155_v56 = vmul.f32 %v2135_v32, %v5734_v30 }
 0x361   : > { %v5941_v58 = vsub.f32 %v5791_v27, %v2104_v0  ;;  %v2138_v59 = vmul.f32 %v5919_v51, %v5919_v51  ;;  %v2156_v4 = vmul.f32 %v2136_v62, %v5738_v35  ;;  %v2133_v40 = vmul.f32 %v5916_v49, %v5916_v49 }
 0x362   : > { %v2167_v60 = vadd.f32 %v2166_v13, %v2148_v38  ;;  %v2151_v15 = vmul.f32 %v2131_v23, %v5795_v47  ;;  %v5950_v18 = vsub.f32 %v5823_v43, %v2104_v0  ;;  %v2139_v30 = vmul.f32 %v5932_v63, %v5932_v63 }
 0x363   : > { %v2157_v27 = vmul.f32 %v2137_v61, %v5742_v14  ;;  %v2176_v29 = vadd.f32 %v2156_v4, %v2155_v56  ;;  %v2134_v20 = vmul.f32 %v5929_v55, %v5929_v55  ;;  %v2152_v35 = vmul.f32 %v2132_v22, %v5797_v45 }
 0x364   : > { %v2168_v21 = vadd.f32 %v2167_v60, %v2149_v54  ;;  %v5959_v44 = vsub.f32 %v5826_v36, %v2104_v0  ;;  %v2140_v38 = vmul.f32 %v5941_v58, %v5941_v58  ;;  %v2158_v43 = vmul.f32 %v2138_v59, %v5761_v17 }
 0x365   : > { %v2177_v13 = vadd.f32 %v2176_v29, %v2157_v27  ;;  %v2153_v32 = vmul.f32 %v2133_v40, %v5812_v52  ;;  %v5966_v14 = vsub.f32 %v5833_v48, %v2104_v0  ;;  %v2141_v54 = vmul.f32 %v5950_v18, %v5950_v18  ;;  %v5982_v27 = vpop.f32.mrb[18].mxu1 }
 0x366   : > { %v2169_v57 = vadd.f32 %v2168_v21, %v2150_v39  ;;  %v2159_v60 = vmul.f32 %v2139_v30, %v5770_v19  ;;  %v2154_v36 = vmul.f32 %v2134_v20, %v5820_v9  ;;  %v2124_v22 = vsub.f32 %v5840_v31, %v2104_v0  ;;  %v5984_v29 = vpop.f32.mrb[19].mxu1 }
 0x367   : > { %v2178_v62 = vadd.f32 %v2177_v13, %v2158_v43  ;;  %v2142_v17 = vmul.f32 %v5959_v44, %v5959_v44  ;;  %v2160_v39 = vmul.f32 %v2140_v38, %v5784_v7  ;;  %v2143_v48 = vmul.f32 %v5966_v14, %v5966_v14  ;;  %v2519_v20 = vpop.f32.mrb[20].mxu1 }
 0x368   : > { %v2170_v6 = vadd.f32 %v2169_v57, %v2151_v15  ;;  %v2161_v59 = vmul.f32 %v2141_v54, %v5795_v47  ;;  %v2144_v19 = vmul.f32 %v2124_v22, %v2124_v22  ;;  %v2521_v47 = vpop.f32.mrb[21].mxu1 }
 0x369   : > { %v2179_v21 = vadd.f32 %v2178_v62, %v2159_v60  ;;  %v2162_v40 = vmul.f32 %v2142_v17, %v5797_v45  ;;  %v2163_v31 = vmul.f32 %v2143_v48, %v5812_v52 }
 0x36a   : > { %v2171_v23 = vadd.f32 %v2170_v6, %v2152_v35  ;;  %v2164_v57 = vmul.f32 %v2144_v19, %v5820_v9  ;;  %v2525_v35 = vpop.f32.mrb[22].mxu1 }
 0x36b   : > { %v2180_v4 = vadd.f32 %v2179_v21, %v2160_v39  ;;  %v2527_v6 = vpop.f32.mrb[23].mxu1 }
 0x36c   : > { %v2172_v61 = vadd.f32 %v2171_v23, %v2153_v32  ;;  %v2596_v38 = vpop.f32.mrb[24].mxu1 }
 0x36d   : > { %v2181_v15 = vadd.f32 %v2180_v4, %v2161_v59  ;;  %v2598_v43 = vpop.f32.mrb[25].mxu1 }
 0x36e   : > { %v2173_v56 = vadd.f32 %v2172_v61, %v2154_v36  ;;  %v2602_v45 = vpop.f32.mrb[26].mxu1 }
 0x36f   : > { %v2182_v0 = vadd.f32 %v2181_v15, %v2162_v40  ;;  %v2604_v13 = vpop.f32.mrb[27].mxu1 }
 0x370   : > { %2174 = vadd.xlane.f32.xlu0 %v2173_v56 }
 0x371   : > { %v2183_v30 = vadd.f32 %v2182_v0, %v2163_v31 }
 0x373   : > { %v2184_v7 = vadd.f32 %v2183_v30, %v2164_v57 }
 0x375   : > { %2185 = vadd.xlane.f32.xlu1 %v2184_v7 }
 0x3fd   : > { %v2175_v32 = vpop.xlane.xlu0 %2174 }
 0x3fe   : > { %v2187_v52 = vmul.f32 0.001953125, %v2175_v32 }
 0x400   : > { %v2189_v23 = vadd.f32 1e-05, %v2187_v52 }
 0x402   : > { %3785 = vrsqrt.f32 %v2189_v23  ;;  %v2186_v9 = vpop.xlane.xlu1 %2185 }
 0x403   : > { %v2188_v54 = vmul.f32 0.001953125, %v2186_v9 }
 0x405   : > { %v2190_v60 = vadd.f32 1e-05, %v2188_v54 }
 0x407   : > { %3787 = vrsqrt.f32 %v2190_v60 }
 0x40c   : > { %v3786_v62 = vpop.eup %3785 }
 0x40d   : > { %v2199_v36 = vmul.f32 %v3786_v62, %v5895_v28  ;;  %v2200_v61 = vmul.f32 %v3786_v62, %v5910_v42  ;;  %v2201_v17 = vmul.f32 %v3786_v62, %v5916_v49  ;;  %v2202_v39 = vmul.f32 %v3786_v62, %v5929_v55 }
 0x40e   : > { %v2193_v0 = vmul.f32 %v3786_v62, %v5867_v5 }
 0x40f   : > { %v5990_v21 = vadd.f32 %v2519_v20, %v2199_v36  ;;  %v5992_v56 = vadd.f32 %v2521_v47, %v2200_v61  ;;  %v5994_v48 = vadd.f32 %v2596_v38, %v2201_v17  ;;  %v5996_v59 = vadd.f32 %v2598_v43, %v2202_v39 }
 0x410   : > { %v2194_v47 = vmul.f32 %v3786_v62, %v5870_v25  ;;  %v2198_v25 = vmul.f32 %v3786_v62, %v5888_v2 }
 0x411   : > { %v2653_v4 = vmin.f32 %v5990_v21, 0.0  ;;  %v2654_v19 = vmin.f32 %v5992_v56, 0.0  ;;  %v2655_v28 = vmin.f32 %v5994_v48, 0.0  ;;  %v2656_v42 = vmin.f32 %v5996_v59, 0.0  ;;  %v3788_v31 = vpop.eup %3787 }
 0x412   : > { %v2209_v57 = vmul.f32 %v3788_v31, %v5950_v18  ;;  %v2210_v30 = vmul.f32 %v3788_v31, %v5959_v44  ;;  %v2211_v7 = vmul.f32 %v3788_v31, %v5966_v14  ;;  %v2212_v20 = vmul.f32 %v3788_v31, %v2124_v22 }
 0x413   : > { %v2679_v40 = vmul.f32 1.442695, %v2653_v4  ;;  %v2681_v49 = vmul.f32 1.442695, %v2654_v19  ;;  %v2683_v15 = vmul.f32 1.442695, %v2655_v28  ;;  %v2195_v18 = vmul.f32 %v3786_v62, %v5873_v1 }
 0x414   : > { %v2685_v55 = vmul.f32 1.442695, %v2656_v42  ;;  %v6007_v38 = vadd.f32 %v2525_v35, %v2209_v57  ;;  %v6009_v43 = vadd.f32 %v2527_v6, %v2210_v30  ;;  %v6011_v32 = vadd.f32 %v2602_v45, %v2211_v7 }
 0x415   : > { %3789 = vpow2.f32 %v2679_v40  ;;  %v6013_v5 = vadd.f32 %v2604_v13, %v2212_v20  ;;  %v2196_v44 = vmul.f32 %v3786_v62, %v5876_v33  ;;  %v2197_v14 = vmul.f32 %v3786_v62, %v5881_v26 }
 0x416   : > { %3791 = vpow2.f32 %v2681_v49  ;;  %v2663_v52 = vmin.f32 %v6007_v38, 0.0  ;;  %v2664_v22 = vmin.f32 %v6009_v43, 0.0  ;;  %v6022_v35 = vadd.f32 %v5846_v3, %v2193_v0 }
 0x417   : > { %3793 = vpow2.f32 %v2683_v15  ;;  %vm2633_vm0 = vcmp.gt.f32.partialorder %v5990_v21, 0.0  ;;  %v2665_v6 = vmin.f32 %v6011_v32, 0.0  ;;  %v2666_v1 = vmin.f32 %v6013_v5, 0.0 }
 0x418   : > { %3795 = vpow2.f32 %v2685_v55  ;;  %v6029_v33 = vadd.f32 %v5848_v16, %v2194_v47  ;;  %vm2634_vm13 = vcmp.gt.f32.partialorder %v5992_v56, 0.0  ;;  %v2699_v26 = vmul.f32 1.442695, %v2663_v52 }
 0x419   : > { %v2701_v45 = vmul.f32 1.442695, %v2664_v22  ;;  %vm2635_vm2 = vcmp.gt.f32.partialorder %v5994_v48, 0.0  ;;  %vm2636_vm3 = vcmp.gt.f32.partialorder %v5996_v59, 0.0  ;;  %v2703_v3 = vmul.f32 1.442695, %v2665_v6 }
 0x41a   : > { %v2705_v2 = vmul.f32 1.442695, %v2666_v1  ;;  %v2203_v13 = vmul.f32 %v3788_v31, %v5901_v50  ;;  %3797 = vpow2.f32 %v2699_v26  ;;  %v2204_v23 = vmul.f32 %v3788_v31, %v5904_v11 }
 0x41b   : > { %v2205_v9 = vmul.f32 %v3788_v31, %v5907_v41  ;;  %v6038_v16 = vadd.f32 %v5854_v10, %v2195_v18  ;;  %3799 = vpow2.f32 %v2701_v45  ;;  %v6041_v60 = vadd.f32 %v5856_v24, %v2196_v44 }
 0x41c   : > { %v6044_v62 = vadd.f32 %v5862_v12, %v2197_v14  ;;  %v6047_v36 = vadd.f32 %v5864_v34, %v2198_v25  ;;  %3801 = vpow2.f32 %v2703_v3  ;;  %v2206_v11 = vmul.f32 %v3788_v31, %v5919_v51 }
 0x41d   : > { %v2207_v10 = vmul.f32 %v3788_v31, %v5932_v63  ;;  %3803 = vpow2.f32 %v2705_v2  ;;  %v2208_v24 = vmul.f32 %v3788_v31, %v5941_v58  ;;  %v6053_v39 = vadd.f32 %v5850_v37, %v2203_v13 }
 0x41e   : > { %vm2643_vm4 = vcmp.gt.f32.partialorder %v6007_v38, 0.0  ;;  %v6060_v51 = vadd.f32 %v5852_v53, %v2204_v23  ;;  %v6063_v63 = vadd.f32 %v5858_v8, %v2205_v9  ;;  %v2648_v53 = vmin.f32 %v6029_v33, 0.0 }
 0x41f   : > { %v3790_v54 = vpop.eup %3789  ;;  %v6080_v19 = vadd.f32 %v5860_v46, %v2206_v11  ;;  %v2649_v28 = vmin.f32 %v6038_v16, 0.0  ;;  %v2650_v42 = vmin.f32 %v6041_v60, 0.0  ;;  %vm2644_vm5 = vcmp.gt.f32.partialorder %v6009_v43, 0.0 }
 0x420   : > { %v3792_v50 = vpop.eup %3791  ;;  %v2885_v61 = vadd.f32 -1.0, %v3790_v54  ;;  %v6090_v40 = vadd.f32 %v5982_v27, %v2207_v10  ;;  %v2651_v49 = vmin.f32 %v6044_v62, 0.0  ;;  %vm2645_vm6 = vcmp.gt.f32.partialorder %v6011_v32, 0.0 }
 0x421   : > { %v3794_v41 = vpop.eup %3793  ;;  %v2886_v17 = vadd.f32 -1.0, %v3792_v50  ;;  %v6096_v46 = vadd.f32 %v5984_v29, %v2208_v24  ;;  %v2657_v15 = vmin.f32 %v6053_v39, 0.0  ;;  %v2669_v31 = vmul.f32 1.442695, %v2648_v53 }
 0x422   : > { %v3796_v12 = vpop.eup %3795  ;;  %v2733_v34 = vsel %vm2633_vm0, %v5990_v21, %v2885_v61  ;;  %v2887_v4 = vadd.f32 -1.0, %v3794_v41  ;;  %v2647_v21 = vmin.f32 %v6022_v35, 0.0  ;;  %v2671_v0 = vmul.f32 1.442695, %v2649_v28 }
 0x423   : > { %2753 = vst [vmem:[%s6067_s15 + $0x30] sm:$0xff] %v2733_v34  ;;  %v2734_v37 = vsel %vm2634_vm13, %v5992_v56, %v2886_v17  ;;  %v2888_v58 = vadd.f32 -1.0, %v3796_v12  ;;  %v2659_v27 = vmin.f32 %v6063_v63, 0.0  ;;  %v2660_v30 = vmin.f32 %v6080_v19, 0.0 }
 0x424   : > { %2754 = vst [vmem:[%s6067_s15 + $0x38] sm:$0xff] %v2734_v37  ;;  %v2735_v8 = vsel %vm2635_vm2, %v5994_v48, %v2887_v4  ;;  %v2652_v48 = vmin.f32 %v6047_v36, 0.0  ;;  %v2667_v55 = vmul.f32 1.442695, %v2647_v21  ;;  %v3798_v57 = vpop.eup %3797  ;;  %v2673_v7 = vmul.f32 1.442695, %v2650_v42 }
 0x425   : > { %2755 = vst [vmem:[%s6067_s15 + $0x40] sm:$0xff] %v2735_v8  ;;  %v2736_v56 = vsel %vm2636_vm3, %v5996_v59, %v2888_v58  ;;  %v2658_v59 = vmin.f32 %v6060_v51, 0.0  ;;  %v3800_v20 = vpop.eup %3799  ;;  %v2895_v47 = vadd.f32 -1.0, %v3798_v57  ;;  %v2661_v29 = vmin.f32 %v6090_v40, 0.0 }
 0x426   : > { %2756 = vst [vmem:[%s6067_s15 + $0x48] sm:$0xff] %v2736_v56  ;;  %3805 = vpow2.f32 %v2667_v55  ;;  %v2675_v18 = vmul.f32 1.442695, %v2651_v49  ;;  %v3802_v44 = vpop.eup %3801  ;;  %v2896_v14 = vadd.f32 -1.0, %v3800_v20  ;;  %v2662_v52 = vmin.f32 %v6096_v46, 0.0 }
 0x427   : > { %3807 = vpow2.f32 %v2669_v31  ;;  %v2677_v22 = vmul.f32 1.442695, %v2652_v48  ;;  %v3804_v25 = vpop.eup %3803  ;;  %v2743_v6 = vsel %vm2643_vm4, %v6007_v38, %v2895_v47  ;;  %v2897_v1 = vadd.f32 -1.0, %v3802_v44 }
 0x428   : > { %3809 = vpow2.f32 %v2671_v0  ;;  %v2687_v26 = vmul.f32 1.442695, %v2657_v15  ;;  %2763 = vst [vmem:[%s6067_s15 + $0x80] sm:$0xff] %v2743_v6  ;;  %v2744_v45 = vsel %vm2644_vm5, %v6009_v43, %v2896_v14  ;;  %v2898_v3 = vadd.f32 -1.0, %v3804_v25 }
 0x429   : > { %3811 = vpow2.f32 %v2673_v7  ;;  %v2689_v2 = vmul.f32 1.442695, %v2658_v59  ;;  %2764 = vst [vmem:[%s6067_s15 + $0x88] sm:$0xff] %v2744_v45  ;;  %v2745_v13 = vsel %vm2645_vm6, %v6011_v32, %v2897_v1  ;;  %vm2646_vm9 = vcmp.gt.f32.partialorder %v6013_v5, 0.0 }
 0x42a   : > { %3813 = vpow2.f32 %v2675_v18  ;;  %v2691_v38 = vmul.f32 1.442695, %v2659_v27  ;;  %2765 = vst [vmem:[%s6067_s15 + $0x90] sm:$0xff] %v2745_v13  ;;  %v2746_v23 = vsel %vm2646_vm9, %v6013_v5, %v2898_v3  ;;  %v2693_v9 = vmul.f32 1.442695, %v2660_v30 }
 0x42b   : > { %3815 = vpow2.f32 %v2677_v22  ;;  %2766 = vst [vmem:[%s6067_s15 + $0x98] sm:$0xff] %v2746_v23  ;;  %v2695_v43 = vmul.f32 1.442695, %v2661_v29  ;;  %v2697_v54 = vmul.f32 1.442695, %v2662_v52  ;;  %vm2627_vm11 = vcmp.gt.f32.partialorder %v6022_v35, 0.0 }
 0x42c   : > { %3817 = vpow2.f32 %v2687_v26  ;;  %vm2628_vm10 = vcmp.gt.f32.partialorder %v6029_v33, 0.0  ;;  %vm2629_vm8 = vcmp.gt.f32.partialorder %v6038_v16, 0.0  ;;  %vm2630_vm14 = vcmp.gt.f32.partialorder %v6041_v60, 0.0 }
 0x42d   : > { %3819 = vpow2.f32 %v2689_v2  ;;  %vm2631_vm7 = vcmp.gt.f32.partialorder %v6044_v62, 0.0  ;;  %vm2632_vm15 = vcmp.gt.f32.partialorder %v6047_v36, 0.0  ;;  %vm2637_vm1 = vcmp.gt.f32.partialorder %v6053_v39, 0.0 }
 0x42e   : > { %3821 = vpow2.f32 %v2691_v38  ;;  %vm2638_vm12 = vcmp.gt.f32.partialorder %v6060_v51, 0.0  ;;  %vm2639_vm0 = vcmp.gt.f32.partialorder %v6063_v63, 0.0  ;;  %vm2640_vm13 = vcmp.gt.f32.partialorder %v6080_v19, 0.0 }
 0x42f   : > { %3823 = vpow2.f32 %v2693_v9  ;;  %vm2641_vm2 = vcmp.gt.f32.partialorder %v6090_v40, 0.0  ;;  %vm2642_vm3 = vcmp.gt.f32.partialorder %v6096_v46, 0.0 }
 0x430   : > { %v3806_v50 = vpop.eup %3805  ;;  %3825 = vpow2.f32 %v2695_v43 }
 0x431   : > { %v3808_v32 = vpop.eup %3807  ;;  %3827 = vpow2.f32 %v2697_v54  ;;  %v2879_v61 = vadd.f32 -1.0, %v3806_v50 }
 0x432   : > { %v3810_v11 = vpop.eup %3809  ;;  %v2880_v5 = vadd.f32 -1.0, %v3808_v32 }
 0x433   : > { %v3812_v10 = vpop.eup %3811  ;;  %v2881_v41 = vadd.f32 -1.0, %v3810_v11  ;;  %v2727_v17 = vsel %vm2627_vm11, %v6022_v35, %v2879_v61 }
 0x434   : > { %v3814_v24 = vpop.eup %3813  ;;  %v2882_v12 = vadd.f32 -1.0, %v3812_v10  ;;  %v2728_v34 = vsel %vm2628_vm10, %v6029_v33, %v2880_v5  ;;  %2747 = vst [vmem:[%s6067_s15] sm:$0xff] %v2727_v17 }
 0x435   : > { %v3816_v4 = vpop.eup %3815  ;;  %v2883_v37 = vadd.f32 -1.0, %v3814_v24  ;;  %v2729_v58 = vsel %vm2629_vm8, %v6038_v16, %v2881_v41  ;;  %2748 = vst [vmem:[%s6067_s15 + $0x8] sm:$0xff] %v2728_v34 }
 0x436   : > { %v3818_v21 = vpop.eup %3817  ;;  %v2884_v35 = vadd.f32 -1.0, %v3816_v4  ;;  %v2730_v53 = vsel %vm2630_vm14, %v6041_v60, %v2882_v12  ;;  %2749 = vst [vmem:[%s6067_s15 + $0x10] sm:$0xff] %v2729_v58 }
 0x437   : > { %v3820_v33 = vpop.eup %3819  ;;  %v2889_v8 = vadd.f32 -1.0, %v3818_v21  ;;  %v2731_v28 = vsel %vm2631_vm7, %v6044_v62, %v2883_v37  ;;  %2750 = vst [vmem:[%s6067_s15 + $0x18] sm:$0xff] %v2730_v53 }
 0x438   : > { %v3822_v16 = vpop.eup %3821  ;;  %v2890_v42 = vadd.f32 -1.0, %v3820_v33  ;;  %v2732_v56 = vsel %vm2632_vm15, %v6047_v36, %v2884_v35  ;;  %2751 = vst [vmem:[%s6067_s15 + $0x20] sm:$0xff] %v2731_v28 }
 0x439   : > { %v3824_v60 = vpop.eup %3823  ;;  %v2891_v49 = vadd.f32 -1.0, %v3822_v16  ;;  %v2737_v48 = vsel %vm2637_vm1, %v6053_v39, %v2889_v8  ;;  %2752 = vst [vmem:[%s6067_s15 + $0x28] sm:$0xff] %v2732_v56 }
 0x43a   : > { %v3826_v62 = vpop.eup %3825  ;;  %v2892_v15 = vadd.f32 -1.0, %v3824_v60  ;;  %v2738_v55 = vsel %vm2638_vm12, %v6060_v51, %v2890_v42  ;;  %2757 = vst [vmem:[%s6067_s15 + $0x50] sm:$0xff] %v2737_v48 }
 0x43b   : > { %v3828_v36 = vpop.eup %3827  ;;  %v2893_v31 = vadd.f32 -1.0, %v3826_v62  ;;  %v2739_v39 = vsel %vm2639_vm0, %v6063_v63, %v2891_v49  ;;  %2758 = vst [vmem:[%s6067_s15 + $0x58] sm:$0xff] %v2738_v55 }
 0x43c   : > { %v2894_v0 = vadd.f32 -1.0, %v3828_v36  ;;  %v2740_v57 = vsel %vm2640_vm13, %v6080_v19, %v2892_v15  ;;  %2759 = vst [vmem:[%s6067_s15 + $0x60] sm:$0xff] %v2739_v39 }
 0x43d   : > { %v2741_v51 = vsel %vm2641_vm2, %v6090_v40, %v2893_v31  ;;  %2760 = vst [vmem:[%s6067_s15 + $0x68] sm:$0xff] %v2740_v57 }
 0x43e   : > { %v2742_v63 = vsel %vm2642_vm3, %v6096_v46, %v2894_v0  ;;  %2761 = vst [vmem:[%s6067_s15 + $0x70] sm:$0xff] %v2741_v51 }
 0x43f   : > { %2762 = vst [vmem:[%s6067_s15 + $0x78] sm:$0xff] %v2742_v63 }
 0x440   : > { %3881 = shalt.err (!%p3878_p4)
}
 0x441   : > { %s3882_s16 = scalar_lea.hbm %s6155_s26, 2560  ;;  %s3886_s27 = scalar_lea.hbm %s6212_s5, 5120 }
 0x442   : > { %p3883_p7 = scmp.ne.s32.totalorder %s6155_s26, %s3882_s16  ;;  %p3887_p0 = scmp.lt.u32.totalorder %s6155_s26, %s6212_s5 }
 0x443   : > { %p3888_p1 = scmp.lt.u32.totalorder %s3886_s27, %s3882_s16  ;;  %p3890_p6 = scmp.lt.u32.totalorder %s3882_s16, %s6155_s26 }
 0x444   : > { %p3884_p8 = pnand %p3883_p7, %p6658_p11 }
 0x445   : > { %p3889_p3 = por %p3888_p1, %p3887_p0 }
 0x446   : > { %p3885_p9 = pneg %p3884_p8 }
 0x447   : > { %p3891_p12 = por %p3890_p6, %p3889_p3 }
 0x449   : > { %p3892_p13 = pnand %p3891_p12, %p3885_p9 }
 0x44b   : > { %3895 = shalt.err (!%p3892_p13)
}
 0x44c   : > { %s3966_s11 = smov 1280   ;;  %s3967_s28 = smov 80  }
 0x44d   : > { %3169 = dma.vmem_to_hbm [thread:$0]  (%p6658_p11), %s6157_s25, 2560, %s6155_s26, %s2768_s7, %s3966_s11, %s3966_s11, %s3967_s28  }
 0x44e PF: > { %s2796_s12 = sand.u32 1, %s3922_s18   ;;  %p6659_p5 = scmp.ne.s32.totalorder %s6379_s30, 0 }
 0x44f   : > { %p6660_p10 = scmp.ge.s32.totalorder %s3934_s21, 2  ;;  %s2797_s14 = scalar_lea.sflag [#allocation5], %s2796_s12 }
 0x451   : > { %p3176_p2 = pnand %p6660_p10, %p6659_p5 }
 0x453   : > { %3917 = dma.done.wait (!%p3176_p2), %s2797_s14, 2560  }
 0x454   : > { %3919 = vsyncadd (!%p3176_p2), %s2797_s14, 4294964736  ;;  %s6661_s21 = sld [smem:[#allocation11_spill]]  ;;  %s6662_s18 = sld [smem:[#allocation9_spill]] }
 0x455   : > { %s6663_s19 = sld [smem:[#allocation10_spill]]  ;;  %s6664_s20 = sld [smem:[#allocation12_spill]] }
 0x45a   : > { %p18_p4 = scmp.ge.s32.totalorder %s6661_s21, 4  }
 0x45c   :  { %20 = sbr.rel (!%p18_p4) target bundleno = 7 (0x7), region = 85 }
 0x463   :  { %2802 = vsyncpa [#allocation4], 1 }
 0x464   :  { %2804 = vsyncpa [#allocation4 + $0x1], 1 }
 0x465   :  { %2805 = vsyncpa [#allocation5], 1 }
 0x466   :  { %2807 = vsyncpa [#allocation5 + $0x1], 1 }

</bundles_post_ra>
